<compile_context>
chip_gen: v7x
topology: tpu7x:2x2x1
jax: 0.10.0
libtpu: 0.0.40
codegen_flags: <defaults>
</compile_context>

<pallas_src>
import functools

import jax
import jax.numpy as jnp
from jax.experimental import pallas as pl
from jax.experimental.pallas import tpu as pltpu


def _rep_spec(shape):
    """Full-array BlockSpec, same block for every grid index."""
    r = len(shape)
    return pl.BlockSpec(shape, lambda *_, _r=r: (0,) * _r)


def make_attention_kernel(num_heads, scale):
    def attention_kernel(x_ref, wq_ref, wk_ref, wv_ref, wp_ref, bp_ref, o_ref):
        x = x_ref[0]                                                  # (N, C) f32
        acc = jnp.zeros(x.shape, jnp.float32)
        for h in range(num_heads):                                    # static unroll (H is small)
            # Leading-axis (sublane-free) weight indexing: no lane relayouts.
            qh = jnp.dot(x, wq_ref[h], preferred_element_type=jnp.float32)   # (N, hd)
            kh = jnp.dot(x, wk_ref[h], preferred_element_type=jnp.float32)   # (N, hd)
            vh = jnp.dot(x, wv_ref[h], preferred_element_type=jnp.float32)   # (N, hd)
            s = jax.lax.dot_general(qh, kh, (((1,), (1,)), ((), ())),
                                    preferred_element_type=jnp.float32) * scale  # (N, N)
            s = s - jnp.max(s, axis=-1, keepdims=True)
            p = jnp.exp(s)
            p = p * pl.reciprocal(jnp.sum(p, axis=-1, keepdims=True), approx=True)
            oh = jnp.dot(p, vh, preferred_element_type=jnp.float32)           # (N, hd)
            # Fold "concat heads -> proj" into per-head accumulation.
            acc = acc + jnp.dot(oh, wp_ref[h], preferred_element_type=jnp.float32)  # (N, C)
        o_ref[0] = acc + bp_ref[...]                                  # bias broadcast, lane-dense store
    return attention_kernel


def attention_pallas(x, w_qkv, w_proj, b_proj, num_heads):
    """x: (B, N, C); w_qkv: (C, 3C) (x @ w_qkv == PyTorch qkv(x), qkv_bias=False);
    w_proj: (C, C) (heads_concat @ w_proj == PyTorch proj(.) pre-bias); b_proj: (C,)."""
    B, N, C = x.shape
    hd = C // num_heads
    scale = hd ** -0.5

    # Wrapper-side layout plumbing: split heads on the WEIGHTS, not on activations.
    w3 = w_qkv.reshape(C, 3, num_heads, hd)              # columns laid out as (3, H, hd)
    wq = jnp.transpose(w3[:, 0], (1, 0, 2))              # (H, C, hd)
    wk = jnp.transpose(w3[:, 1], (1, 0, 2))              # (H, C, hd)
    wv = jnp.transpose(w3[:, 2], (1, 0, 2))              # (H, C, hd)
    wp = w_proj.reshape(num_heads, hd, C)                # (H, hd, C)  (rows are head-major)
    bp = b_proj.reshape(1, C)

    kern = make_attention_kernel(num_heads, scale)
    xspec = pl.BlockSpec((1, N, C), lambda b: (b, 0, 0))
    return pl.pallas_call(
        kern,
        out_shape=jax.ShapeDtypeStruct((B, N, C), jnp.float32),
        grid=(B,),
        in_specs=[xspec, _rep_spec(wq.shape), _rep_spec(wk.shape),
                  _rep_spec(wv.shape), _rep_spec(wp.shape), _rep_spec(bp.shape)],
        out_specs=xspec,
        compiler_params=pltpu.CompilerParams(dimension_semantics=("parallel",)),
    )(x, wq, wk, wv, wp, bp)


# ----------------------------- pure-JAX reference (PyTorch semantics) ----------
def attention_reference(x, w_qkv, w_proj, b_proj, num_heads):
    B, N, C = x.shape
    hd = C // num_heads
    scale = hd ** -0.5
    qkv = x @ w_qkv                                                   # (B, N, 3C)
    qkv = qkv.reshape(B, N, 3, num_heads, hd).transpose(2, 0, 3, 1, 4)
    q, k, v = qkv[0], qkv[1], qkv[2]                                  # (B, H, N, hd)
    attn = (q @ jnp.swapaxes(k, -2, -1)) * scale
    attn = jax.nn.softmax(attn, axis=-1)                              # dropout = identity (eval)
    out = (attn @ v).transpose(0, 2, 1, 3).reshape(B, N, C)
    return out @ w_proj + b_proj


# ----------------------------- main --------------------------------------------
if __name__ == "__main__":
    B, N, C, H = 2, 128, 128, 4                                       # dim=128, num_heads=4, head_dim=32
    key = jax.random.PRNGKey(0)
    kx, kqkv, kproj, kb = jax.random.split(key, 4)
    x = jax.random.normal(kx, (B, N, C), dtype=jnp.float32)
    w_qkv = 0.05 * jax.random.normal(kqkv, (C, 3 * C), dtype=jnp.float32)   # qkv_bias=False
    w_proj = 0.05 * jax.random.normal(kproj, (C, C), dtype=jnp.float32)
    b_proj = 0.05 * jax.random.normal(kb, (C,), dtype=jnp.float32)

    fwd = jax.jit(functools.partial(attention_pallas, num_heads=H))
    out = jax.block_until_ready(fwd(x, w_qkv, w_proj, b_proj))

    ref = attention_reference(x, w_qkv, w_proj, b_proj, H)
    assert out.shape == (B, N, C) and out.dtype == jnp.float32
    assert bool(jnp.all(jnp.isfinite(out)))
    assert bool(jnp.max(jnp.abs(out - ref)) < 1e-2), float(jnp.max(jnp.abs(out - ref)))
    print("KERNEL_OK")
</pallas_src>

<mosaic_0001>
module attributes {stable_mosaic.version = 11 : i64} {
  func.func @attention_kernel(%arg0: i32, %arg1: memref<1x128x128xf32, #tpu.memory_space<vmem>>, %arg2: memref<4x128x32xf32, #tpu.memory_space<vmem>>, %arg3: memref<4x128x32xf32, #tpu.memory_space<vmem>>, %arg4: memref<4x128x32xf32, #tpu.memory_space<vmem>>, %arg5: memref<4x32x128xf32, #tpu.memory_space<vmem>>, %arg6: memref<1x128xf32, #tpu.memory_space<vmem>>, %arg7: memref<1x128x128xf32, #tpu.memory_space<vmem>>) attributes {dimension_semantics = [#tpu.dimension_semantics<parallel>], iteration_bounds = array<i64: 2>, scalar_prefetch = 0 : i64, scratch_operands = 0 : i64, tpu.core_type = #tpu.core_type<tc>, window_params = [{transform_indices = @transform_0, window_bounds = array<i64: 1, 128, 128>}, {pipeline_mode = #tpu.pipeline_mode<synchronous>, transform_indices = @transform_1, window_bounds = array<i64: 4, 128, 32>}, {pipeline_mode = #tpu.pipeline_mode<synchronous>, transform_indices = @transform_2, window_bounds = array<i64: 4, 128, 32>}, {pipeline_mode = #tpu.pipeline_mode<synchronous>, transform_indices = @transform_3, window_bounds = array<i64: 4, 128, 32>}, {pipeline_mode = #tpu.pipeline_mode<synchronous>, transform_indices = @transform_4, window_bounds = array<i64: 4, 32, 128>}, {pipeline_mode = #tpu.pipeline_mode<synchronous>, transform_indices = @transform_5, window_bounds = array<i64: 1, 128>}, {transform_indices = @transform_6, window_bounds = array<i64: 1, 128, 128>}]} {
    %c0 = arith.constant 0 : index
    %c0_0 = arith.constant 0 : index
    %c0_1 = arith.constant 0 : index
    %0 = vector.load %arg1[%c0, %c0_0, %c0_1] : memref<1x128x128xf32, #tpu.memory_space<vmem>>, vector<1x128x128xf32>
    %1 = vector.shape_cast %0 : vector<1x128x128xf32> to vector<128x128xf32>
    %cst = arith.constant 0.000000e+00 : f32
    %2 = vector.broadcast %cst : f32 to vector<128x128xf32>
    %c0_2 = arith.constant 0 : index
    %c0_3 = arith.constant 0 : index
    %c0_4 = arith.constant 0 : index
    %3 = vector.load %arg2[%c0_2, %c0_3, %c0_4] : memref<4x128x32xf32, #tpu.memory_space<vmem>>, vector<1x128x32xf32>
    %4 = vector.shape_cast %3 : vector<1x128x32xf32> to vector<128x32xf32>
    %cst_5 = arith.constant dense<0.000000e+00> : vector<128x32xf32>
    %5 = tpu.matmul %1, %4, %cst_5 {dimension_numbers = #tpu.dot_dimension_numbers<[1], [0], [0], [1], [0, 0, 1, 1], [], []>} : vector<128x128xf32>, vector<128x32xf32>, vector<128x32xf32> -> vector<128x32xf32>
    %c0_6 = arith.constant 0 : index
    %c0_7 = arith.constant 0 : index
    %c0_8 = arith.constant 0 : index
    %6 = vector.load %arg3[%c0_6, %c0_7, %c0_8] : memref<4x128x32xf32, #tpu.memory_space<vmem>>, vector<1x128x32xf32>
    %7 = vector.shape_cast %6 : vector<1x128x32xf32> to vector<128x32xf32>
    %cst_9 = arith.constant dense<0.000000e+00> : vector<128x32xf32>
    %8 = tpu.matmul %1, %7, %cst_9 {dimension_numbers = #tpu.dot_dimension_numbers<[1], [0], [0], [1], [0, 0, 1, 1], [], []>} : vector<128x128xf32>, vector<128x32xf32>, vector<128x32xf32> -> vector<128x32xf32>
    %c0_10 = arith.constant 0 : index
    %c0_11 = arith.constant 0 : index
    %c0_12 = arith.constant 0 : index
    %9 = vector.load %arg4[%c0_10, %c0_11, %c0_12] : memref<4x128x32xf32, #tpu.memory_space<vmem>>, vector<1x128x32xf32>
    %10 = vector.shape_cast %9 : vector<1x128x32xf32> to vector<128x32xf32>
    %cst_13 = arith.constant dense<0.000000e+00> : vector<128x32xf32>
    %11 = tpu.matmul %1, %10, %cst_13 {dimension_numbers = #tpu.dot_dimension_numbers<[1], [0], [0], [1], [0, 0, 1, 1], [], []>} : vector<128x128xf32>, vector<128x32xf32>, vector<128x32xf32> -> vector<128x32xf32>
    %cst_14 = arith.constant dense<0.000000e+00> : vector<128x128xf32>
    %12 = tpu.matmul %5, %8, %cst_14 {dimension_numbers = #tpu.dot_dimension_numbers<[1], [1], [0], [0], [0, 0, 1, 0], [], []>} : vector<128x32xf32>, vector<128x32xf32>, vector<128x128xf32> -> vector<128x128xf32>
    %cst_15 = arith.constant 0.176776692 : f32
    %13 = vector.broadcast %cst_15 : f32 to vector<128x128xf32>
    %14 = arith.mulf %12, %13 : vector<128x128xf32>
    %cst_16 = arith.constant dense<0xFF800000> : vector<128xf32>
    %15 = vector.multi_reduction <maximumf>, %14, %cst_16 [1] : vector<128x128xf32> to vector<128xf32>
    %16 = vector.shape_cast %15 : vector<128xf32> to vector<128x1xf32>
    %17 = vector.broadcast %16 : vector<128x1xf32> to vector<128x128xf32>
    %18 = arith.subf %14, %17 : vector<128x128xf32>
    %19 = math.exp %18 : vector<128x128xf32>
    %cst_17 = arith.constant dense<0.000000e+00> : vector<128xf32>
    %20 = vector.multi_reduction <add>, %19, %cst_17 [1] : vector<128x128xf32> to vector<128xf32>
    %21 = vector.shape_cast %20 : vector<128xf32> to vector<128x1xf32>
    %22 = tpu.reciprocal %21 {approx = true} : vector<128x1xf32> -> vector<128x1xf32>
    %23 = vector.broadcast %22 : vector<128x1xf32> to vector<128x128xf32>
    %24 = arith.mulf %19, %23 : vector<128x128xf32>
    %cst_18 = arith.constant dense<0.000000e+00> : vector<128x32xf32>
    %25 = tpu.matmul %24, %11, %cst_18 {dimension_numbers = #tpu.dot_dimension_numbers<[1], [0], [0], [1], [0, 0, 1, 1], [], []>} : vector<128x128xf32>, vector<128x32xf32>, vector<128x32xf32> -> vector<128x32xf32>
    %c0_19 = arith.constant 0 : index
    %c0_20 = arith.constant 0 : index
    %c0_21 = arith.constant 0 : index
    %26 = vector.load %arg5[%c0_19, %c0_20, %c0_21] : memref<4x32x128xf32, #tpu.memory_space<vmem>>, vector<1x32x128xf32>
    %27 = vector.shape_cast %26 : vector<1x32x128xf32> to vector<32x128xf32>
    %cst_22 = arith.constant dense<0.000000e+00> : vector<128x128xf32>
    %28 = tpu.matmul %25, %27, %cst_22 {dimension_numbers = #tpu.dot_dimension_numbers<[1], [0], [0], [1], [0, 0, 1, 1], [], []>} : vector<128x32xf32>, vector<32x128xf32>, vector<128x128xf32> -> vector<128x128xf32>
    %29 = arith.addf %2, %28 : vector<128x128xf32>
    %c1 = arith.constant 1 : index
    %c0_23 = arith.constant 0 : index
    %c0_24 = arith.constant 0 : index
    %30 = vector.load %arg2[%c1, %c0_23, %c0_24] : memref<4x128x32xf32, #tpu.memory_space<vmem>>, vector<1x128x32xf32>
    %31 = vector.shape_cast %30 : vector<1x128x32xf32> to vector<128x32xf32>
    %cst_25 = arith.constant dense<0.000000e+00> : vector<128x32xf32>
    %32 = tpu.matmul %1, %31, %cst_25 {dimension_numbers = #tpu.dot_dimension_numbers<[1], [0], [0], [1], [0, 0, 1, 1], [], []>} : vector<128x128xf32>, vector<128x32xf32>, vector<128x32xf32> -> vector<128x32xf32>
    %c1_26 = arith.constant 1 : index
    %c0_27 = arith.constant 0 : index
    %c0_28 = arith.constant 0 : index
    %33 = vector.load %arg3[%c1_26, %c0_27, %c0_28] : memref<4x128x32xf32, #tpu.memory_space<vmem>>, vector<1x128x32xf32>
    %34 = vector.shape_cast %33 : vector<1x128x32xf32> to vector<128x32xf32>
    %cst_29 = arith.constant dense<0.000000e+00> : vector<128x32xf32>
    %35 = tpu.matmul %1, %34, %cst_29 {dimension_numbers = #tpu.dot_dimension_numbers<[1], [0], [0], [1], [0, 0, 1, 1], [], []>} : vector<128x128xf32>, vector<128x32xf32>, vector<128x32xf32> -> vector<128x32xf32>
    %c1_30 = arith.constant 1 : index
    %c0_31 = arith.constant 0 : index
    %c0_32 = arith.constant 0 : index
    %36 = vector.load %arg4[%c1_30, %c0_31, %c0_32] : memref<4x128x32xf32, #tpu.memory_space<vmem>>, vector<1x128x32xf32>
    %37 = vector.shape_cast %36 : vector<1x128x32xf32> to vector<128x32xf32>
    %cst_33 = arith.constant dense<0.000000e+00> : vector<128x32xf32>
    %38 = tpu.matmul %1, %37, %cst_33 {dimension_numbers = #tpu.dot_dimension_numbers<[1], [0], [0], [1], [0, 0, 1, 1], [], []>} : vector<128x128xf32>, vector<128x32xf32>, vector<128x32xf32> -> vector<128x32xf32>
    %cst_34 = arith.constant dense<0.000000e+00> : vector<128x128xf32>
    %39 = tpu.matmul %32, %35, %cst_34 {dimension_numbers = #tpu.dot_dimension_numbers<[1], [1], [0], [0], [0, 0, 1, 0], [], []>} : vector<128x32xf32>, vector<128x32xf32>, vector<128x128xf32> -> vector<128x128xf32>
    %cst_35 = arith.constant 0.176776692 : f32
    %40 = vector.broadcast %cst_35 : f32 to vector<128x128xf32>
    %41 = arith.mulf %39, %40 : vector<128x128xf32>
    %cst_36 = arith.constant dense<0xFF800000> : vector<128xf32>
    %42 = vector.multi_reduction <maximumf>, %41, %cst_36 [1] : vector<128x128xf32> to vector<128xf32>
    %43 = vector.shape_cast %42 : vector<128xf32> to vector<128x1xf32>
    %44 = vector.broadcast %43 : vector<128x1xf32> to vector<128x128xf32>
    %45 = arith.subf %41, %44 : vector<128x128xf32>
    %46 = math.exp %45 : vector<128x128xf32>
    %cst_37 = arith.constant dense<0.000000e+00> : vector<128xf32>
    %47 = vector.multi_reduction <add>, %46, %cst_37 [1] : vector<128x128xf32> to vector<128xf32>
    %48 = vector.shape_cast %47 : vector<128xf32> to vector<128x1xf32>
    %49 = tpu.reciprocal %48 {approx = true} : vector<128x1xf32> -> vector<128x1xf32>
    %50 = vector.broadcast %49 : vector<128x1xf32> to vector<128x128xf32>
    %51 = arith.mulf %46, %50 : vector<128x128xf32>
    %cst_38 = arith.constant dense<0.000000e+00> : vector<128x32xf32>
    %52 = tpu.matmul %51, %38, %cst_38 {dimension_numbers = #tpu.dot_dimension_numbers<[1], [0], [0], [1], [0, 0, 1, 1], [], []>} : vector<128x128xf32>, vector<128x32xf32>, vector<128x32xf32> -> vector<128x32xf32>
    %c1_39 = arith.constant 1 : index
    %c0_40 = arith.constant 0 : index
    %c0_41 = arith.constant 0 : index
    %53 = vector.load %arg5[%c1_39, %c0_40, %c0_41] : memref<4x32x128xf32, #tpu.memory_space<vmem>>, vector<1x32x128xf32>
    %54 = vector.shape_cast %53 : vector<1x32x128xf32> to vector<32x128xf32>
    %cst_42 = arith.constant dense<0.000000e+00> : vector<128x128xf32>
    %55 = tpu.matmul %52, %54, %cst_42 {dimension_numbers = #tpu.dot_dimension_numbers<[1], [0], [0], [1], [0, 0, 1, 1], [], []>} : vector<128x32xf32>, vector<32x128xf32>, vector<128x128xf32> -> vector<128x128xf32>
    %56 = arith.addf %29, %55 : vector<128x128xf32>
    %c2 = arith.constant 2 : index
    %c0_43 = arith.constant 0 : index
    %c0_44 = arith.constant 0 : index
    %57 = vector.load %arg2[%c2, %c0_43, %c0_44] : memref<4x128x32xf32, #tpu.memory_space<vmem>>, vector<1x128x32xf32>
    %58 = vector.shape_cast %57 : vector<1x128x32xf32> to vector<128x32xf32>
    %cst_45 = arith.constant dense<0.000000e+00> : vector<128x32xf32>
    %59 = tpu.matmul %1, %58, %cst_45 {dimension_numbers = #tpu.dot_dimension_numbers<[1], [0], [0], [1], [0, 0, 1, 1], [], []>} : vector<128x128xf32>, vector<128x32xf32>, vector<128x32xf32> -> vector<128x32xf32>
    %c2_46 = arith.constant 2 : index
    %c0_47 = arith.constant 0 : index
    %c0_48 = arith.constant 0 : index
    %60 = vector.load %arg3[%c2_46, %c0_47, %c0_48] : memref<4x128x32xf32, #tpu.memory_space<vmem>>, vector<1x128x32xf32>
    %61 = vector.shape_cast %60 : vector<1x128x32xf32> to vector<128x32xf32>
    %cst_49 = arith.constant dense<0.000000e+00> : vector<128x32xf32>
    %62 = tpu.matmul %1, %61, %cst_49 {dimension_numbers = #tpu.dot_dimension_numbers<[1], [0], [0], [1], [0, 0, 1, 1], [], []>} : vector<128x128xf32>, vector<128x32xf32>, vector<128x32xf32> -> vector<128x32xf32>
    %c2_50 = arith.constant 2 : index
    %c0_51 = arith.constant 0 : index
    %c0_52 = arith.constant 0 : index
    %63 = vector.load %arg4[%c2_50, %c0_51, %c0_52] : memref<4x128x32xf32, #tpu.memory_space<vmem>>, vector<1x128x32xf32>
    %64 = vector.shape_cast %63 : vector<1x128x32xf32> to vector<128x32xf32>
    %cst_53 = arith.constant dense<0.000000e+00> : vector<128x32xf32>
    %65 = tpu.matmul %1, %64, %cst_53 {dimension_numbers = #tpu.dot_dimension_numbers<[1], [0], [0], [1], [0, 0, 1, 1], [], []>} : vector<128x128xf32>, vector<128x32xf32>, vector<128x32xf32> -> vector<128x32xf32>
    %cst_54 = arith.constant dense<0.000000e+00> : vector<128x128xf32>
    %66 = tpu.matmul %59, %62, %cst_54 {dimension_numbers = #tpu.dot_dimension_numbers<[1], [1], [0], [0], [0, 0, 1, 0], [], []>} : vector<128x32xf32>, vector<128x32xf32>, vector<128x128xf32> -> vector<128x128xf32>
    %cst_55 = arith.constant 0.176776692 : f32
    %67 = vector.broadcast %cst_55 : f32 to vector<128x128xf32>
    %68 = arith.mulf %66, %67 : vector<128x128xf32>
    %cst_56 = arith.constant dense<0xFF800000> : vector<128xf32>
    %69 = vector.multi_reduction <maximumf>, %68, %cst_56 [1] : vector<128x128xf32> to vector<128xf32>
    %70 = vector.shape_cast %69 : vector<128xf32> to vector<128x1xf32>
    %71 = vector.broadcast %70 : vector<128x1xf32> to vector<128x128xf32>
    %72 = arith.subf %68, %71 : vector<128x128xf32>
    %73 = math.exp %72 : vector<128x128xf32>
    %cst_57 = arith.constant dense<0.000000e+00> : vector<128xf32>
    %74 = vector.multi_reduction <add>, %73, %cst_57 [1] : vector<128x128xf32> to vector<128xf32>
    %75 = vector.shape_cast %74 : vector<128xf32> to vector<128x1xf32>
    %76 = tpu.reciprocal %75 {approx = true} : vector<128x1xf32> -> vector<128x1xf32>
    %77 = vector.broadcast %76 : vector<128x1xf32> to vector<128x128xf32>
    %78 = arith.mulf %73, %77 : vector<128x128xf32>
    %cst_58 = arith.constant dense<0.000000e+00> : vector<128x32xf32>
    %79 = tpu.matmul %78, %65, %cst_58 {dimension_numbers = #tpu.dot_dimension_numbers<[1], [0], [0], [1], [0, 0, 1, 1], [], []>} : vector<128x128xf32>, vector<128x32xf32>, vector<128x32xf32> -> vector<128x32xf32>
    %c2_59 = arith.constant 2 : index
    %c0_60 = arith.constant 0 : index
    %c0_61 = arith.constant 0 : index
    %80 = vector.load %arg5[%c2_59, %c0_60, %c0_61] : memref<4x32x128xf32, #tpu.memory_space<vmem>>, vector<1x32x128xf32>
    %81 = vector.shape_cast %80 : vector<1x32x128xf32> to vector<32x128xf32>
    %cst_62 = arith.constant dense<0.000000e+00> : vector<128x128xf32>
    %82 = tpu.matmul %79, %81, %cst_62 {dimension_numbers = #tpu.dot_dimension_numbers<[1], [0], [0], [1], [0, 0, 1, 1], [], []>} : vector<128x32xf32>, vector<32x128xf32>, vector<128x128xf32> -> vector<128x128xf32>
    %83 = arith.addf %56, %82 : vector<128x128xf32>
    %c3 = arith.constant 3 : index
    %c0_63 = arith.constant 0 : index
    %c0_64 = arith.constant 0 : index
    %84 = vector.load %arg2[%c3, %c0_63, %c0_64] : memref<4x128x32xf32, #tpu.memory_space<vmem>>, vector<1x128x32xf32>
    %85 = vector.shape_cast %84 : vector<1x128x32xf32> to vector<128x32xf32>
    %cst_65 = arith.constant dense<0.000000e+00> : vector<128x32xf32>
    %86 = tpu.matmul %1, %85, %cst_65 {dimension_numbers = #tpu.dot_dimension_numbers<[1], [0], [0], [1], [0, 0, 1, 1], [], []>} : vector<128x128xf32>, vector<128x32xf32>, vector<128x32xf32> -> vector<128x32xf32>
    %c3_66 = arith.constant 3 : index
    %c0_67 = arith.constant 0 : index
    %c0_68 = arith.constant 0 : index
    %87 = vector.load %arg3[%c3_66, %c0_67, %c0_68] : memref<4x128x32xf32, #tpu.memory_space<vmem>>, vector<1x128x32xf32>
    %88 = vector.shape_cast %87 : vector<1x128x32xf32> to vector<128x32xf32>
    %cst_69 = arith.constant dense<0.000000e+00> : vector<128x32xf32>
    %89 = tpu.matmul %1, %88, %cst_69 {dimension_numbers = #tpu.dot_dimension_numbers<[1], [0], [0], [1], [0, 0, 1, 1], [], []>} : vector<128x128xf32>, vector<128x32xf32>, vector<128x32xf32> -> vector<128x32xf32>
    %c3_70 = arith.constant 3 : index
    %c0_71 = arith.constant 0 : index
    %c0_72 = arith.constant 0 : index
    %90 = vector.load %arg4[%c3_70, %c0_71, %c0_72] : memref<4x128x32xf32, #tpu.memory_space<vmem>>, vector<1x128x32xf32>
    %91 = vector.shape_cast %90 : vector<1x128x32xf32> to vector<128x32xf32>
    %cst_73 = arith.constant dense<0.000000e+00> : vector<128x32xf32>
    %92 = tpu.matmul %1, %91, %cst_73 {dimension_numbers = #tpu.dot_dimension_numbers<[1], [0], [0], [1], [0, 0, 1, 1], [], []>} : vector<128x128xf32>, vector<128x32xf32>, vector<128x32xf32> -> vector<128x32xf32>
    %cst_74 = arith.constant dense<0.000000e+00> : vector<128x128xf32>
    %93 = tpu.matmul %86, %89, %cst_74 {dimension_numbers = #tpu.dot_dimension_numbers<[1], [1], [0], [0], [0, 0, 1, 0], [], []>} : vector<128x32xf32>, vector<128x32xf32>, vector<128x128xf32> -> vector<128x128xf32>
    %cst_75 = arith.constant 0.176776692 : f32
    %94 = vector.broadcast %cst_75 : f32 to vector<128x128xf32>
    %95 = arith.mulf %93, %94 : vector<128x128xf32>
    %cst_76 = arith.constant dense<0xFF800000> : vector<128xf32>
    %96 = vector.multi_reduction <maximumf>, %95, %cst_76 [1] : vector<128x128xf32> to vector<128xf32>
    %97 = vector.shape_cast %96 : vector<128xf32> to vector<128x1xf32>
    %98 = vector.broadcast %97 : vector<128x1xf32> to vector<128x128xf32>
    %99 = arith.subf %95, %98 : vector<128x128xf32>
    %100 = math.exp %99 : vector<128x128xf32>
    %cst_77 = arith.constant dense<0.000000e+00> : vector<128xf32>
    %101 = vector.multi_reduction <add>, %100, %cst_77 [1] : vector<128x128xf32> to vector<128xf32>
    %102 = vector.shape_cast %101 : vector<128xf32> to vector<128x1xf32>
    %103 = tpu.reciprocal %102 {approx = true} : vector<128x1xf32> -> vector<128x1xf32>
    %104 = vector.broadcast %103 : vector<128x1xf32> to vector<128x128xf32>
    %105 = arith.mulf %100, %104 : vector<128x128xf32>
    %cst_78 = arith.constant dense<0.000000e+00> : vector<128x32xf32>
    %106 = tpu.matmul %105, %92, %cst_78 {dimension_numbers = #tpu.dot_dimension_numbers<[1], [0], [0], [1], [0, 0, 1, 1], [], []>} : vector<128x128xf32>, vector<128x32xf32>, vector<128x32xf32> -> vector<128x32xf32>
    %c3_79 = arith.constant 3 : index
    %c0_80 = arith.constant 0 : index
    %c0_81 = arith.constant 0 : index
    %107 = vector.load %arg5[%c3_79, %c0_80, %c0_81] : memref<4x32x128xf32, #tpu.memory_space<vmem>>, vector<1x32x128xf32>
    %108 = vector.shape_cast %107 : vector<1x32x128xf32> to vector<32x128xf32>
    %cst_82 = arith.constant dense<0.000000e+00> : vector<128x128xf32>
    %109 = tpu.matmul %106, %108, %cst_82 {dimension_numbers = #tpu.dot_dimension_numbers<[1], [0], [0], [1], [0, 0, 1, 1], [], []>} : vector<128x32xf32>, vector<32x128xf32>, vector<128x128xf32> -> vector<128x128xf32>
    %110 = arith.addf %83, %109 : vector<128x128xf32>
    %c0_83 = arith.constant 0 : index
    %c0_84 = arith.constant 0 : index
    %111 = vector.load %arg6[%c0_83, %c0_84] : memref<1x128xf32, #tpu.memory_space<vmem>>, vector<1x128xf32>
    %112 = vector.broadcast %111 : vector<1x128xf32> to vector<128x128xf32>
    %113 = arith.addf %110, %112 : vector<128x128xf32>
    %c0_85 = arith.constant 0 : index
    %c0_86 = arith.constant 0 : index
    %c0_87 = arith.constant 0 : index
    %114 = vector.load %arg7[%c0_85, %c0_86, %c0_87] : memref<1x128x128xf32, #tpu.memory_space<vmem>>, vector<1x128x128xf32>
    %115 = vector.shape_cast %114 : vector<1x128x128xf32> to vector<128x128xf32>
    %116 = vector.shape_cast %113 : vector<128x128xf32> to vector<1x128x128xf32>
    tpu.vector_store %arg7[%c0_85, %c0_86, %c0_87], %116 {strides = array<i32>} : memref<1x128x128xf32, #tpu.memory_space<vmem>>, vector<1x128x128xf32>,
    return
  }
  func.func @transform_0(%arg0: i32) -> (i32, i32, i32) {
    %c0_i32 = arith.constant 0 : i32
    %c0_i32_0 = arith.constant 0 : i32
    %c0_i32_1 = arith.constant 0 : i32
    return %arg0, %c0_i32, %c0_i32_0 : i32, i32, i32
  }
  func.func @transform_1(%arg0: i32) -> (i32, i32, i32) {
    %c0_i32 = arith.constant 0 : i32
    %c0_i32_0 = arith.constant 0 : i32
    %c0_i32_1 = arith.constant 0 : i32
    %c0_i32_2 = arith.constant 0 : i32
    return %c0_i32, %c0_i32_0, %c0_i32_1 : i32, i32, i32
  }
  func.func @transform_2(%arg0: i32) -> (i32, i32, i32) {
    %c0_i32 = arith.constant 0 : i32
    %c0_i32_0 = arith.constant 0 : i32
    %c0_i32_1 = arith.constant 0 : i32
    %c0_i32_2 = arith.constant 0 : i32
    return %c0_i32, %c0_i32_0, %c0_i32_1 : i32, i32, i32
  }
  func.func @transform_3(%arg0: i32) -> (i32, i32, i32) {
    %c0_i32 = arith.constant 0 : i32
    %c0_i32_0 = arith.constant 0 : i32
    %c0_i32_1 = arith.constant 0 : i32
    %c0_i32_2 = arith.constant 0 : i32
    return %c0_i32, %c0_i32_0, %c0_i32_1 : i32, i32, i32
  }
  func.func @transform_4(%arg0: i32) -> (i32, i32, i32) {
    %c0_i32 = arith.constant 0 : i32
    %c0_i32_0 = arith.constant 0 : i32
    %c0_i32_1 = arith.constant 0 : i32
    %c0_i32_2 = arith.constant 0 : i32
    return %c0_i32, %c0_i32_0, %c0_i32_1 : i32, i32, i32
  }
  func.func @transform_5(%arg0: i32) -> (i32, i32) {
    %c0_i32 = arith.constant 0 : i32
    %c0_i32_0 = arith.constant 0 : i32
    %c0_i32_1 = arith.constant 0 : i32
    return %c0_i32, %c0_i32_0 : i32, i32
  }
  func.func @transform_6(%arg0: i32) -> (i32, i32, i32) {
    %c0_i32 = arith.constant 0 : i32
    %c0_i32_0 = arith.constant 0 : i32
    %c0_i32_1 = arith.constant 0 : i32
    return %arg0, %c0_i32, %c0_i32_0 : i32, i32, i32
  }
}

</mosaic_0001>

<bundles_post_ra>
// kernel: attention_pallas.1
= control target key start
LH: loop header
LB: loop body
LE: loop exit
PB: predicated region body
PF: predicated region fallthrough
CT: control target
= control target key end

     0   :  { %11 = vsyncpa [#allocation3], 0  ;;  %s10794_s0 = inlined_call_operand.vmem [shape: f32[2,128,128], index: 0, kind: input, shape index: {}]   ;;  %s10795_s1 = inlined_call_operand.vmem [shape: f32[4,128,32], index: 1, kind: input, shape index: {}]   ;;  %s10796_s2 = inlined_call_operand.vmem [shape: f32[4,128,32], index: 2, kind: input, shape index: {}]   ;;  %s10797_s3 = inlined_call_operand.vmem [shape: f32[4,128,32], index: 3, kind: input, shape index: {}]   ;;  %s10798_s4 = inlined_call_operand.vmem [shape: f32[4,32,128], index: 4, kind: input, shape index: {}]   ;;  %s10799_s5 = inlined_call_operand.vmem [shape: f32[1,128], index: 5, kind: input, shape index: {}]   ;;  %s10800_s6 = inlined_call_operand.hbm [shape: f32[2,128,128], index: 6, kind: output, shape index: {}]  }
   0x1   :  { %13 = vsyncpa [#allocation3 + $0x1], 0  ;;  %s8876_s21 = smov 0   ;;  %s8878_s22 = smov 0  }
   0x2   :  { %s8880_s23 = smov 0   ;;  %s8882_s24 = smov 0  }
   0x3 LB: > { %s8897_s25 = sadd.s32 4294967295, %s8836_s24   ;;  %s5330_s26 = sadd.s32 4294967294, %s8836_s24   ;;  %s8836_s24 = sphi %s8882_s24, %s10808_s24   ;;  %s8832_s23 = sphi %s8880_s23, %s10807_s23   ;;  %s8828_s22 = sphi %s8878_s22, %s10806_s22   ;;  %s8824_s21 = sphi %s8876_s21, %s10805_s21  }
   0x4   : > { %s8901_s27 = sadd.s32 1, %s8836_s24   ;;  %s157_s28 = sadd.s32 1, %s8832_s23 }
   0x5   : > { %s154_s29 = ssub.s32 %s8836_s24, %s8901_s27  ;;  %p167_p0 = scmp.ne.s32.totalorder %s8832_s23, %s8828_s22 }
   0x6   : > { %p155_p1 = scmp.eq.s32.totalorder %s154_s29, 0  ;;  %p168_p2 = scmp.eq.s32.totalorder %s8897_s25, 1 }
   0x7   : > { %p173_p3 = scmp.ne.s32.totalorder %s8828_s22, %s8824_s21  ;;  %p174_p4 = scmp.eq.s32.totalorder %s5330_s26, 1 }
   0x8   : > { %s8912_s30 = scalar_select %p155_p1, %s8832_s23, %s157_s28  }
   0x9   : > { %p8914_p5 = por %p168_p2, %p167_p0  ;;  %p8918_p6 = por %p174_p4, %p173_p3 }
   0xa   : > { %p5333_p7 = scmp.ge.s32.totalorder %s8836_s24, 1  ;;  %p215_p8 = scmp.lt.s32.totalorder %s8836_s24, 3 }
   0xc   : > { %p216_p9 = pnand %p5333_p7, %p215_p8 }
   0xd   : > { %v266_v0 = vld [vmem:[%s10795_s1] sm:$0xff] (!%p216_p9)  ;;  %v267_v1 = vld [vmem:[%s10795_s1 + $0x8] sm:$0xff] (!%p216_p9)  ;;  %v268_v2 = vld [vmem:[%s10795_s1 + $0x10] sm:$0xff] (!%p216_p9)  ;;  %p245_p10 = scmp.lt.s32.totalorder (!%p216_p9), %s8897_s25, 1  ;;  %vm749_vm0 = vcmask (!%p216_p9), 261120   ;;  %s242_s15 = sand.u32 (!%p216_p9), 1, %s8828_s22  }
   0xe   : > { %219 = sbr.rel (%p216_p9) target bundleno = 3714 (0xe82), region = 44  ;;  %v7661_v3 = vpack.c.bf16 (!%p216_p9), %v267_v1, %v266_v0  ;;  %v269_v4 = vld [vmem:[%s10795_s1 + $0x18] sm:$0xff] (!%p216_p9)  ;;  %v270_v6 = vld [vmem:[%s10795_s1 + $0x20] sm:$0xff] (!%p216_p9)  ;;  %v271_v7 = vld [vmem:[%s10795_s1 + $0x28] sm:$0xff] (!%p216_p9)  ;;  %s5334_s16 = sshll.u32 (!%p216_p9), %s242_s15, 7 }
   0xf   : > { %v7665_v5 = vpack.c.bf16 (!%p216_p9), %v269_v4, %v268_v2  ;;  %v7669_v8 = vpack.c.bf16 (!%p216_p9), %v271_v7, %v270_v6  ;;  %v272_v9 = vld [vmem:[%s10795_s1 + $0x30] sm:$0xff] (!%p216_p9)  ;;  %v273_v10 = vld [vmem:[%s10795_s1 + $0x38] sm:$0xff] (!%p216_p9)  ;;  %v274_v13 = vld [vmem:[%s10795_s1 + $0x40] sm:$0xff] (!%p216_p9)  ;;  %s10724_s19 = scalar_lea.vmem (!%p216_p9), [#allocation2], %s5334_s16  ;;  %s5692_s20 = sshll.u32 (!%p216_p9), %s8897_s25, 11 }
  0x10   : > { %7662 = vmatprep.subr.bf16.mxu1 (!%p216_p9), %v7661_v3  ;;  %v7673_v12 = vpack.c.bf16 (!%p216_p9), %v273_v10, %v272_v9  ;;  %v275_v14 = vld [vmem:[%s10795_s1 + $0x48] sm:$0xff] (!%p216_p9)  ;;  %v276_v16 = vld [vmem:[%s10795_s1 + $0x50] sm:$0xff] (!%p216_p9)  ;;  %v277_v17 = vld [vmem:[%s10795_s1 + $0x58] sm:$0xff] (!%p216_p9)  ;;  %s10745_s29 = scalar_lea.hbm (!%p216_p9), %s10800_s6, %s5692_s20  ;;  %s8838_s11 = smov (!%p216_p9), [#allocation2]  }
  0x11   : > { %7664 = vmatpush3.bf16.msra.mxu1 (!%p216_p9), %v7661_v3  ;;  %v7677_v15 = vpack.c.bf16 (!%p216_p9), %v275_v14, %v274_v13  ;;  %v7681_v18 = vpack.c.bf16 (!%p216_p9), %v277_v17, %v276_v16  ;;  %v278_v19 = vld [vmem:[%s10795_s1 + $0x60] sm:$0xff] (!%p216_p9)  ;;  %v279_v20 = vld [vmem:[%s10795_s1 + $0x68] sm:$0xff] (!%p216_p9)  ;;  %v280_v22 = vld [vmem:[%s10795_s1 + $0x70] sm:$0xff] (!%p216_p9)  ;;  %s8778_s12 = sshll.u32 (!%p216_p9), %s8838_s11, 4  ;;  %s8779_s12 = int_to_ptr.vmem [resolvable:$false] %s8778_s12 }
  0x12   : > { %7666 = vmatprep.subr.bf16.mxu1 (!%p216_p9), %v7665_v5  ;;  %v7685_v21 = vpack.c.bf16 (!%p216_p9), %v279_v20, %v278_v19  ;;  %v281_v23 = vld [vmem:[%s10795_s1 + $0x78] sm:$0xff] (!%p216_p9)  ;;  %v427_v25 = vld [vmem:[%s10796_s2] sm:$0xff] (!%p216_p9)  ;;  %v428_v26 = vld [vmem:[%s10796_s2 + $0x8] sm:$0xff] (!%p216_p9)  ;;  %s8780_s13 = scalar_lea.vmem (!%p216_p9), %s8779_s12, 4096 }
  0x13   : > { %v7689_v24 = vpack.c.bf16 (!%p216_p9), %v281_v23, %v280_v22  ;;  %v7693_v27 = vpack.c.bf16 (!%p216_p9), %v428_v26, %v427_v25  ;;  %v429_v28 = vld [vmem:[%s10796_s2 + $0x10] sm:$0xff] (!%p216_p9)  ;;  %v430_v29 = vld [vmem:[%s10796_s2 + $0x18] sm:$0xff] (!%p216_p9)  ;;  %v431_v33 = vld [vmem:[%s10796_s2 + $0x20] sm:$0xff] (!%p216_p9) }
  0x14   : > { %v7697_v32 = vpack.c.bf16 (!%p216_p9), %v430_v29, %v429_v28  ;;  %v432_v34 = vld [vmem:[%s10796_s2 + $0x28] sm:$0xff] (!%p216_p9)  ;;  %v433_v38 = vld [vmem:[%s10796_s2 + $0x30] sm:$0xff] (!%p216_p9)  ;;  %v434_v39 = vld [vmem:[%s10796_s2 + $0x38] sm:$0xff] (!%p216_p9) }
  0x15   : > { %s246_s26 = scalar_select %p245_p10, %s8897_s25, 1  ;;  %7668 = vmatpush3.bf16.msra.mxu1 %v7665_v5  ;;  %v7701_v37 = vpack.c.bf16 %v432_v34, %v431_v33  ;;  %v7705_v42 = vpack.c.bf16 %v434_v39, %v433_v38  ;;  %v435_v43 = vld [vmem:[%s10796_s2 + $0x40] sm:$0xff]  ;;  %v436_v44 = vld [vmem:[%s10796_s2 + $0x48] sm:$0xff]  ;;  %v437_v48 = vld [vmem:[%s10796_s2 + $0x50] sm:$0xff] }
  0x16   : > { %7670 = vmatprep.subr.bf16.mxu1 %v7669_v8  ;;  %v7709_v47 = vpack.c.bf16 %v436_v44, %v435_v43  ;;  %v438_v49 = vld [vmem:[%s10796_s2 + $0x58] sm:$0xff]  ;;  %v439_v53 = vld [vmem:[%s10796_s2 + $0x60] sm:$0xff]  ;;  %v440_v54 = vld [vmem:[%s10796_s2 + $0x68] sm:$0xff]  ;;  %s10753_s25 = scalar_lea.sflag [#allocation3], %s242_s15 }
  0x17   : > { %s5691_s28 = sshll.u32 %s246_s26, 7  ;;  %v7713_v52 = vpack.c.bf16 %v438_v49, %v437_v48  ;;  %v7717_v57 = vpack.c.bf16 %v440_v54, %v439_v53  ;;  %v441_v58 = vld [vmem:[%s10796_s2 + $0x70] sm:$0xff]  ;;  %v442_v59 = vld [vmem:[%s10796_s2 + $0x78] sm:$0xff]  ;;  %vm9111_vm1 = vmpackc.low %vm749_vm0, %vm749_vm0  ;;  %s5268_s26 = sshll.u32 %s10724_s19, 4  ;;  %s10747_s26 = int_to_ptr.vmem [resolvable:$true] %s5268_s26 }
  0x18   : > { %s8947_s10 = scalar_lea.vmem %s10794_s0, %s5691_s28  ;;  %v7721_v62 = vpack.c.bf16 %v442_v59, %v441_v58  ;;  %v589_v53 = vld [vmem:[%s10797_s3 + $0x8] sm:$0xff]  ;;  %v590_v54 = vld [vmem:[%s10797_s3 + $0x10] sm:$0xff]  ;;  %v591_v58 = vld [vmem:[%s10797_s3 + $0x18] sm:$0xff]  ;;  %s8774_s9 = scalar_lea.vmem %s10747_s26, 2048 }
  0x19   : > { %v8956_v11 = vld [vmem:[%s8947_s10] sm:$0xff]  ;;  %7672 = vmatpush3.bf16.msra.mxu1 %v7669_v8  ;;  %v8997_v30 = vld [vmem:[%s8947_s10 + $0x8] sm:$0xff]  ;;  %v9000_v31 = vld [vmem:[%s8947_s10 + $0x10] sm:$0xff]  ;;  %v7729_v59 = vpack.c.bf16 %v591_v58, %v590_v54  ;;  %p8775_p11 = scmp.ne.s32.totalorder %s10747_s26, %s8774_s9  ;;  %p8781_p0 = scmp.lt.s32.totalorder %s10747_s26, %s8779_s12 }
  0x1a   : > { %6445 = vmatprep.mubr.f32.mxu1 %v8956_v11  ;;  %6557 = vmatprep.mubr.f32.mxu0 %v8956_v11  ;;  %v9011_v35 = vld [vmem:[%s8947_s10 + $0x18] sm:$0xff]  ;;  %v9014_v36 = vld [vmem:[%s8947_s10 + $0x20] sm:$0xff]  ;;  %v9025_v40 = vld [vmem:[%s8947_s10 + $0x28] sm:$0xff]  ;;  %p8782_p1 = scmp.lt.s32.totalorder %s8780_s13, %s8774_s9 }
  0x1b   : > { %7674 = vmatprep.subr.bf16.mxu1 %v7673_v12  ;;  %v9028_v41 = vld [vmem:[%s8947_s10 + $0x30] sm:$0xff]  ;;  %v9039_v45 = vld [vmem:[%s8947_s10 + $0x38] sm:$0xff]  ;;  %v9042_v46 = vld [vmem:[%s8947_s10 + $0x40] sm:$0xff]  ;;  %p8776_p12 = pnand %p8775_p11, %p8914_p5 }
  0x1c   : > { %v9053_v50 = vld [vmem:[%s8947_s10 + $0x48] sm:$0xff]  ;;  %v9056_v51 = vld [vmem:[%s8947_s10 + $0x50] sm:$0xff]  ;;  %v9067_v55 = vld [vmem:[%s8947_s10 + $0x58] sm:$0xff]  ;;  %p8783_p2 = por %p8782_p1, %p8781_p0 }
  0x1d   : > { %7676 = vmatpush3.bf16.msra.mxu1 %v7673_v12  ;;  %v9070_v56 = vld [vmem:[%s8947_s10 + $0x60] sm:$0xff]  ;;  %v9081_v60 = vld [vmem:[%s8947_s10 + $0x68] sm:$0xff]  ;;  %v9084_v61 = vld [vmem:[%s8947_s10 + $0x70] sm:$0xff]  ;;  %p8777_p13 = pneg %p8776_p12 }
  0x1e   : > { %7678 = vmatprep.subr.bf16.mxu1 %v7677_v15  ;;  %v9089_v63 = vld [vmem:[%s8947_s10 + $0x78] sm:$0xff]  ;;  %v5617_v19 = vld [vmem:[%s10797_s3 + $0x180] sm:$0xff] }
  0x1f   : > { %p8784_p3 = pnand %p8783_p2, %p8777_p13 }
  0x21   : > { %7680 = vmatpush3.bf16.msra.mxu1 %v7677_v15 }
  0x22   : > { %7682 = vmatprep.subr.bf16.mxu1 %v7681_v18 }
  0x25   : > { %7684 = vmatpush3.bf16.msra.mxu1 %v7681_v18 }
  0x26   : > { %7686 = vmatprep.subr.bf16.mxu1 %v7685_v21 }
  0x29   : > { %7688 = vmatpush3.bf16.msra.mxu1 %v7685_v21 }
  0x2a   : > { %7690 = vmatprep.subr.bf16.mxu1 %v7689_v24 }
  0x2d   : > { %7692 = vmatpush3.bf16.msra.mxu1 %v7689_v24 }
  0x2e   : > { %7694 = vmatprep.subr.bf16.mxu1 %v7693_v27 }
  0x30   : > { %6446 = vmatmul.mubr.f32.vlgmr.msra.gmra.mrb[0].mxu1 %v8997_v30 }
  0x31   : > { %7696 = vmatpush3.bf16.msra.mxu1 %v7693_v27  ;;  %6448 = vmatprep.mubr.f32.mxu1 %v9000_v31 }
  0x32   : > { %7698 = vmatprep.subr.bf16.mxu1 %v7697_v32 }
  0x34   : > { %6449 = vmatmul.mubr.f32.gmra.mrb[2].mxu1 %v9011_v35 }
  0x35   : > { %7700 = vmatpush3.bf16.msra.mxu1 %v7697_v32  ;;  %6451 = vmatprep.mubr.f32.mxu1 %v9014_v36 }
  0x36   : > { %7702 = vmatprep.subr.bf16.mxu1 %v7701_v37 }
  0x38   : > { %6452 = vmatmul.mubr.f32.gmra.mrb[4].mxu1 %v9025_v40 }
  0x39   : > { %7704 = vmatpush3.bf16.msra.mxu1 %v7701_v37  ;;  %6454 = vmatprep.mubr.f32.mxu1 %v9028_v41 }
  0x3a   : > { %7706 = vmatprep.subr.bf16.mxu1 %v7705_v42 }
  0x3c   : > { %6455 = vmatmul.mubr.f32.gmra.mrb[6].mxu1 %v9039_v45 }
  0x3d   : > { %7708 = vmatpush3.bf16.msra.mxu1 %v7705_v42  ;;  %6457 = vmatprep.mubr.f32.mxu1 %v9042_v46 }
  0x3e   : > { %7710 = vmatprep.subr.bf16.mxu1 %v7709_v47 }
  0x40   : > { %6458 = vmatmul.mubr.f32.gmra.mrb[8].mxu1 %v9053_v50 }
  0x41   : > { %7712 = vmatpush3.bf16.msra.mxu1 %v7709_v47  ;;  %6460 = vmatprep.mubr.f32.mxu1 %v9056_v51 }
  0x42   : > { %7714 = vmatprep.subr.bf16.mxu1 %v7713_v52 }
  0x44   : > { %6461 = vmatmul.mubr.f32.gmra.mrb[10].mxu1 %v9067_v55 }
  0x45   : > { %7716 = vmatpush3.bf16.msra.mxu1 %v7713_v52  ;;  %6463 = vmatprep.mubr.f32.mxu1 %v9070_v56  ;;  %v588_v52 = vld [vmem:[%s10797_s3] sm:$0xff] }
  0x46   : > { %7718 = vmatprep.subr.bf16.mxu1 %v7717_v57 }
  0x48   : > { %6464 = vmatmul.mubr.f32.gmra.mrb[12].mxu1 %v9081_v60 }
  0x49   : > { %7720 = vmatpush3.bf16.msra.mxu1 %v7717_v57  ;;  %6466 = vmatprep.mubr.f32.mxu1 %v9084_v61  ;;  %v7725_v57 = vpack.c.bf16 %v589_v53, %v588_v52 }
  0x4a   : > { %7722 = vmatprep.subr.bf16.mxu1 %v7721_v62 }
  0x4b   : > { %7726 = vmatprep.subr.bf16.mxu0 %v7725_v57 }
  0x4c   : > { %6467 = vmatmul.mubr.f32.gmra.mrb[14].mxu1 %v9089_v63  ;;  %7728 = vmatpush3.bf16.msra.mxu0 %v7725_v57 }
  0x4d   : > { %7724 = vmatpush3.bf16.msra.mxu1 %v7721_v62  ;;  %6501 = vmatprep.mubr.f32.mxu1 %v8956_v11  ;;  %v593_v62 = vld [vmem:[%s10797_s3 + $0x28] sm:$0xff] }
  0x4e   : > { %7730 = vmatprep.subr.bf16.mxu0 %v7729_v59 }
  0x50   : > { %6502 = vmatmul.mubr.f32.vlgmr.msra.gmra.mrb[16].mxu1 %v8997_v30  ;;  %7732 = vmatpush3.bf16.msra.mxu0 %v7729_v59 }
  0x51   : > { %6504 = vmatprep.mubr.f32.mxu1 %v9000_v31 }
  0x54   : > { %6505 = vmatmul.mubr.f32.gmra.mrb[18].mxu1 %v9011_v35 }
  0x55   : > { %6507 = vmatprep.mubr.f32.mxu1 %v9014_v36 }
  0x58   : > { %6508 = vmatmul.mubr.f32.gmra.mrb[20].mxu1 %v9025_v40 }
  0x59   : > { %6510 = vmatprep.mubr.f32.mxu1 %v9028_v41 }
  0x5c   : > { %6511 = vmatmul.mubr.f32.gmra.mrb[22].mxu1 %v9039_v45 }
  0x5d   : > { %6513 = vmatprep.mubr.f32.mxu1 %v9042_v46 }
  0x60   : > { %6514 = vmatmul.mubr.f32.gmra.mrb[24].mxu1 %v9053_v50 }
  0x61   : > { %6516 = vmatprep.mubr.f32.mxu1 %v9056_v51 }
  0x64   : > { %6517 = vmatmul.mubr.f32.gmra.mrb[26].mxu1 %v9067_v55 }
  0x65   : > { %6519 = vmatprep.mubr.f32.mxu1 %v9070_v56 }
  0x68   : > { %6520 = vmatmul.mubr.f32.gmra.mrb[28].mxu1 %v9081_v60 }
  0x69   : > { %6522 = vmatprep.mubr.f32.mxu1 %v9084_v61 }
  0x6c   : > { %6523 = vmatmul.mubr.f32.gmra.mrb[30].mxu1 %v9089_v63 }
 0x103   : > { %v6447_v0 = vpop.f32.mrb[0].mxu1 }
 0x104   : > { %v348_v1 = vpop.f32.mrb[1].mxu1 }
 0x105   : > { %6613 = vmatprep.mubr.msk.f32.mxu1 %vm749_vm0, %v348_v1  ;;  %v594_v1 = vld [vmem:[%s10797_s3 + $0x30] sm:$0xff] }
 0x107   : > { %v6450_v2 = vpop.f32.mrb[2].mxu1 }
 0x108   : > { %v358_v3 = vpop.f32.mrb[3].mxu1 }
 0x10b   : > { %v6453_v4 = vpop.f32.mrb[4].mxu1 }
 0x10c   : > { %v368_v5 = vpop.f32.mrb[5].mxu1 }
 0x10f   : > { %v6456_v6 = vpop.f32.mrb[6].mxu1 }
 0x110   : > { %v378_v7 = vpop.f32.mrb[7].mxu1 }
 0x113   : > { %v6459_v8 = vpop.f32.mrb[8].mxu1 }
 0x114   : > { %v388_v9 = vpop.f32.mrb[9].mxu1 }
 0x117   : > { %v6462_v10 = vpop.f32.mrb[10].mxu1 }
 0x118   : > { %v398_v12 = vpop.f32.mrb[11].mxu1 }
 0x11b   : > { %v6465_v13 = vpop.f32.mrb[12].mxu1 }
 0x11c   : > { %v408_v14 = vpop.f32.mrb[13].mxu1 }
 0x11f   : > { %v6468_v15 = vpop.f32.mrb[14].mxu1 }
 0x120   : > { %v418_v16 = vpop.f32.mrb[15].mxu1 }
 0x123   : > { %v6503_v17 = vpop.f32.mrb[16].mxu1 }
 0x124   : > { %v509_v18 = vpop.f32.mrb[17].mxu1 }
 0x125   : > { %v7757_v20 = vpack.c.bf16 %v6503_v17, %v509_v18 }
 0x127   : > { %7759 = vmatprep.subr.msk.bf16.mxu1 %vm9111_vm1, %v7757_v20  ;;  %v6506_v21 = vpop.f32.mrb[18].mxu1 }
 0x128   : > { %7762 = vmatpush3.bf16.xpose.msk.msra.mxu1 %vm9111_vm1, %v7757_v20  ;;  %v519_v22 = vpop.f32.mrb[19].mxu1 }
 0x129   : > { %v7763_v23 = vpack.c.bf16 %v6506_v21, %v519_v22 }
 0x12b   : > { %7765 = vmatprep.subr.msk.bf16.mxu1 %vm9111_vm1, %v7763_v23  ;;  %v6509_v24 = vpop.f32.mrb[20].mxu1 }
 0x12c   : > { %v529_v25 = vpop.f32.mrb[21].mxu1 }
 0x12d   : > { %v7769_v26 = vpack.c.bf16 %v6509_v24, %v529_v25 }
 0x12f   : > { %v6512_v27 = vpop.f32.mrb[22].mxu1 }
 0x130   : > { %7768 = vmatpush3.bf16.xpose.msk.msra.mxu1 %vm9111_vm1, %v7763_v23  ;;  %v539_v28 = vpop.f32.mrb[23].mxu1 }
 0x131   : > { %7771 = vmatprep.subr.msk.bf16.mxu1 %vm9111_vm1, %v7769_v26  ;;  %v7775_v29 = vpack.c.bf16 %v6512_v27, %v539_v28 }
 0x133   : > { %v6515_v32 = vpop.f32.mrb[24].mxu1 }
 0x134   : > { %v549_v33 = vpop.f32.mrb[25].mxu1 }
 0x135   : > { %v7781_v34 = vpack.c.bf16 %v6515_v32, %v549_v33 }
 0x137   : > { %v6518_v37 = vpop.f32.mrb[26].mxu1 }
 0x138   : > { %7774 = vmatpush3.bf16.xpose.msk.msra.mxu1 %vm9111_vm1, %v7769_v26  ;;  %v559_v38 = vpop.f32.mrb[27].mxu1 }
 0x139   : > { %7777 = vmatprep.subr.msk.bf16.mxu1 %vm9111_vm1, %v7775_v29  ;;  %v7787_v39 = vpack.c.bf16 %v6518_v37, %v559_v38 }
 0x13b   : > { %v6521_v42 = vpop.f32.mrb[28].mxu1 }
 0x13c   : > { %v569_v43 = vpop.f32.mrb[29].mxu1 }
 0x13d   : > { %v7793_v44 = vpack.c.bf16 %v6521_v42, %v569_v43 }
 0x13f   : > { %v6524_v47 = vpop.f32.mrb[30].mxu1 }
 0x140   : > { %7780 = vmatpush3.bf16.xpose.msk.msra.mxu1 %vm9111_vm1, %v7775_v29  ;;  %v579_v48 = vpop.f32.mrb[31].mxu1 }
 0x141   : > { %7783 = vmatprep.subr.msk.bf16.mxu1 %vm9111_vm1, %v7781_v34  ;;  %v7799_v49 = vpack.c.bf16 %v6524_v47, %v579_v48 }
 0x148   : > { %7786 = vmatpush3.bf16.xpose.msk.msra.mxu1 %vm9111_vm1, %v7781_v34 }
 0x149   : > { %7789 = vmatprep.subr.msk.bf16.mxu1 %vm9111_vm1, %v7787_v39 }
 0x150   : > { %7792 = vmatpush3.bf16.xpose.msk.msra.mxu1 %vm9111_vm1, %v7787_v39 }
 0x151   : > { %7795 = vmatprep.subr.msk.bf16.mxu1 %vm9111_vm1, %v7793_v44 }
 0x158   : > { %7798 = vmatpush3.bf16.xpose.msk.msra.mxu1 %vm9111_vm1, %v7793_v44 }
 0x159   : > { %7801 = vmatprep.subr.msk.bf16.mxu1 %vm9111_vm1, %v7799_v49 }
 0x160   : > { %7804 = vmatpush3.bf16.xpose.msk.msra.mxu1 %vm9111_vm1, %v7799_v49 }
 0x167   : > { %6614 = vmatmul.mubr.msk.f32.vlgmr.msra.gmra.mrb[32].mxu1 %vm749_vm0, %v6447_v0 }
 0x168   : > { %6616 = vmatprep.mubr.msk.f32.mxu1 %vm749_vm0, %v358_v3 }
 0x16b   : > { %6617 = vmatmul.mubr.msk.f32.gmra.mrb[34].mxu1 %vm749_vm0, %v6450_v2  ;;  %v595_v2 = vld [vmem:[%s10797_s3 + $0x38] sm:$0xff] }
 0x16c   : > { %6619 = vmatprep.mubr.msk.f32.mxu1 %vm749_vm0, %v368_v5  ;;  %v7737_v3 = vpack.c.bf16 %v595_v2, %v594_v1  ;;  %v597_v5 = vld [vmem:[%s10797_s3 + $0x48] sm:$0xff]  ;;  %v5387_v2 = vld [vmem:[%s10796_s2 + $0x90] sm:$0xff] }
 0x16d   : > { %v5386_v1 = vld [vmem:[%s10796_s2 + $0x88] sm:$0xff] }
 0x16f   : > { %6620 = vmatmul.mubr.msk.f32.gmra.mrb[36].mxu1 %vm749_vm0, %v6453_v4  ;;  %v596_v4 = vld [vmem:[%s10797_s3 + $0x40] sm:$0xff] }
 0x170   : > { %6622 = vmatprep.mubr.msk.f32.mxu1 %vm749_vm0, %v378_v7  ;;  %v598_v7 = vld [vmem:[%s10797_s3 + $0x50] sm:$0xff] }
 0x173   : > { %6623 = vmatmul.mubr.msk.f32.gmra.mrb[38].mxu1 %vm749_vm0, %v6456_v6  ;;  %v7741_v6 = vpack.c.bf16 %v597_v5, %v596_v4  ;;  %v5388_v4 = vld [vmem:[%s10796_s2 + $0x98] sm:$0xff] }
 0x174   : > { %6625 = vmatprep.mubr.msk.f32.mxu1 %vm749_vm0, %v388_v9  ;;  %v7873_v5 = vpack.c.bf16 %v5388_v4, %v5387_v2 }
 0x177   : > { %6626 = vmatmul.mubr.msk.f32.gmra.mrb[40].mxu1 %vm749_vm0, %v6459_v8  ;;  %v599_v8 = vld [vmem:[%s10797_s3 + $0x58] sm:$0xff] }
 0x178   : > { %6628 = vmatprep.mubr.msk.f32.mxu1 %vm749_vm0, %v398_v12  ;;  %v7745_v9 = vpack.c.bf16 %v599_v8, %v598_v7  ;;  %v601_v12 = vld [vmem:[%s10797_s3 + $0x68] sm:$0xff] }
 0x179   : > { %v5390_v7 = vld [vmem:[%s10796_s2 + $0xa8] sm:$0xff] }
 0x17b   : > { %6629 = vmatmul.mubr.msk.f32.gmra.mrb[42].mxu1 %vm749_vm0, %v6462_v10  ;;  %v600_v10 = vld [vmem:[%s10797_s3 + $0x60] sm:$0xff] }
 0x17c   : > { %6631 = vmatprep.mubr.msk.f32.mxu1 %vm749_vm0, %v408_v14  ;;  %v602_v14 = vld [vmem:[%s10797_s3 + $0x70] sm:$0xff] }
 0x17f   : > { %6632 = vmatmul.mubr.msk.f32.gmra.mrb[44].mxu1 %vm749_vm0, %v6465_v13  ;;  %v7749_v13 = vpack.c.bf16 %v601_v12, %v600_v10  ;;  %v5392_v10 = vld [vmem:[%s10796_s2 + $0xb8] sm:$0xff] }
 0x180   : > { %6634 = vmatprep.mubr.msk.f32.mxu1 %vm749_vm0, %v418_v16 }
 0x183   : > { %6635 = vmatmul.mubr.msk.f32.gmra.mrb[46].mxu1 %vm749_vm0, %v6468_v15  ;;  %v603_v15 = vld [vmem:[%s10797_s3 + $0x78] sm:$0xff] }
 0x184   : > { %6781 = vmatprep.mubr.f32.mxu1 %v8956_v11  ;;  %v592_v11 = vld [vmem:[%s10797_s3 + $0x20] sm:$0xff]  ;;  %v7753_v16 = vpack.c.bf16 %v603_v15, %v602_v14  ;;  %v5394_v14 = vld [vmem:[%s10796_s2 + $0xc8] sm:$0xff] }
 0x185   : > { %v7733_v0 = vpack.c.bf16 %v593_v62, %v592_v11 }
 0x187   : > { %7734 = vmatprep.subr.bf16.mxu0 %v7733_v0 }
 0x188   : > { %7736 = vmatpush3.bf16.msra.mxu0 %v7733_v0  ;;  %v5385_v0 = vld [vmem:[%s10796_s2 + $0x80] sm:$0xff] }
 0x189   : > { %7738 = vmatprep.subr.bf16.mxu0 %v7737_v3 }
 0x18c   : > { %7740 = vmatpush3.bf16.msra.mxu0 %v7737_v3  ;;  %v7869_v3 = vpack.c.bf16 %v5386_v1, %v5385_v0 }
 0x18d   : > { %7742 = vmatprep.subr.bf16.mxu0 %v7741_v6 }
 0x18e   : > { %7870 = vmatprep.subr.bf16.mxu1 %v7869_v3 }
 0x18f   : > { %7872 = vmatpush3.bf16.msra.mxu1 %v7869_v3 }
 0x190   : > { %7744 = vmatpush3.bf16.msra.mxu0 %v7741_v6  ;;  %v5389_v6 = vld [vmem:[%s10796_s2 + $0xa0] sm:$0xff]  ;;  %7874 = vmatprep.subr.bf16.mxu1 %v7873_v5 }
 0x191   : > { %7746 = vmatprep.subr.bf16.mxu0 %v7745_v9  ;;  %v7877_v8 = vpack.c.bf16 %v5390_v7, %v5389_v6 }
 0x193   : > { %7876 = vmatpush3.bf16.msra.mxu1 %v7873_v5 }
 0x194   : > { %7748 = vmatpush3.bf16.msra.mxu0 %v7745_v9  ;;  %v5391_v9 = vld [vmem:[%s10796_s2 + $0xb0] sm:$0xff]  ;;  %7878 = vmatprep.subr.bf16.mxu1 %v7877_v8 }
 0x195   : > { %7750 = vmatprep.subr.bf16.mxu0 %v7749_v13  ;;  %v7881_v12 = vpack.c.bf16 %v5392_v10, %v5391_v9 }
 0x197   : > { %7880 = vmatpush3.bf16.msra.mxu1 %v7877_v8 }
 0x198   : > { %7752 = vmatpush3.bf16.msra.mxu0 %v7749_v13  ;;  %v5393_v13 = vld [vmem:[%s10796_s2 + $0xc0] sm:$0xff]  ;;  %7882 = vmatprep.subr.bf16.mxu1 %v7881_v12 }
 0x199   : > { %7754 = vmatprep.subr.bf16.mxu0 %v7753_v16  ;;  %v7885_v15 = vpack.c.bf16 %v5394_v14, %v5393_v13 }
 0x19b   : > { %7884 = vmatpush3.bf16.msra.mxu1 %v7881_v12 }
 0x19c   : > { %7756 = vmatpush3.bf16.msra.mxu0 %v7753_v16  ;;  %v5395_v16 = vld [vmem:[%s10796_s2 + $0xd0] sm:$0xff]  ;;  %7886 = vmatprep.subr.bf16.mxu1 %v7885_v15 }
 0x19f   : > { %6558 = vmatmul.mubr.f32.vlgmr.msra.gmra.mrb[0].mxu0 %v8997_v30  ;;  %7888 = vmatpush3.bf16.msra.mxu1 %v7885_v15 }
 0x1a0   : > { %6560 = vmatprep.mubr.f32.mxu0 %v9000_v31 }
 0x1a3   : > { %6561 = vmatmul.mubr.f32.gmra.mrb[2].mxu0 %v9011_v35 }
 0x1a4   : > { %6563 = vmatprep.mubr.f32.mxu0 %v9014_v36 }
 0x1a7   : > { %6564 = vmatmul.mubr.f32.gmra.mrb[4].mxu0 %v9025_v40 }
 0x1a8   : > { %6566 = vmatprep.mubr.f32.mxu0 %v9028_v41 }
 0x1ab   : > { %6567 = vmatmul.mubr.f32.gmra.mrb[6].mxu0 %v9039_v45 }
 0x1ac   : > { %6569 = vmatprep.mubr.f32.mxu0 %v9042_v46 }
 0x1af   : > { %6570 = vmatmul.mubr.f32.gmra.mrb[8].mxu0 %v9053_v50 }
 0x1b0   : > { %6572 = vmatprep.mubr.f32.mxu0 %v9056_v51 }
 0x1b3   : > { %6573 = vmatmul.mubr.f32.gmra.mrb[10].mxu0 %v9067_v55 }
 0x1b4   : > { %6575 = vmatprep.mubr.f32.mxu0 %v9070_v56 }
 0x1b7   : > { %6576 = vmatmul.mubr.f32.gmra.mrb[12].mxu0 %v9081_v60 }
 0x1b8   : > { %6578 = vmatprep.mubr.f32.mxu0 %v9084_v61 }
 0x1bb   : > { %6579 = vmatmul.mubr.f32.gmra.mrb[14].mxu0 %v9089_v63 }
 0x23a   : > { %v6615_v17 = vpop.f32.mrb[32].mxu1 }
 0x23b   : > { %v912_v18 = vpop.f32.mrb[33].mxu1  ;;  %v9229_v23 = vmul.f32 0.17677669, %v6615_v17  ;;  %v5396_v17 = vld [vmem:[%s10796_s2 + $0xd8] sm:$0xff] }
 0x23c   : > { %v9226_v20 = vmul.f32 0.17677669, %v912_v18  ;;  %v7889_v18 = vpack.c.bf16 %v5396_v17, %v5395_v16 }
 0x23e   : > { %1007 = vmax.xlane.f32.xlu0 %v9226_v20  ;;  %v6618_v21 = vpop.f32.mrb[34].mxu1  ;;  %7890 = vmatprep.subr.bf16.mxu1 %v7889_v18 }
 0x23f   : > { %v922_v22 = vpop.f32.mrb[35].mxu1  ;;  %v9235_v27 = vmul.f32 0.17677669, %v6618_v21  ;;  %v5397_v21 = vld [vmem:[%s10796_s2 + $0xe0] sm:$0xff]  ;;  %7892 = vmatpush3.bf16.msra.mxu1 %v7889_v18 }
 0x240   : > { %v9231_v24 = vmul.f32 0.17677669, %v922_v22  ;;  %v5398_v22 = vld [vmem:[%s10796_s2 + $0xe8] sm:$0xff] }
 0x242   : > { %1009 = vmax.xlane.f32.xlu0 %v9229_v23  ;;  %1011 = vmax.xlane.f32.xlu1 %v9231_v24  ;;  %v6621_v25 = vpop.f32.mrb[36].mxu1 }
 0x243   : > { %v932_v26 = vpop.f32.mrb[37].mxu1  ;;  %v9241_v33 = vmul.f32 0.17677669, %v6621_v25  ;;  %v7893_v25 = vpack.c.bf16 %v5398_v22, %v5397_v21 }
 0x244   : > { %v9237_v28 = vmul.f32 0.17677669, %v932_v26  ;;  %v5399_v26 = vld [vmem:[%s10796_s2 + $0xf0] sm:$0xff] }
 0x245   : > { %7894 = vmatprep.subr.bf16.mxu1 %v7893_v25 }
 0x246   : > { %1013 = vmax.xlane.f32.xlu1 %v9235_v27  ;;  %1015 = vmax.xlane.f32.xlu0 %v9237_v28  ;;  %v6624_v29 = vpop.f32.mrb[38].mxu1 }
 0x247   : > { %v942_v32 = vpop.f32.mrb[39].mxu1  ;;  %v9247_v39 = vmul.f32 0.17677669, %v6624_v29  ;;  %v5400_v29 = vld [vmem:[%s10796_s2 + $0xf8] sm:$0xff]  ;;  %7896 = vmatpush3.bf16.msra.mxu1 %v7893_v25 }
 0x248   : > { %v9243_v34 = vmul.f32 0.17677669, %v942_v32  ;;  %v7897_v32 = vpack.c.bf16 %v5400_v29, %v5399_v26 }
 0x24a   : > { %1017 = vmax.xlane.f32.xlu1 %v9241_v33  ;;  %1019 = vmax.xlane.f32.xlu0 %v9243_v34  ;;  %v6627_v37 = vpop.f32.mrb[40].mxu1 }
 0x24b   : > { %v952_v38 = vpop.f32.mrb[41].mxu1  ;;  %v9253_v47 = vmul.f32 0.17677669, %v6627_v37  ;;  %7898 = vmatprep.subr.bf16.mxu1 %v7897_v32 }
 0x24c   : > { %v9249_v42 = vmul.f32 0.17677669, %v952_v38  ;;  %7900 = vmatpush3.bf16.msra.mxu1 %v7897_v32 }
 0x24e   : > { %1021 = vmax.xlane.f32.xlu1 %v9247_v39  ;;  %1023 = vmax.xlane.f32.xlu0 %v9249_v42  ;;  %v6630_v43 = vpop.f32.mrb[42].mxu1 }
 0x24f   : > { %v962_v44 = vpop.f32.mrb[43].mxu1  ;;  %v9259_v53 = vmul.f32 0.17677669, %v6630_v43  ;;  %6782 = vmatmul.mubr.f32.vlgmr.msra.gmra.mrb[48].mxu1 %v8997_v30 }
 0x250   : > { %v9255_v48 = vmul.f32 0.17677669, %v962_v44  ;;  %6784 = vmatprep.mubr.f32.mxu1 %v9000_v31 }
 0x252   : > { %1025 = vmax.xlane.f32.xlu1 %v9253_v47  ;;  %1027 = vmax.xlane.f32.xlu0 %v9255_v48  ;;  %v6633_v49 = vpop.f32.mrb[44].mxu1 }
 0x253   : > { %v972_v52 = vpop.f32.mrb[45].mxu1  ;;  %v9265_v59 = vmul.f32 0.17677669, %v6633_v49  ;;  %6785 = vmatmul.mubr.f32.gmra.mrb[50].mxu1 %v9011_v35 }
 0x254   : > { %v9261_v54 = vmul.f32 0.17677669, %v972_v52  ;;  %6787 = vmatprep.mubr.f32.mxu1 %v9014_v36 }
 0x256   : > { %1029 = vmax.xlane.f32.xlu1 %v9259_v53  ;;  %1031 = vmax.xlane.f32.xlu0 %v9261_v54  ;;  %v6636_v57 = vpop.f32.mrb[46].mxu1 }
 0x257   : > { %v982_v58 = vpop.f32.mrb[47].mxu1  ;;  %v9271_v62 = vmul.f32 0.17677669, %v6636_v57  ;;  %6788 = vmatmul.mubr.f32.gmra.mrb[52].mxu1 %v9025_v40 }
 0x258   : > { %v9267_v11 = vmul.f32 0.17677669, %v982_v58  ;;  %6790 = vmatprep.mubr.f32.mxu1 %v9028_v41 }
 0x25a   : > { %1033 = vmax.xlane.f32.xlu1 %v9265_v59  ;;  %1035 = vmax.xlane.f32.xlu0 %v9267_v11 }
 0x25b   : > { %6791 = vmatmul.mubr.f32.gmra.mrb[54].mxu1 %v9039_v45 }
 0x25c   : > { %6793 = vmatprep.mubr.f32.mxu1 %v9042_v46 }
 0x25e   : > { %1037 = vmax.xlane.f32.xlu1 %v9271_v62 }
 0x25f   : > { %6794 = vmatmul.mubr.f32.gmra.mrb[56].mxu1 %v9053_v50 }
 0x260   : > { %6796 = vmatprep.mubr.f32.mxu1 %v9056_v51 }
 0x263   : > { %6797 = vmatmul.mubr.f32.gmra.mrb[58].mxu1 %v9067_v55 }
 0x264   : > { %6799 = vmatprep.mubr.f32.mxu1 %v9070_v56 }
 0x267   : > { %6800 = vmatmul.mubr.f32.gmra.mrb[60].mxu1 %v9081_v60 }
 0x268   : > { %6802 = vmatprep.mubr.f32.mxu1 %v9084_v61 }
 0x26b   : > { %6803 = vmatmul.mubr.f32.gmra.mrb[62].mxu1 %v9089_v63 }
 0x272   : > { %v6559_v61 = vpop.f32.mrb[0].mxu0 }
 0x273   : > { %v670_v63 = vpop.f32.mrb[1].mxu0 }
 0x274   : > { %v7805_v38 = vpack.c.bf16 %v6559_v61, %v670_v63 }
 0x276   : > { %v6562_v49 = vpop.f32.mrb[2].mxu0  ;;  %7806 = vmatprep.subr.bf16.mxu0 %v7805_v38 }
 0x277   : > { %v680_v52 = vpop.f32.mrb[3].mxu0  ;;  %7808 = vmatpush3.bf16.msra.mxu0 %v7805_v38 }
 0x278   : > { %v7809_v58 = vpack.c.bf16 %v6562_v49, %v680_v52 }
 0x27a   : > { %7810 = vmatprep.subr.bf16.mxu0 %v7809_v58 }
 0x27b   : > { %7812 = vmatpush3.bf16.msra.mxu0 %v7809_v58 }
 0x2cb   : > { %v1008_v30 = vpop.xlane.xlu0 %1007 }
 0x2cc   : > { %v1039_v31 = vsub.f32 %v9226_v20, %v1008_v30 }
 0x2ce   : > { %v1055_v35 = vmul.f32 1.442695, %v1039_v31 }
 0x2cf   : > { %v1010_v36 = vpop.xlane.xlu0 %1009  ;;  %v1012_v40 = vpop.xlane.xlu1 %1011 }
 0x2d0   : > { %8486 = vpow2.f32 %v1055_v35  ;;  %v1040_v41 = vsub.f32 %v9229_v23, %v1010_v36  ;;  %v1041_v45 = vsub.f32 %v9231_v24, %v1012_v40 }
 0x2d2   : > { %v1057_v46 = vmul.f32 1.442695, %v1040_v41  ;;  %v1059_v50 = vmul.f32 1.442695, %v1041_v45 }
 0x2d3   : > { %v1014_v51 = vpop.xlane.xlu1 %1013  ;;  %v1016_v55 = vpop.xlane.xlu0 %1015 }
 0x2d4   : > { %8488 = vpow2.f32 %v1057_v46  ;;  %v1042_v56 = vsub.f32 %v9235_v27, %v1014_v51  ;;  %v1043_v60 = vsub.f32 %v9237_v28, %v1016_v55 }
 0x2d5   : > { %8490 = vpow2.f32 %v1059_v50 }
 0x2d6   : > { %v1061_v20 = vmul.f32 1.442695, %v1042_v56  ;;  %v1063_v37 = vmul.f32 1.442695, %v1043_v60 }
 0x2d7   : > { %v1018_v43 = vpop.xlane.xlu1 %1017  ;;  %v1020_v44 = vpop.xlane.xlu0 %1019 }
 0x2d8   : > { %8492 = vpow2.f32 %v1061_v20  ;;  %v1044_v23 = vsub.f32 %v9241_v33, %v1018_v43  ;;  %v1045_v24 = vsub.f32 %v9243_v34, %v1020_v44  ;;  %v6565_v34 = vpop.f32.mrb[4].mxu0 }
 0x2d9   : > { %8494 = vpow2.f32 %v1063_v37  ;;  %v690_v3 = vpop.f32.mrb[5].mxu0 }
 0x2da   : > { %v9344_v27 = vpop.eup %8486  ;;  %v1065_v28 = vmul.f32 1.442695, %v1044_v23  ;;  %v1067_v57 = vmul.f32 1.442695, %v1045_v24  ;;  %v7813_v7 = vpack.c.bf16 %v6565_v34, %v690_v3  ;;  %v6568_v12 = vpop.f32.mrb[6].mxu0 }
 0x2db   : > { %v1022_v0 = vpop.xlane.xlu1 %1021  ;;  %v1024_v1 = vpop.xlane.xlu0 %1023  ;;  %1087 = vadd.xlane.f32.xlu0 %v9344_v27 }
 0x2dc   : > { %8496 = vpow2.f32 %v1065_v28  ;;  %v1046_v2 = vsub.f32 %v9247_v39, %v1022_v0  ;;  %v1047_v33 = vsub.f32 %v9249_v42, %v1024_v1  ;;  %7814 = vmatprep.subr.bf16.mxu0 %v7813_v7  ;;  %v700_v13 = vpop.f32.mrb[7].mxu0  ;;  %v5369_v28 = vld [vmem:[%s10795_s1 + $0x80] sm:$0xff] }
 0x2dd   : > { %8498 = vpow2.f32 %v1067_v57  ;;  %7816 = vmatpush3.bf16.msra.mxu0 %v7813_v7  ;;  %v7817_v17 = vpack.c.bf16 %v6568_v12, %v700_v13  ;;  %v6571_v25 = vpop.f32.mrb[8].mxu0  ;;  %v5370_v57 = vld [vmem:[%s10795_s1 + $0x88] sm:$0xff]  ;;  %v5371_v12 = vld [vmem:[%s10795_s1 + $0x90] sm:$0xff]  ;;  %v5372_v13 = vld [vmem:[%s10795_s1 + $0x98] sm:$0xff] }
 0x2de   : > { %v9349_v4 = vpop.eup %8488  ;;  %v1069_v5 = vmul.f32 1.442695, %v1046_v2  ;;  %v1071_v6 = vmul.f32 1.442695, %v1047_v33  ;;  %v710_v26 = vpop.f32.mrb[9].mxu0  ;;  %v7837_v58 = vpack.c.bf16 %v5370_v57, %v5369_v28  ;;  %v5378_v28 = vld [vmem:[%s10795_s1 + $0xc8] sm:$0xff] }
 0x2df   : > { %v9351_v8 = vpop.eup %8490  ;;  %v1026_v9 = vpop.xlane.xlu1 %1025  ;;  %1089 = vadd.xlane.f32.xlu1 %v9349_v4  ;;  %7818 = vmatprep.subr.bf16.mxu0 %v7817_v17  ;;  %v7821_v31 = vpack.c.bf16 %v6571_v25, %v710_v26 }
 0x2e0   : > { %v1028_v10 = vpop.xlane.xlu0 %1027  ;;  %8500 = vpow2.f32 %v1069_v5  ;;  %v1048_v39 = vsub.f32 %v9253_v47, %v1026_v9  ;;  %1091 = vadd.xlane.f32.xlu0 %v9351_v8  ;;  %v6574_v41 = vpop.f32.mrb[10].mxu0 }
 0x2e1   : > { %v1049_v42 = vsub.f32 %v9255_v48, %v1028_v10  ;;  %8502 = vpow2.f32 %v1071_v6  ;;  %7820 = vmatpush3.bf16.msra.mxu0 %v7817_v17  ;;  %v720_v45 = vpop.f32.mrb[11].mxu0 }
 0x2e2   : > { %v9357_v14 = vpop.eup %8492  ;;  %v1073_v15 = vmul.f32 1.442695, %v1048_v39  ;;  %7822 = vmatprep.subr.bf16.mxu0 %v7821_v31  ;;  %v7825_v55 = vpack.c.bf16 %v6574_v41, %v720_v45 }
 0x2e3   : > { %v1075_v16 = vmul.f32 1.442695, %v1049_v42  ;;  %v9359_v18 = vpop.eup %8494  ;;  %v1030_v21 = vpop.xlane.xlu1 %1029  ;;  %1093 = vadd.xlane.f32.xlu1 %v9357_v14 }
 0x2e4   : > { %v1032_v22 = vpop.xlane.xlu0 %1031  ;;  %8504 = vpow2.f32 %v1073_v15  ;;  %v1050_v47 = vsub.f32 %v9259_v53, %v1030_v21  ;;  %1095 = vadd.xlane.f32.xlu0 %v9359_v18 }
 0x2e5   : > { %v1051_v48 = vsub.f32 %v9261_v54, %v1032_v22  ;;  %8506 = vpow2.f32 %v1075_v16  ;;  %7824 = vmatpush3.bf16.msra.mxu0 %v7821_v31 }
 0x2e6   : > { %v9365_v29 = vpop.eup %8496  ;;  %v1077_v32 = vmul.f32 1.442695, %v1050_v47  ;;  %7826 = vmatprep.subr.bf16.mxu0 %v7825_v55 }
 0x2e7   : > { %v1079_v30 = vmul.f32 1.442695, %v1051_v48  ;;  %v9367_v35 = vpop.eup %8498  ;;  %v1034_v36 = vpop.xlane.xlu1 %1033  ;;  %1097 = vadd.xlane.f32.xlu1 %v9365_v29  ;;  %v7841_v48 = vpack.c.bf16 %v5372_v13, %v5371_v12  ;;  %v5381_v12 = vld [vmem:[%s10795_s1 + $0xe0] sm:$0xff]  ;;  %v5382_v13 = vld [vmem:[%s10795_s1 + $0xe8] sm:$0xff] }
 0x2e8   : > { %v1036_v53 = vpop.xlane.xlu0 %1035  ;;  %8508 = vpow2.f32 %v1077_v32  ;;  %v1052_v54 = vsub.f32 %v9265_v59, %v1034_v36  ;;  %1099 = vadd.xlane.f32.xlu0 %v9367_v35  ;;  %v5373_v32 = vld [vmem:[%s10795_s1 + $0xa0] sm:$0xff] }
 0x2e9   : > { %v1053_v40 = vsub.f32 %v9267_v11, %v1036_v53  ;;  %8510 = vpow2.f32 %v1079_v30  ;;  %v6577_v11 = vpop.f32.mrb[12].mxu0  ;;  %7828 = vmatpush3.bf16.msra.mxu0 %v7825_v55  ;;  %v5374_v30 = vld [vmem:[%s10795_s1 + $0xa8] sm:$0xff]  ;;  %v5376_v55 = vld [vmem:[%s10795_s1 + $0xb8] sm:$0xff] }
 0x2ea   : > { %v9373_v46 = vpop.eup %8500  ;;  %v1081_v50 = vmul.f32 1.442695, %v1052_v54  ;;  %v730_v20 = vpop.f32.mrb[13].mxu0  ;;  %v7845_v41 = vpack.c.bf16 %v5374_v30, %v5373_v32  ;;  %v9494_v32 = vld [vmem:[%s8947_s10 + $0x10] sm:$0xff]  ;;  %v9502_v30 = vld [vmem:[%s8947_s10 + $0x20] sm:$0xff] }
 0x2eb   : > { %v1083_v51 = vmul.f32 1.442695, %v1053_v40  ;;  %v9375_v56 = vpop.eup %8502  ;;  %1101 = vadd.xlane.f32.xlu1 %v9373_v46  ;;  %v1038_v60 = vpop.xlane.xlu1 %1037  ;;  %v7829_v38 = vpack.c.bf16 %v6577_v11, %v730_v20 }
 0x2ec   : > { %8512 = vpow2.f32 %v1081_v50  ;;  %v1054_v59 = vsub.f32 %v9271_v62, %v1038_v60  ;;  %1103 = vadd.xlane.f32.xlu0 %v9375_v56  ;;  %v6580_v43 = vpop.f32.mrb[14].mxu0 }
 0x2ed   : > { %8514 = vpow2.f32 %v1083_v51  ;;  %7830 = vmatprep.subr.bf16.mxu0 %v7829_v38  ;;  %v740_v44 = vpop.f32.mrb[15].mxu0  ;;  %v5375_v51 = vld [vmem:[%s10795_s1 + $0xb0] sm:$0xff] }
 0x2ee   : > { %v9380_v61 = vpop.eup %8504  ;;  %v1085_v63 = vmul.f32 1.442695, %v1054_v59  ;;  %7832 = vmatpush3.bf16.msra.mxu0 %v7829_v38  ;;  %v7833_v24 = vpack.c.bf16 %v6580_v43, %v740_v44  ;;  %v7849_v38 = vpack.c.bf16 %v5376_v55, %v5375_v51  ;;  %v9546_v51 = vld [vmem:[%s8947_s10 + $0x78] sm:$0xff] }
 0x2ef   : > { %v9382_v37 = vpop.eup %8506  ;;  %1105 = vadd.xlane.f32.xlu1 %v9380_v61 }
 0x2f0   : > { %8516 = vpow2.f32 %v1085_v63  ;;  %1107 = vadd.xlane.f32.xlu0 %v9382_v37  ;;  %7834 = vmatprep.subr.bf16.mxu0 %v7833_v24 }
 0x2f2   : > { %v9386_v62 = vpop.eup %8508  ;;  %7836 = vmatpush3.bf16.msra.mxu0 %v7833_v24  ;;  %v5377_v24 = vld [vmem:[%s10795_s1 + $0xc0] sm:$0xff] }
 0x2f3   : > { %v9388_v23 = vpop.eup %8510  ;;  %1109 = vadd.xlane.f32.xlu1 %v9386_v62  ;;  %7838 = vmatprep.subr.bf16.mxu0 %v7837_v58 }
 0x2f4   : > { %1111 = vadd.xlane.f32.xlu0 %v9388_v23 }
 0x2f6   : > { %v9392_v49 = vpop.eup %8512 }
 0x2f7   : > { %v9394_v52 = vpop.eup %8514  ;;  %1113 = vadd.xlane.f32.xlu1 %v9392_v49 }
 0x2f8   : > { %1115 = vadd.xlane.f32.xlu0 %v9394_v52 }
 0x2fa   : > { %v9404_v0 = vpop.eup %8516 }
 0x2fb   : > { %1117 = vadd.xlane.f32.xlu1 %v9404_v0 }
 0x322   : > { %v6783_v5 = vpop.f32.mrb[48].mxu1 }
 0x323   : > { %v1545_v6 = vpop.f32.mrb[49].mxu1 }
 0x324   : > { %v7933_v9 = vpack.c.bf16 %v6783_v5, %v1545_v6  ;;  %v5379_v6 = vld [vmem:[%s10795_s1 + $0xd0] sm:$0xff] }
 0x326   : > { %7935 = vmatprep.subr.msk.bf16.mxu1 %vm9111_vm1, %v7933_v9  ;;  %v6786_v15 = vpop.f32.mrb[50].mxu1 }
 0x327   : > { %7938 = vmatpush3.bf16.xpose.msk.msra.mxu1 %vm9111_vm1, %v7933_v9 }
 0x368   : > { %v1088_v1 = vpop.xlane.xlu0 %1087 }
 0x369   : > { %8518 = vrcp.f32 %v1088_v1 }
 0x36c   : > { %v1090_v2 = vpop.xlane.xlu1 %1089 }
 0x36d   : > { %8520 = vrcp.f32 %v1090_v2  ;;  %v1092_v33 = vpop.xlane.xlu0 %1091 }
 0x36e   : > { %8522 = vrcp.f32 %v1092_v33 }
 0x370   : > { %v1094_v34 = vpop.xlane.xlu1 %1093 }
 0x371   : > { %8524 = vrcp.f32 %v1094_v34  ;;  %v1096_v3 = vpop.xlane.xlu0 %1095  ;;  %v7853_v34 = vpack.c.bf16 %v5378_v28, %v5377_v24 }
 0x372   : > { %8526 = vrcp.f32 %v1096_v3 }
 0x373   : > { %v8519_v7 = vpop.eup %8518 }
 0x374   : > { %v1098_v10 = vpop.xlane.xlu1 %1097  ;;  %v1135_v39 = vmul.f32 %v8519_v7, %v9344_v27  ;;  %v1555_v27 = vpop.f32.mrb[51].mxu1  ;;  %v5380_v7 = vld [vmem:[%s10795_s1 + $0xd8] sm:$0xff] }
 0x375   : > { %8528 = vrcp.f32 %v1098_v10  ;;  %v1100_v42 = vpop.xlane.xlu0 %1099  ;;  %v7939_v17 = vpack.c.bf16 %v6786_v15, %v1555_v27  ;;  %v6789_v31 = vpop.f32.mrb[52].mxu1 }
 0x376   : > { %8530 = vrcp.f32 %v1100_v42  ;;  %6669 = vmatprep.mubr.f32.mxu0 %v1135_v39  ;;  %v7857_v39 = vpack.c.bf16 %v5380_v7, %v5379_v6 }
 0x377   : > { %v8521_v16 = vpop.eup %8520  ;;  %7941 = vmatprep.subr.msk.bf16.mxu1 %vm9111_vm1, %v7939_v17 }
 0x378   : > { %v8523_v21 = vpop.eup %8522  ;;  %v1102_v22 = vpop.xlane.xlu1 %1101  ;;  %v1136_v47 = vmul.f32 %v8521_v16, %v9349_v4  ;;  %7944 = vmatpush3.bf16.xpose.msk.msra.mxu1 %vm9111_vm1, %v7939_v17  ;;  %v7861_v16 = vpack.c.bf16 %v5382_v13, %v5381_v12 }
 0x379   : > { %8532 = vrcp.f32 %v1102_v22  ;;  %v1104_v25 = vpop.xlane.xlu0 %1103  ;;  %v1137_v26 = vmul.f32 %v8523_v21, %v9351_v8  ;;  %v1565_v4 = vpop.f32.mrb[53].mxu1  ;;  %v5384_v21 = vld [vmem:[%s10795_s1 + $0xf8] sm:$0xff] }
 0x37a   : > { %8534 = vrcp.f32 %v1104_v25  ;;  %6670 = vmatmul.mubr.f32.vlgmr.msra.gmra.mrb[16].mxu0 %v1136_v47  ;;  %v7945_v53 = vpack.c.bf16 %v6789_v31, %v1565_v4  ;;  %v6792_v60 = vpop.f32.mrb[54].mxu1  ;;  %v9506_v31 = vld [vmem:[%s8947_s10 + $0x28] sm:$0xff]  ;;  %v9510_v4 = vld [vmem:[%s8947_s10 + $0x30] sm:$0xff] }
 0x37b   : > { %v8525_v36 = vpop.eup %8524  ;;  %6672 = vmatprep.mubr.f32.mxu0 %v1137_v26  ;;  %7840 = vmatpush3.bf16.msra.mxu0 %v7837_v58 }
 0x37c   : > { %v8527_v8 = vpop.eup %8526  ;;  %v1106_v54 = vpop.xlane.xlu1 %1105  ;;  %v1138_v40 = vmul.f32 %v8525_v36, %v9357_v14  ;;  %7842 = vmatprep.subr.bf16.mxu0 %v7841_v48  ;;  %7947 = vmatprep.subr.msk.bf16.mxu1 %vm9111_vm1, %v7945_v53  ;;  %v9514_v36 = vld [vmem:[%s8947_s10 + $0x38] sm:$0xff] }
 0x37d   : > { %8536 = vrcp.f32 %v1106_v54  ;;  %v1108_v45 = vpop.xlane.xlu0 %1107  ;;  %v1139_v50 = vmul.f32 %v8527_v8, %v9359_v18  ;;  %v1575_v14 = vpop.f32.mrb[55].mxu1  ;;  %v9522_v8 = vld [vmem:[%s8947_s10 + $0x48] sm:$0xff]  ;;  %v9526_v54 = vld [vmem:[%s8947_s10 + $0x50] sm:$0xff] }
 0x37e   : > { %8538 = vrcp.f32 %v1108_v45  ;;  %6673 = vmatmul.mubr.f32.gmra.mrb[18].mxu0 %v1138_v40  ;;  %v7951_v11 = vpack.c.bf16 %v6792_v60, %v1575_v14  ;;  %v6795_v57 = vpop.f32.mrb[56].mxu1  ;;  %v9530_v40 = vld [vmem:[%s8947_s10 + $0x58] sm:$0xff]  ;;  %v9538_v45 = vld [vmem:[%s8947_s10 + $0x68] sm:$0xff] }
 0x37f   : > { %v8529_v59 = vpop.eup %8528  ;;  %6675 = vmatprep.mubr.f32.mxu0 %v1139_v50  ;;  %7844 = vmatpush3.bf16.msra.mxu0 %v7841_v48  ;;  %v9542_v50 = vld [vmem:[%s8947_s10 + $0x70] sm:$0xff] }
 0x380   : > { %v8531_v18 = vpop.eup %8530  ;;  %v1110_v63 = vpop.xlane.xlu1 %1109  ;;  %v1140_v20 = vmul.f32 %v8529_v59, %v9365_v29  ;;  %7846 = vmatprep.subr.bf16.mxu0 %v7845_v41  ;;  %7950 = vmatpush3.bf16.xpose.msk.msra.mxu1 %vm9111_vm1, %v7945_v53  ;;  %v9518_v53 = vld [vmem:[%s8947_s10 + $0x40] sm:$0xff] }
 0x381   : > { %8540 = vrcp.f32 %v1110_v63  ;;  %v1112_v43 = vpop.xlane.xlu0 %1111  ;;  %v1141_v44 = vmul.f32 %v8531_v18, %v9367_v35  ;;  %v1585_v29 = vpop.f32.mrb[57].mxu1  ;;  %7953 = vmatprep.subr.msk.bf16.mxu1 %vm9111_vm1, %v7951_v11 }
 0x382   : > { %8542 = vrcp.f32 %v1112_v43  ;;  %6676 = vmatmul.mubr.f32.gmra.mrb[20].mxu0 %v1140_v20  ;;  %v7957_v1 = vpack.c.bf16 %v6795_v57, %v1585_v29  ;;  %v6798_v55 = vpop.f32.mrb[58].mxu1  ;;  %v5485_v43 = vld [vmem:[%s10795_s1 + $0x100] sm:$0xff] }
 0x383   : > { %v8533_v58 = vpop.eup %8532  ;;  %6678 = vmatprep.mubr.f32.mxu0 %v1141_v44  ;;  %7848 = vmatpush3.bf16.msra.mxu0 %v7845_v41  ;;  %v9534_v41 = vld [vmem:[%s8947_s10 + $0x60] sm:$0xff]  ;;  %v1595_v60 = vpop.f32.mrb[59].mxu1  ;;  %v5486_v44 = vld [vmem:[%s10795_s1 + $0x108] sm:$0xff] }
 0x384   : > { %v8535_v2 = vpop.eup %8534  ;;  %v1114_v33 = vpop.xlane.xlu1 %1113  ;;  %v1142_v35 = vmul.f32 %v8533_v58, %v9373_v46  ;;  %7850 = vmatprep.subr.bf16.mxu0 %v7849_v38  ;;  %v7963_v14 = vpack.c.bf16 %v6798_v55, %v1595_v60  ;;  %v8029_v24 = vpack.c.bf16 %v5486_v44, %v5485_v43  ;;  %v5495_v60 = vld [vmem:[%s10795_s1 + $0x150] sm:$0xff] }
 0x385   : > { %8544 = vrcp.f32 %v1114_v33  ;;  %v1116_v3 = vpop.xlane.xlu0 %1115  ;;  %v1143_v5 = vmul.f32 %v8535_v2, %v9375_v56  ;;  %v6801_v59 = vpop.f32.mrb[60].mxu1 }
 0x386   : > { %8546 = vrcp.f32 %v1116_v3  ;;  %6679 = vmatmul.mubr.f32.gmra.mrb[22].mxu0 %v1142_v35 }
 0x387   : > { %v8537_v46 = vpop.eup %8536  ;;  %6681 = vmatprep.mubr.f32.mxu0 %v1143_v5  ;;  %7852 = vmatpush3.bf16.msra.mxu0 %v7849_v38 }
 0x388   : > { %v8539_v9 = vpop.eup %8538  ;;  %v1118_v10 = vpop.xlane.xlu1 %1117  ;;  %v1144_v56 = vmul.f32 %v8537_v46, %v9380_v61  ;;  %7854 = vmatprep.subr.bf16.mxu0 %v7853_v34  ;;  %7956 = vmatpush3.bf16.xpose.msk.msra.mxu1 %vm9111_vm1, %v7951_v11 }
 0x389   : > { %8548 = vrcp.f32 %v1118_v10  ;;  %v1145_v42 = vmul.f32 %v8539_v9, %v9382_v37  ;;  %v5383_v37 = vld [vmem:[%s10795_s1 + $0xf0] sm:$0xff]  ;;  %7959 = vmatprep.subr.msk.bf16.mxu1 %vm9111_vm1, %v7957_v1  ;;  %v1605_v11 = vpop.f32.mrb[61].mxu1 }
 0x38a   : > { %6682 = vmatmul.mubr.f32.gmra.mrb[24].mxu0 %v1144_v56  ;;  %v7969_v18 = vpack.c.bf16 %v6801_v59, %v1605_v11  ;;  %v6804_v63 = vpop.f32.mrb[62].mxu1  ;;  %v5487_v56 = vld [vmem:[%s10795_s1 + $0x110] sm:$0xff] }
 0x38b   : > { %v8541_v15 = vpop.eup %8540  ;;  %6684 = vmatprep.mubr.f32.mxu0 %v1145_v42  ;;  %7856 = vmatpush3.bf16.msra.mxu0 %v7853_v34  ;;  %v1615_v20 = vpop.f32.mrb[63].mxu1 }
 0x38c   : > { %v8543_v61 = vpop.eup %8542  ;;  %v1146_v27 = vmul.f32 %v8541_v15, %v9386_v62  ;;  %7858 = vmatprep.subr.bf16.mxu0 %v7857_v39  ;;  %v7975_v38 = vpack.c.bf16 %v6804_v63, %v1615_v20  ;;  %v5489_v15 = vld [vmem:[%s10795_s1 + $0x120] sm:$0xff]  ;;  %v5498_v20 = vld [vmem:[%s10795_s1 + $0x168] sm:$0xff] }
 0x38d   : > { %v1147_v17 = vmul.f32 %v8543_v61, %v9388_v23  ;;  %v7865_v23 = vpack.c.bf16 %v5384_v21, %v5383_v37  ;;  %v5490_v61 = vld [vmem:[%s10795_s1 + $0x128] sm:$0xff]  ;;  %v5491_v37 = vld [vmem:[%s10795_s1 + $0x130] sm:$0xff]  ;;  %v5492_v21 = vld [vmem:[%s10795_s1 + $0x138] sm:$0xff] }
 0x38e   : > { %6685 = vmatmul.mubr.f32.gmra.mrb[26].mxu0 %v1146_v27  ;;  %v5497_v63 = vld [vmem:[%s10795_s1 + $0x160] sm:$0xff] }
 0x38f   : > { %v8545_v22 = vpop.eup %8544  ;;  %6687 = vmatprep.mubr.f32.mxu0 %v1147_v17  ;;  %7860 = vmatpush3.bf16.msra.mxu0 %v7857_v39  ;;  %v5488_v39 = vld [vmem:[%s10795_s1 + $0x118] sm:$0xff]  ;;  %v8037_v17 = vpack.c.bf16 %v5490_v61, %v5489_v15  ;;  %v8053_v44 = vpack.c.bf16 %v5498_v20, %v5497_v63  ;;  %v5502_v15 = vld [vmem:[%s10796_s2 + $0x108] sm:$0xff] }
 0x390   : > { %v8547_v62 = vpop.eup %8546  ;;  %v1148_v47 = vmul.f32 %v8545_v22, %v9392_v49  ;;  %7862 = vmatprep.subr.bf16.mxu0 %v7861_v16  ;;  %7962 = vmatpush3.bf16.xpose.msk.msra.mxu1 %vm9111_vm1, %v7957_v1  ;;  %v9486_v49 = vld [vmem:[%s8947_s10] sm:$0xff]  ;;  %v8033_v13 = vpack.c.bf16 %v5488_v39, %v5487_v56  ;;  %v5500_v56 = vld [vmem:[%s10795_s1 + $0x178] sm:$0xff]  ;;  %v5514_v63 = vld [vmem:[%s10796_s2 + $0x168] sm:$0xff] }
 0x391   : > { %v1149_v48 = vmul.f32 %v8547_v62, %v9394_v52  ;;  %v9490_v52 = vld [vmem:[%s8947_s10 + $0x8] sm:$0xff]  ;;  %7965 = vmatprep.subr.msk.bf16.mxu1 %vm9111_vm1, %v7963_v14 }
 0x392   : > { %6688 = vmatmul.mubr.f32.gmra.mrb[28].mxu0 %v1148_v47  ;;  %v8041_v47 = vpack.c.bf16 %v5492_v21, %v5491_v37  ;;  %v5504_v37 = vld [vmem:[%s10796_s2 + $0x118] sm:$0xff] }
 0x393   : > { %v8549_v25 = vpop.eup %8548  ;;  %6690 = vmatprep.mubr.f32.mxu0 %v1149_v48  ;;  %7864 = vmatpush3.bf16.msra.mxu0 %v7861_v16  ;;  %v5494_v48 = vld [vmem:[%s10795_s1 + $0x148] sm:$0xff] }
 0x394   : > { %v1150_v26 = vmul.f32 %v8549_v25, %v9404_v0  ;;  %7866 = vmatprep.subr.bf16.mxu0 %v7865_v23  ;;  %v9498_v0 = vld [vmem:[%s8947_s10 + $0x18] sm:$0xff] }
 0x396   : > { %6691 = vmatmul.mubr.f32.gmra.mrb[30].mxu0 %v1150_v26 }
 0x397   : > { %7868 = vmatpush3.bf16.msra.mxu0 %v7865_v23  ;;  %6725 = vmatprep.mubr.f32.mxu0 %v9486_v49  ;;  %v5493_v23 = vld [vmem:[%s10795_s1 + $0x140] sm:$0xff] }
 0x398   : > { %7968 = vmatpush3.bf16.xpose.msk.msra.mxu1 %vm9111_vm1, %v7963_v14  ;;  %v8045_v55 = vpack.c.bf16 %v5494_v48, %v5493_v23  ;;  %v5496_v14 = vld [vmem:[%s10795_s1 + $0x158] sm:$0xff]  ;;  %v5507_v23 = vld [vmem:[%s10796_s2 + $0x130] sm:$0xff] }
 0x399   : > { %7971 = vmatprep.subr.msk.bf16.mxu1 %vm9111_vm1, %v7969_v18  ;;  %v5508_v48 = vld [vmem:[%s10796_s2 + $0x138] sm:$0xff] }
 0x39a   : > { %6726 = vmatmul.mubr.f32.vlgmr.msra.gmra.mrb[32].mxu0 %v9490_v52 }
 0x39b   : > { %6728 = vmatprep.mubr.f32.mxu0 %v9494_v32 }
 0x39e   : > { %6729 = vmatmul.mubr.f32.gmra.mrb[34].mxu0 %v9498_v0 }
 0x39f   : > { %6731 = vmatprep.mubr.f32.mxu0 %v9502_v30 }
 0x3a0   : > { %7974 = vmatpush3.bf16.xpose.msk.msra.mxu1 %vm9111_vm1, %v7969_v18  ;;  %v8049_v18 = vpack.c.bf16 %v5496_v14, %v5495_v60  ;;  %v5511_v14 = vld [vmem:[%s10796_s2 + $0x150] sm:$0xff] }
 0x3a1   : > { %7977 = vmatprep.subr.msk.bf16.mxu1 %vm9111_vm1, %v7975_v38 }
 0x3a2   : > { %6732 = vmatmul.mubr.f32.gmra.mrb[36].mxu0 %v9506_v31 }
 0x3a3   : > { %6734 = vmatprep.mubr.f32.mxu0 %v9510_v4 }
 0x3a6   : > { %6735 = vmatmul.mubr.f32.gmra.mrb[38].mxu0 %v9514_v36 }
 0x3a7   : > { %6737 = vmatprep.mubr.f32.mxu0 %v9518_v53 }
 0x3a8   : > { %7980 = vmatpush3.bf16.xpose.msk.msra.mxu1 %vm9111_vm1, %v7975_v38 }
 0x3a9   : > { %8030 = vmatprep.subr.bf16.mxu1 %v8029_v24 }
 0x3aa   : > { %6738 = vmatmul.mubr.f32.gmra.mrb[40].mxu0 %v9522_v8 }
 0x3ab   : > { %6740 = vmatprep.mubr.f32.mxu0 %v9526_v54 }
 0x3ae   : > { %6741 = vmatmul.mubr.f32.gmra.mrb[42].mxu0 %v9530_v40 }
 0x3af   : > { %6743 = vmatprep.mubr.f32.mxu0 %v9534_v41 }
 0x3b2   : > { %6744 = vmatmul.mubr.f32.gmra.mrb[44].mxu0 %v9538_v45 }
 0x3b3   : > { %6746 = vmatprep.mubr.f32.mxu0 %v9542_v50 }
 0x3b6   : > { %6747 = vmatmul.mubr.f32.gmra.mrb[46].mxu0 %v9546_v51 }
 0x3b7   : > { %6837 = vmatprep.mubr.f32.mxu0 %v9486_v49 }
 0x44d   : > { %v9568_v28 = vpop.f32.mrb[16].mxu0 }
 0x44e   : > { %v9570_v57 = vpop.f32.mrb[17].mxu0 }
 0x451   : > { %v9572_v29 = vpop.f32.mrb[18].mxu0 }
 0x452   : > { %v9574_v58 = vpop.f32.mrb[19].mxu0 }
 0x455   : > { %v9576_v1 = vpop.f32.mrb[20].mxu0 }
 0x456   : > { %v9578_v2 = vpop.f32.mrb[21].mxu0 }
 0x459   : > { %v9580_v33 = vpop.f32.mrb[22].mxu0 }
 0x45a   : > { %v9582_v35 = vpop.f32.mrb[23].mxu0 }
 0x45d   : > { %v9584_v34 = vpop.f32.mrb[24].mxu0 }
 0x45e   : > { %v9586_v3 = vpop.f32.mrb[25].mxu0 }
 0x461   : > { %v9588_v5 = vpop.f32.mrb[26].mxu0 }
 0x462   : > { %v9590_v6 = vpop.f32.mrb[27].mxu0 }
 0x465   : > { %v9592_v7 = vpop.f32.mrb[28].mxu0 }
 0x466   : > { %v9594_v46 = vpop.f32.mrb[29].mxu0 }
 0x469   : > { %v9596_v9 = vpop.f32.mrb[30].mxu0 }
 0x46a   : > { %v9598_v10 = vpop.f32.mrb[31].mxu0 }
 0x46d   : > { %v6727_v42 = vpop.f32.mrb[32].mxu0 }
 0x46e   : > { %v1383_v12 = vpop.f32.mrb[33].mxu0 }
 0x46f   : > { %6893 = vmatprep.mubr.msk.f32.mxu1 %vm749_vm0, %v1383_v12 }
 0x470   : > { %6894 = vmatmul.mubr.msk.f32.vlgmr.msra.gmra.mrb[64].mxu1 %vm749_vm0, %v6727_v42 }
 0x471   : > { %v6730_v27 = vpop.f32.mrb[34].mxu0  ;;  %8032 = vmatpush3.bf16.msra.mxu1 %v8029_v24  ;;  %v5499_v24 = vld [vmem:[%s10795_s1 + $0x170] sm:$0xff] }
 0x472   : > { %v1393_v16 = vpop.f32.mrb[35].mxu0  ;;  %8034 = vmatprep.subr.bf16.mxu1 %v8033_v13  ;;  %v8057_v12 = vpack.c.bf16 %v5500_v56, %v5499_v24  ;;  %v5401_v24 = vld [vmem:[%s10797_s3 + $0x80] sm:$0xff]  ;;  %v5402_v56 = vld [vmem:[%s10797_s3 + $0x88] sm:$0xff] }
 0x473   : > { %6896 = vmatprep.mubr.msk.f32.mxu1 %vm749_vm0, %v1393_v16 }
 0x474   : > { %6897 = vmatmul.mubr.msk.f32.gmra.mrb[66].mxu1 %vm749_vm0, %v6730_v27 }
 0x475   : > { %v6733_v22 = vpop.f32.mrb[36].mxu0  ;;  %8036 = vmatpush3.bf16.msra.mxu1 %v8033_v13  ;;  %v5501_v13 = vld [vmem:[%s10796_s2 + $0x100] sm:$0xff] }
 0x476   : > { %v1403_v62 = vpop.f32.mrb[37].mxu0  ;;  %8038 = vmatprep.subr.bf16.mxu1 %v8037_v17  ;;  %v8061_v16 = vpack.c.bf16 %v5502_v15, %v5501_v13  ;;  %v5405_v15 = vld [vmem:[%s10797_s3 + $0xa0] sm:$0xff] }
 0x477   : > { %6899 = vmatprep.mubr.msk.f32.mxu1 %vm749_vm0, %v1403_v62  ;;  %v5506_v62 = vld [vmem:[%s10796_s2 + $0x128] sm:$0xff] }
 0x478   : > { %6900 = vmatmul.mubr.msk.f32.gmra.mrb[68].mxu1 %vm749_vm0, %v6733_v22  ;;  %v5505_v22 = vld [vmem:[%s10796_s2 + $0x120] sm:$0xff] }
 0x479   : > { %v6736_v25 = vpop.f32.mrb[38].mxu0  ;;  %8040 = vmatpush3.bf16.msra.mxu1 %v8037_v17  ;;  %v5503_v17 = vld [vmem:[%s10796_s2 + $0x110] sm:$0xff] }
 0x47a   : > { %v1413_v26 = vpop.f32.mrb[39].mxu0  ;;  %8042 = vmatprep.subr.bf16.mxu1 %v8041_v47  ;;  %v8065_v21 = vpack.c.bf16 %v5504_v37, %v5503_v17  ;;  %v5408_v17 = vld [vmem:[%s10797_s3 + $0xb8] sm:$0xff] }
 0x47b   : > { %6902 = vmatprep.mubr.msk.f32.mxu1 %vm749_vm0, %v1413_v26  ;;  %v5509_v26 = vld [vmem:[%s10796_s2 + $0x140] sm:$0xff] }
 0x47c   : > { %6903 = vmatmul.mubr.msk.f32.gmra.mrb[70].mxu1 %vm749_vm0, %v6736_v25  ;;  %v8073_v25 = vpack.c.bf16 %v5508_v48, %v5507_v23  ;;  %v5412_v23 = vld [vmem:[%s10797_s3 + $0xd8] sm:$0xff] }
 0x47d   : > { %v6739_v59 = vpop.f32.mrb[40].mxu0  ;;  %8044 = vmatpush3.bf16.msra.mxu1 %v8041_v47  ;;  %v8069_v47 = vpack.c.bf16 %v5506_v62, %v5505_v22  ;;  %v5410_v22 = vld [vmem:[%s10797_s3 + $0xc8] sm:$0xff] }
 0x47e   : > { %v1423_v11 = vpop.f32.mrb[41].mxu0  ;;  %8046 = vmatprep.subr.bf16.mxu1 %v8045_v55 }
 0x47f   : > { %6905 = vmatprep.mubr.msk.f32.mxu1 %vm749_vm0, %v1423_v11 }
 0x480   : > { %6906 = vmatmul.mubr.msk.f32.gmra.mrb[72].mxu1 %vm749_vm0, %v6739_v59  ;;  %v5512_v59 = vld [vmem:[%s10796_s2 + $0x158] sm:$0xff] }
 0x481   : > { %v6742_v38 = vpop.f32.mrb[42].mxu0  ;;  %8048 = vmatpush3.bf16.msra.mxu1 %v8045_v55  ;;  %v5510_v55 = vld [vmem:[%s10796_s2 + $0x148] sm:$0xff]  ;;  %v8081_v11 = vpack.c.bf16 %v5512_v59, %v5511_v14  ;;  %v5416_v14 = vld [vmem:[%s10797_s3 + $0xf8] sm:$0xff] }
 0x482   : > { %v1433_v43 = vpop.f32.mrb[43].mxu0  ;;  %8050 = vmatprep.subr.bf16.mxu1 %v8049_v18  ;;  %v8077_v60 = vpack.c.bf16 %v5510_v55, %v5509_v26  ;;  %v5414_v26 = vld [vmem:[%s10797_s3 + $0xe8] sm:$0xff] }
 0x483   : > { %6908 = vmatprep.mubr.msk.f32.mxu1 %vm749_vm0, %v1433_v43  ;;  %v5516_v43 = vld [vmem:[%s10796_s2 + $0x178] sm:$0xff] }
 0x484   : > { %6909 = vmatmul.mubr.msk.f32.gmra.mrb[74].mxu1 %vm749_vm0, %v6742_v38  ;;  %v5515_v38 = vld [vmem:[%s10796_s2 + $0x170] sm:$0xff] }
 0x485   : > { %v6745_v39 = vpop.f32.mrb[44].mxu0  ;;  %8052 = vmatpush3.bf16.msra.mxu1 %v8049_v18  ;;  %v5513_v18 = vld [vmem:[%s10796_s2 + $0x160] sm:$0xff] }
 0x486   : > { %v1443_v42 = vpop.f32.mrb[45].mxu0  ;;  %8054 = vmatprep.subr.bf16.mxu1 %v8053_v44  ;;  %v8085_v20 = vpack.c.bf16 %v5514_v63, %v5513_v18 }
 0x487   : > { %6911 = vmatprep.mubr.msk.f32.mxu1 %vm749_vm0, %v1443_v42  ;;  %v7901_v42 = vpack.c.bf16 %v5402_v56, %v5401_v24 }
 0x488   : > { %6912 = vmatmul.mubr.msk.f32.gmra.mrb[76].mxu1 %vm749_vm0, %v6745_v39  ;;  %v5403_v39 = vld [vmem:[%s10797_s3 + $0x90] sm:$0xff] }
 0x489   : > { %v6748_v61 = vpop.f32.mrb[46].mxu0  ;;  %8056 = vmatpush3.bf16.msra.mxu1 %v8053_v44  ;;  %v8089_v44 = vpack.c.bf16 %v5516_v43, %v5515_v38  ;;  %7902 = vmatprep.subr.bf16.mxu0 %v7901_v42 }
 0x48a   : > { %v1453_v27 = vpop.f32.mrb[47].mxu0  ;;  %8058 = vmatprep.subr.bf16.mxu1 %v8057_v12  ;;  %7904 = vmatpush3.bf16.msra.mxu0 %v7901_v42 }
 0x48b   : > { %6914 = vmatprep.mubr.msk.f32.mxu1 %vm749_vm0, %v1453_v27 }
 0x48c   : > { %6915 = vmatmul.mubr.msk.f32.gmra.mrb[78].mxu1 %vm749_vm0, %v6748_v61  ;;  %v5406_v61 = vld [vmem:[%s10797_s3 + $0xa8] sm:$0xff] }
 0x48d   : > { %8060 = vmatpush3.bf16.msra.mxu1 %v8057_v12  ;;  %7069 = vmatprep.mubr.f32.mxu1 %v9486_v49  ;;  %v5404_v12 = vld [vmem:[%s10797_s3 + $0x98] sm:$0xff]  ;;  %v7909_v27 = vpack.c.bf16 %v5406_v61, %v5405_v15 }
 0x48e   : > { %8062 = vmatprep.subr.bf16.mxu1 %v8061_v16  ;;  %v7905_v13 = vpack.c.bf16 %v5404_v12, %v5403_v39 }
 0x490   : > { %7070 = vmatmul.mubr.f32.vlgmr.msra.gmra.mrb[80].mxu1 %v9490_v52  ;;  %7906 = vmatprep.subr.bf16.mxu0 %v7905_v13 }
 0x491   : > { %8064 = vmatpush3.bf16.msra.mxu1 %v8061_v16  ;;  %7072 = vmatprep.mubr.f32.mxu1 %v9494_v32  ;;  %v5407_v16 = vld [vmem:[%s10797_s3 + $0xb0] sm:$0xff] }
 0x492   : > { %8066 = vmatprep.subr.bf16.mxu1 %v8065_v21  ;;  %7908 = vmatpush3.bf16.msra.mxu0 %v7905_v13  ;;  %v7913_v37 = vpack.c.bf16 %v5408_v17, %v5407_v16 }
 0x493   : > { %7910 = vmatprep.subr.bf16.mxu0 %v7909_v27 }
 0x494   : > { %7073 = vmatmul.mubr.f32.gmra.mrb[82].mxu1 %v9498_v0 }
 0x495   : > { %8068 = vmatpush3.bf16.msra.mxu1 %v8065_v21  ;;  %7075 = vmatprep.mubr.f32.mxu1 %v9502_v30  ;;  %v5409_v21 = vld [vmem:[%s10797_s3 + $0xc0] sm:$0xff] }
 0x496   : > { %8070 = vmatprep.subr.bf16.mxu1 %v8069_v47  ;;  %7912 = vmatpush3.bf16.msra.mxu0 %v7909_v27  ;;  %v7917_v62 = vpack.c.bf16 %v5410_v22, %v5409_v21 }
 0x497   : > { %7914 = vmatprep.subr.bf16.mxu0 %v7913_v37 }
 0x498   : > { %7076 = vmatmul.mubr.f32.gmra.mrb[84].mxu1 %v9506_v31 }
 0x499   : > { %8072 = vmatpush3.bf16.msra.mxu1 %v8069_v47  ;;  %7078 = vmatprep.mubr.f32.mxu1 %v9510_v4  ;;  %v5411_v47 = vld [vmem:[%s10797_s3 + $0xd0] sm:$0xff] }
 0x49a   : > { %8074 = vmatprep.subr.bf16.mxu1 %v8073_v25  ;;  %7916 = vmatpush3.bf16.msra.mxu0 %v7913_v37  ;;  %v7921_v48 = vpack.c.bf16 %v5412_v23, %v5411_v47 }
 0x49b   : > { %7918 = vmatprep.subr.bf16.mxu0 %v7917_v62 }
 0x49c   : > { %7079 = vmatmul.mubr.f32.gmra.mrb[86].mxu1 %v9514_v36 }
 0x49d   : > { %8076 = vmatpush3.bf16.msra.mxu1 %v8073_v25  ;;  %7081 = vmatprep.mubr.f32.mxu1 %v9518_v53  ;;  %v5413_v25 = vld [vmem:[%s10797_s3 + $0xe0] sm:$0xff] }
 0x49e   : > { %8078 = vmatprep.subr.bf16.mxu1 %v8077_v60  ;;  %7920 = vmatpush3.bf16.msra.mxu0 %v7917_v62  ;;  %v7925_v55 = vpack.c.bf16 %v5414_v26, %v5413_v25 }
 0x49f   : > { %7922 = vmatprep.subr.bf16.mxu0 %v7921_v48 }
 0x4a0   : > { %7082 = vmatmul.mubr.f32.gmra.mrb[88].mxu1 %v9522_v8 }
 0x4a1   : > { %8080 = vmatpush3.bf16.msra.mxu1 %v8077_v60  ;;  %7084 = vmatprep.mubr.f32.mxu1 %v9526_v54  ;;  %v5415_v60 = vld [vmem:[%s10797_s3 + $0xf0] sm:$0xff] }
 0x4a2   : > { %8082 = vmatprep.subr.bf16.mxu1 %v8081_v11  ;;  %7924 = vmatpush3.bf16.msra.mxu0 %v7921_v48  ;;  %v7929_v59 = vpack.c.bf16 %v5416_v14, %v5415_v60 }
 0x4a3   : > { %7926 = vmatprep.subr.bf16.mxu0 %v7925_v55 }
 0x4a4   : > { %7085 = vmatmul.mubr.f32.gmra.mrb[90].mxu1 %v9530_v40 }
 0x4a5   : > { %8084 = vmatpush3.bf16.msra.mxu1 %v8081_v11  ;;  %7087 = vmatprep.mubr.f32.mxu1 %v9534_v41 }
 0x4a6   : > { %8086 = vmatprep.subr.bf16.mxu1 %v8085_v20  ;;  %7928 = vmatpush3.bf16.msra.mxu0 %v7925_v55 }
 0x4a7   : > { %7930 = vmatprep.subr.bf16.mxu0 %v7929_v59 }
 0x4a8   : > { %7088 = vmatmul.mubr.f32.gmra.mrb[92].mxu1 %v9538_v45 }
 0x4a9   : > { %8088 = vmatpush3.bf16.msra.mxu1 %v8085_v20  ;;  %7090 = vmatprep.mubr.f32.mxu1 %v9542_v50 }
 0x4aa   : > { %8090 = vmatprep.subr.bf16.mxu1 %v8089_v44  ;;  %7932 = vmatpush3.bf16.msra.mxu0 %v7929_v59 }
 0x4ac   : > { %7091 = vmatmul.mubr.f32.gmra.mrb[94].mxu1 %v9546_v51 }
 0x4ad   : > { %8092 = vmatpush3.bf16.msra.mxu1 %v8089_v44  ;;  %7125 = vmatprep.mubr.f32.mxu1 %v9486_v49 }
 0x4ae   : > { %6838 = vmatmul.mubr.f32.vlgmr.msra.gmra.mrb[48].mxu0 %v9490_v52 }
 0x4af   : > { %6840 = vmatprep.mubr.f32.mxu0 %v9494_v32 }
 0x4b0   : > { %7126 = vmatmul.mubr.f32.vlgmr.msra.gmra.mrb[96].mxu1 %v9490_v52 }
 0x4b1   : > { %7128 = vmatprep.mubr.f32.mxu1 %v9494_v32 }
 0x4b2   : > { %6841 = vmatmul.mubr.f32.gmra.mrb[50].mxu0 %v9498_v0 }
 0x4b3   : > { %6843 = vmatprep.mubr.f32.mxu0 %v9502_v30 }
 0x4b4   : > { %7129 = vmatmul.mubr.f32.gmra.mrb[98].mxu1 %v9498_v0 }
 0x4b5   : > { %7131 = vmatprep.mubr.f32.mxu1 %v9502_v30 }
 0x4b6   : > { %6844 = vmatmul.mubr.f32.gmra.mrb[52].mxu0 %v9506_v31 }
 0x4b7   : > { %6846 = vmatprep.mubr.f32.mxu0 %v9510_v4 }
 0x4b8   : > { %7132 = vmatmul.mubr.f32.gmra.mrb[100].mxu1 %v9506_v31 }
 0x4b9   : > { %7134 = vmatprep.mubr.f32.mxu1 %v9510_v4 }
 0x4ba   : > { %6847 = vmatmul.mubr.f32.gmra.mrb[54].mxu0 %v9514_v36 }
 0x4bb   : > { %6849 = vmatprep.mubr.f32.mxu0 %v9518_v53 }
 0x4bc   : > { %7135 = vmatmul.mubr.f32.gmra.mrb[102].mxu1 %v9514_v36 }
 0x4bd   : > { %7137 = vmatprep.mubr.f32.mxu1 %v9518_v53 }
 0x4be   : > { %6850 = vmatmul.mubr.f32.gmra.mrb[56].mxu0 %v9522_v8 }
 0x4bf   : > { %6852 = vmatprep.mubr.f32.mxu0 %v9526_v54 }
 0x4c0   : > { %7138 = vmatmul.mubr.f32.gmra.mrb[104].mxu1 %v9522_v8 }
 0x4c1   : > { %7140 = vmatprep.mubr.f32.mxu1 %v9526_v54 }
 0x4c2   : > { %6853 = vmatmul.mubr.f32.gmra.mrb[58].mxu0 %v9530_v40 }
 0x4c3   : > { %6855 = vmatprep.mubr.f32.mxu0 %v9534_v41 }
 0x4c4   : > { %7141 = vmatmul.mubr.f32.gmra.mrb[106].mxu1 %v9530_v40 }
 0x4c5   : > { %7143 = vmatprep.mubr.f32.mxu1 %v9534_v41 }
 0x4c6   : > { %6856 = vmatmul.mubr.f32.gmra.mrb[60].mxu0 %v9538_v45 }
 0x4c7   : > { %6858 = vmatprep.mubr.f32.mxu0 %v9542_v50 }
 0x4c8   : > { %7144 = vmatmul.mubr.f32.gmra.mrb[108].mxu1 %v9538_v45 }
 0x4c9   : > { %7146 = vmatprep.mubr.f32.mxu1 %v9542_v50 }
 0x4ca   : > { %6859 = vmatmul.mubr.f32.gmra.mrb[62].mxu0 %v9546_v51 }
 0x4cc   : > { %7147 = vmatmul.mubr.f32.gmra.mrb[110].mxu1 %v9546_v51 }
 0x543   : > { %v6895_v52 = vpop.f32.mrb[64].mxu1 }
 0x544   : > { %v9801_v32 = vmul.f32 0.17677669, %v6895_v52  ;;  %v1948_v0 = vpop.f32.mrb[65].mxu1 }
 0x545   : > { %v9803_v30 = vmul.f32 0.17677669, %v1948_v0 }
 0x546   : > { %2045 = vmax.xlane.f32.xlu1 %v9801_v32 }
 0x547   : > { %2043 = vmax.xlane.f32.xlu0 %v9803_v30  ;;  %v6898_v31 = vpop.f32.mrb[66].mxu1 }
 0x548   : > { %v9807_v4 = vmul.f32 0.17677669, %v6898_v31  ;;  %v1958_v36 = vpop.f32.mrb[67].mxu1 }
 0x549   : > { %v9809_v53 = vmul.f32 0.17677669, %v1958_v36 }
 0x54a   : > { %2049 = vmax.xlane.f32.xlu1 %v9807_v4 }
 0x54b   : > { %2047 = vmax.xlane.f32.xlu0 %v9809_v53  ;;  %v6901_v8 = vpop.f32.mrb[68].mxu1 }
 0x54c   : > { %v9813_v54 = vmul.f32 0.17677669, %v6901_v8  ;;  %v1968_v40 = vpop.f32.mrb[69].mxu1 }
 0x54d   : > { %v9815_v41 = vmul.f32 0.17677669, %v1968_v40 }
 0x54e   : > { %2053 = vmax.xlane.f32.xlu1 %v9813_v54 }
 0x54f   : > { %2051 = vmax.xlane.f32.xlu0 %v9815_v41  ;;  %v6904_v45 = vpop.f32.mrb[70].mxu1 }
 0x550   : > { %v9819_v50 = vmul.f32 0.17677669, %v6904_v45  ;;  %v1978_v51 = vpop.f32.mrb[71].mxu1 }
 0x551   : > { %v9821_v11 = vmul.f32 0.17677669, %v1978_v51 }
 0x552   : > { %2057 = vmax.xlane.f32.xlu1 %v9819_v50 }
 0x553   : > { %2055 = vmax.xlane.f32.xlu0 %v9821_v11  ;;  %v6907_v18 = vpop.f32.mrb[72].mxu1 }
 0x554   : > { %v9825_v63 = vmul.f32 0.17677669, %v6907_v18  ;;  %v1988_v20 = vpop.f32.mrb[73].mxu1 }
 0x555   : > { %v9827_v38 = vmul.f32 0.17677669, %v1988_v20 }
 0x556   : > { %2061 = vmax.xlane.f32.xlu1 %v9825_v63 }
 0x557   : > { %2059 = vmax.xlane.f32.xlu0 %v9827_v38  ;;  %v6910_v43 = vpop.f32.mrb[74].mxu1 }
 0x558   : > { %v9831_v44 = vmul.f32 0.17677669, %v6910_v43  ;;  %v1998_v24 = vpop.f32.mrb[75].mxu1 }
 0x559   : > { %v9833_v56 = vmul.f32 0.17677669, %v1998_v24 }
 0x55a   : > { %2065 = vmax.xlane.f32.xlu1 %v9831_v44 }
 0x55b   : > { %2063 = vmax.xlane.f32.xlu0 %v9833_v56  ;;  %v6913_v39 = vpop.f32.mrb[76].mxu1 }
 0x55c   : > { %v9837_v42 = vmul.f32 0.17677669, %v6913_v39  ;;  %v2008_v12 = vpop.f32.mrb[77].mxu1 }
 0x55d   : > { %v9839_v13 = vmul.f32 0.17677669, %v2008_v12 }
 0x55e   : > { %2069 = vmax.xlane.f32.xlu1 %v9837_v42 }
 0x55f   : > { %2067 = vmax.xlane.f32.xlu0 %v9839_v13  ;;  %v6916_v15 = vpop.f32.mrb[78].mxu1 }
 0x560   : > { %v9843_v61 = vmul.f32 0.17677669, %v6916_v15  ;;  %v2018_v27 = vpop.f32.mrb[79].mxu1 }
 0x561   : > { %v9845_v16 = vmul.f32 0.17677669, %v2018_v27 }
 0x562   : > { %2073 = vmax.xlane.f32.xlu1 %v9843_v61 }
 0x563   : > { %2071 = vmax.xlane.f32.xlu0 %v9845_v16  ;;  %v7071_v17 = vpop.f32.mrb[80].mxu1 }
 0x564   : > { %v2806_v37 = vpop.f32.mrb[81].mxu1 }
 0x565   : > { %7237 = vmatprep.mubr.msk.f32.mxu1 %vm749_vm0, %v2806_v37 }
 0x567   : > { %v7074_v21 = vpop.f32.mrb[82].mxu1 }
 0x568   : > { %v2816_v22 = vpop.f32.mrb[83].mxu1 }
 0x56b   : > { %v7077_v62 = vpop.f32.mrb[84].mxu1 }
 0x56c   : > { %v2826_v47 = vpop.f32.mrb[85].mxu1 }
 0x56f   : > { %v7080_v23 = vpop.f32.mrb[86].mxu1 }
 0x570   : > { %v2836_v48 = vpop.f32.mrb[87].mxu1 }
 0x573   : > { %v9850_v25 = vpop.f32.mrb[88].mxu1 }
 0x574   : > { %v2846_v26 = vpop.f32.mrb[89].mxu1 }
 0x577   : > { %v9852_v55 = vpop.f32.mrb[90].mxu1 }
 0x578   : > { %v9854_v60 = vpop.f32.mrb[91].mxu1 }
 0x57b   : > { %v9856_v14 = vpop.f32.mrb[92].mxu1 }
 0x57c   : > { %v9858_v59 = vpop.f32.mrb[93].mxu1 }
 0x57f   : > { %v9860_v52 = vpop.f32.mrb[94].mxu1 }
 0x580   : > { %v9862_v0 = vpop.f32.mrb[95].mxu1 }
 0x583   : > { %v7127_v31 = vpop.f32.mrb[96].mxu1 }
 0x584   : > { %v2968_v36 = vpop.f32.mrb[97].mxu1 }
 0x585   : > { %v8125_v8 = vpack.c.bf16 %v7127_v31, %v2968_v36 }
 0x587   : > { %8127 = vmatprep.subr.msk.bf16.mxu1 %vm9111_vm1, %v8125_v8  ;;  %v7130_v40 = vpop.f32.mrb[98].mxu1 }
 0x588   : > { %8130 = vmatpush3.bf16.xpose.msk.msra.mxu1 %vm9111_vm1, %v8125_v8  ;;  %v2978_v45 = vpop.f32.mrb[99].mxu1 }
 0x589   : > { %v8131_v51 = vpack.c.bf16 %v7130_v40, %v2978_v45 }
 0x58b   : > { %8133 = vmatprep.subr.msk.bf16.mxu1 %vm9111_vm1, %v8131_v51  ;;  %v7133_v18 = vpop.f32.mrb[100].mxu1 }
 0x58c   : > { %v2988_v20 = vpop.f32.mrb[101].mxu1 }
 0x58d   : > { %v8137_v43 = vpack.c.bf16 %v7133_v18, %v2988_v20 }
 0x58f   : > { %v7136_v24 = vpop.f32.mrb[102].mxu1 }
 0x590   : > { %8136 = vmatpush3.bf16.xpose.msk.msra.mxu1 %vm9111_vm1, %v8131_v51  ;;  %v2998_v39 = vpop.f32.mrb[103].mxu1 }
 0x591   : > { %8139 = vmatprep.subr.msk.bf16.mxu1 %vm9111_vm1, %v8137_v43  ;;  %v8143_v12 = vpack.c.bf16 %v7136_v24, %v2998_v39 }
 0x593   : > { %v7139_v15 = vpop.f32.mrb[104].mxu1 }
 0x594   : > { %v3008_v27 = vpop.f32.mrb[105].mxu1 }
 0x595   : > { %v8149_v37 = vpack.c.bf16 %v7139_v15, %v3008_v27 }
 0x597   : > { %v7142_v31 = vpop.f32.mrb[106].mxu1 }
 0x598   : > { %8142 = vmatpush3.bf16.xpose.msk.msra.mxu1 %vm9111_vm1, %v8137_v43  ;;  %v3018_v36 = vpop.f32.mrb[107].mxu1 }
 0x599   : > { %8145 = vmatprep.subr.msk.bf16.mxu1 %vm9111_vm1, %v8143_v12  ;;  %v8155_v8 = vpack.c.bf16 %v7142_v31, %v3018_v36 }
 0x59b   : > { %v7145_v40 = vpop.f32.mrb[108].mxu1 }
 0x59c   : > { %v3028_v45 = vpop.f32.mrb[109].mxu1 }
 0x59d   : > { %v8161_v51 = vpack.c.bf16 %v7145_v40, %v3028_v45 }
 0x59f   : > { %v7148_v18 = vpop.f32.mrb[110].mxu1 }
 0x5a0   : > { %8148 = vmatpush3.bf16.xpose.msk.msra.mxu1 %vm9111_vm1, %v8143_v12  ;;  %v3038_v20 = vpop.f32.mrb[111].mxu1 }
 0x5a1   : > { %8151 = vmatprep.subr.msk.bf16.mxu1 %vm9111_vm1, %v8149_v37  ;;  %v8167_v24 = vpack.c.bf16 %v7148_v18, %v3038_v20 }
 0x5a8   : > { %8154 = vmatpush3.bf16.xpose.msk.msra.mxu1 %vm9111_vm1, %v8149_v37 }
 0x5a9   : > { %8157 = vmatprep.subr.msk.bf16.mxu1 %vm9111_vm1, %v8155_v8 }
 0x5b0   : > { %8160 = vmatpush3.bf16.xpose.msk.msra.mxu1 %vm9111_vm1, %v8155_v8 }
 0x5b1   : > { %8163 = vmatprep.subr.msk.bf16.mxu1 %vm9111_vm1, %v8161_v51 }
 0x5b8   : > { %8166 = vmatpush3.bf16.xpose.msk.msra.mxu1 %vm9111_vm1, %v8161_v51 }
 0x5b9   : > { %8169 = vmatprep.subr.msk.bf16.mxu1 %vm9111_vm1, %v8167_v24 }
 0x5c0   : > { %8172 = vmatpush3.bf16.xpose.msk.msra.mxu1 %vm9111_vm1, %v8167_v24 }
 0x5c7   : > { %7238 = vmatmul.mubr.msk.f32.vlgmr.msra.gmra.mrb[112].mxu1 %vm749_vm0, %v7071_v17 }
 0x5c8   : > { %7240 = vmatprep.mubr.msk.f32.mxu1 %vm749_vm0, %v2816_v22 }
 0x5cb   : > { %7241 = vmatmul.mubr.msk.f32.gmra.mrb[114].mxu1 %vm749_vm0, %v7074_v21 }
 0x5cc   : > { %7243 = vmatprep.mubr.msk.f32.mxu1 %vm749_vm0, %v2826_v47 }
 0x5cf   : > { %7244 = vmatmul.mubr.msk.f32.gmra.mrb[116].mxu1 %vm749_vm0, %v7077_v62 }
 0x5d0   : > { %7246 = vmatprep.mubr.msk.f32.mxu1 %vm749_vm0, %v2836_v48 }
 0x5d3   : > { %v2046_v43 = vpop.xlane.xlu1 %2045  ;;  %7247 = vmatmul.mubr.msk.f32.gmra.mrb[118].mxu1 %vm749_vm0, %v7080_v23  ;;  %v6839_v23 = vpop.f32.mrb[48].mxu0 }
 0x5d4   : > { %v2076_v39 = vsub.f32 %v9801_v32, %v2046_v43  ;;  %v2044_v12 = vpop.xlane.xlu0 %2043  ;;  %7249 = vmatprep.mubr.msk.f32.mxu1 %vm749_vm0, %v2846_v26  ;;  %v1707_v26 = vpop.f32.mrb[49].mxu0 }
 0x5d5   : > { %v2075_v17 = vsub.f32 %v9803_v30, %v2044_v12  ;;  %v6842_v31 = vpop.f32.mrb[50].mxu0 }
 0x5d6   : > { %v2093_v15 = vmul.f32 1.442695, %v2076_v39 }
 0x5d7   : > { %v2091_v22 = vmul.f32 1.442695, %v2075_v17  ;;  %v2050_v27 = vpop.xlane.xlu1 %2049  ;;  %7250 = vmatmul.mubr.msk.f32.gmra.mrb[120].mxu1 %vm749_vm0, %v9850_v25 }
 0x5d8   : > { %8550 = vpow2.f32 %v2093_v15  ;;  %v2078_v21 = vsub.f32 %v9807_v4, %v2050_v27  ;;  %v2048_v62 = vpop.xlane.xlu0 %2047  ;;  %7252 = vmatprep.mubr.msk.f32.mxu1 %vm749_vm0, %v9854_v60  ;;  %v7981_v4 = vpack.c.bf16 %v6839_v23, %v1707_v26 }
 0x5d9   : > { %8552 = vpow2.f32 %v2091_v22  ;;  %v2077_v32 = vsub.f32 %v9809_v53, %v2048_v62 }
 0x5da   : > { %v2097_v47 = vmul.f32 1.442695, %v2078_v21  ;;  %7982 = vmatprep.subr.bf16.mxu0 %v7981_v4 }
 0x5db   : > { %v2095_v48 = vmul.f32 1.442695, %v2077_v32  ;;  %v2054_v30 = vpop.xlane.xlu1 %2053  ;;  %7253 = vmatmul.mubr.msk.f32.gmra.mrb[122].mxu1 %vm749_vm0, %v9852_v55  ;;  %v1717_v55 = vpop.f32.mrb[51].mxu0  ;;  %7984 = vmatpush3.bf16.msra.mxu0 %v7981_v4 }
 0x5dc   : > { %8554 = vpow2.f32 %v2097_v47  ;;  %v2080_v25 = vsub.f32 %v9813_v54, %v2054_v30  ;;  %v2052_v37 = vpop.xlane.xlu0 %2051  ;;  %7255 = vmatprep.mubr.msk.f32.mxu1 %vm749_vm0, %v9858_v59  ;;  %v7985_v59 = vpack.c.bf16 %v6842_v31, %v1717_v55  ;;  %v6845_v18 = vpop.f32.mrb[52].mxu0 }
 0x5dd   : > { %8556 = vpow2.f32 %v2095_v48  ;;  %v2079_v60 = vsub.f32 %v9815_v41, %v2052_v37 }
 0x5de   : > { %v2101_v53 = vmul.f32 1.442695, %v2080_v25  ;;  %7986 = vmatprep.subr.bf16.mxu0 %v7985_v59 }
 0x5df   : > { %v2099_v36 = vmul.f32 1.442695, %v2079_v60  ;;  %v2058_v8 = vpop.xlane.xlu1 %2057  ;;  %7256 = vmatmul.mubr.msk.f32.gmra.mrb[124].mxu1 %vm749_vm0, %v9856_v14  ;;  %7988 = vmatpush3.bf16.msra.mxu0 %v7985_v59 }
 0x5e0   : > { %8558 = vpow2.f32 %v2101_v53  ;;  %v2082_v54 = vsub.f32 %v9819_v50, %v2058_v8  ;;  %v2056_v40 = vpop.xlane.xlu0 %2055  ;;  %7258 = vmatprep.mubr.msk.f32.mxu1 %vm749_vm0, %v9862_v0  ;;  %v1727_v50 = vpop.f32.mrb[53].mxu0 }
 0x5e1   : > { %8560 = vpow2.f32 %v2099_v36  ;;  %v2081_v41 = vsub.f32 %v9821_v11, %v2056_v40  ;;  %v7989_v11 = vpack.c.bf16 %v6845_v18, %v1727_v50  ;;  %v6848_v15 = vpop.f32.mrb[54].mxu0 }
 0x5e2   : > { %v9924_v45 = vpop.eup %8550  ;;  %v2105_v51 = vmul.f32 1.442695, %v2082_v54 }
 0x5e3   : > { %v9926_v20 = vpop.eup %8552  ;;  %v2103_v14 = vmul.f32 1.442695, %v2081_v41  ;;  %v2062_v24 = vpop.xlane.xlu1 %2061  ;;  %2125 = vadd.xlane.f32.xlu1 %v9924_v45  ;;  %7259 = vmatmul.mubr.msk.f32.gmra.mrb[126].mxu1 %vm749_vm0, %v9860_v52 }
 0x5e4   : > { %8562 = vpow2.f32 %v2105_v51  ;;  %v2084_v0 = vsub.f32 %v9825_v63, %v2062_v24  ;;  %v2060_v43 = vpop.xlane.xlu0 %2059  ;;  %2123 = vadd.xlane.f32.xlu0 %v9926_v20  ;;  %7381 = vmatprep.mubr.f32.mxu1 %v9486_v49  ;;  %v1737_v63 = vpop.f32.mrb[55].mxu0 }
 0x5e5   : > { %8564 = vpow2.f32 %v2103_v14  ;;  %v2083_v39 = vsub.f32 %v9827_v38, %v2060_v43  ;;  %7990 = vmatprep.subr.bf16.mxu0 %v7989_v11  ;;  %v7993_v38 = vpack.c.bf16 %v6848_v15, %v1737_v63  ;;  %v6851_v23 = vpop.f32.mrb[56].mxu0 }
 0x5e6   : > { %v9935_v12 = vpop.eup %8554  ;;  %v2109_v17 = vmul.f32 1.442695, %v2084_v0  ;;  %7992 = vmatpush3.bf16.msra.mxu0 %v7989_v11 }
 0x5e7   : > { %v9937_v52 = vpop.eup %8556  ;;  %v2107_v22 = vmul.f32 1.442695, %v2083_v39  ;;  %v2066_v27 = vpop.xlane.xlu1 %2065  ;;  %2129 = vadd.xlane.f32.xlu1 %v9935_v12  ;;  %7994 = vmatprep.subr.bf16.mxu0 %v7993_v38 }
 0x5e8   : > { %8566 = vpow2.f32 %v2109_v17  ;;  %v2086_v21 = vsub.f32 %v9831_v44, %v2066_v27  ;;  %v2064_v62 = vpop.xlane.xlu0 %2063  ;;  %2127 = vadd.xlane.f32.xlu0 %v9937_v52  ;;  %v1747_v44 = vpop.f32.mrb[57].mxu0 }
 0x5e9   : > { %8568 = vpow2.f32 %v2107_v22  ;;  %v2085_v49 = vsub.f32 %v9833_v56, %v2064_v62  ;;  %v7997_v4 = vpack.c.bf16 %v6851_v23, %v1747_v44  ;;  %v6854_v31 = vpop.f32.mrb[58].mxu0 }
 0x5ea   : > { %v9943_v32 = vpop.eup %8558  ;;  %v2113_v47 = vmul.f32 1.442695, %v2086_v21  ;;  %7996 = vmatpush3.bf16.msra.mxu0 %v7993_v38 }
 0x5eb   : > { %v9945_v48 = vpop.eup %8560  ;;  %v2111_v30 = vmul.f32 1.442695, %v2085_v49  ;;  %v2070_v26 = vpop.xlane.xlu1 %2069  ;;  %2133 = vadd.xlane.f32.xlu1 %v9943_v32  ;;  %7998 = vmatprep.subr.bf16.mxu0 %v7997_v4 }
 0x5ec   : > { %8570 = vpow2.f32 %v2113_v47  ;;  %v2088_v25 = vsub.f32 %v9837_v42, %v2070_v26  ;;  %v2068_v37 = vpop.xlane.xlu0 %2067  ;;  %2131 = vadd.xlane.f32.xlu0 %v9945_v48  ;;  %v1757_v42 = vpop.f32.mrb[59].mxu0 }
 0x5ed   : > { %8572 = vpow2.f32 %v2111_v30  ;;  %v2087_v56 = vsub.f32 %v9839_v13, %v2068_v37  ;;  %v8001_v59 = vpack.c.bf16 %v6854_v31, %v1757_v42  ;;  %v6857_v24 = vpop.f32.mrb[60].mxu0 }
 0x5ee   : > { %v9951_v60 = vpop.eup %8562  ;;  %v2117_v53 = vmul.f32 1.442695, %v2088_v25  ;;  %8000 = vmatpush3.bf16.msra.mxu0 %v7997_v4 }
 0x5ef   : > { %v9953_v36 = vpop.eup %8564  ;;  %v2115_v8 = vmul.f32 1.442695, %v2087_v56  ;;  %2137 = vadd.xlane.f32.xlu1 %v9951_v60  ;;  %v2074_v55 = vpop.xlane.xlu1 %2073  ;;  %8002 = vmatprep.subr.bf16.mxu0 %v8001_v59 }
 0x5f0   : > { %8574 = vpow2.f32 %v2117_v53  ;;  %v2090_v54 = vsub.f32 %v9843_v61, %v2074_v55  ;;  %2135 = vadd.xlane.f32.xlu0 %v9953_v36  ;;  %v2072_v40 = vpop.xlane.xlu0 %2071  ;;  %v1767_v61 = vpop.f32.mrb[61].mxu0 }
 0x5f1   : > { %8576 = vpow2.f32 %v2115_v8  ;;  %v2089_v13 = vsub.f32 %v9845_v16, %v2072_v40  ;;  %v8005_v50 = vpack.c.bf16 %v6857_v24, %v1767_v61  ;;  %v6860_v43 = vpop.f32.mrb[62].mxu0 }
 0x5f2   : > { %v9959_v41 = vpop.eup %8566  ;;  %v2121_v51 = vmul.f32 1.442695, %v2090_v54  ;;  %8004 = vmatpush3.bf16.msra.mxu0 %v8001_v59  ;;  %v1777_v11 = vpop.f32.mrb[63].mxu0 }
 0x5f3   : > { %v9961_v18 = vpop.eup %8568  ;;  %v2119_v14 = vmul.f32 1.442695, %v2089_v13  ;;  %2141 = vadd.xlane.f32.xlu1 %v9959_v41  ;;  %8006 = vmatprep.subr.bf16.mxu0 %v8005_v50  ;;  %v8009_v39 = vpack.c.bf16 %v6860_v43, %v1777_v11 }
 0x5f4   : > { %8578 = vpow2.f32 %v2121_v51  ;;  %2139 = vadd.xlane.f32.xlu0 %v9961_v18 }
 0x5f5   : > { %8580 = vpow2.f32 %v2119_v14 }
 0x5f6   : > { %v9965_v0 = vpop.eup %8570  ;;  %8008 = vmatpush3.bf16.msra.mxu0 %v8005_v50 }
 0x5f7   : > { %v9967_v16 = vpop.eup %8572  ;;  %2145 = vadd.xlane.f32.xlu1 %v9965_v0  ;;  %8010 = vmatprep.subr.bf16.mxu0 %v8009_v39 }
 0x5f8   : > { %2143 = vadd.xlane.f32.xlu0 %v9967_v16 }
 0x5fa   : > { %v9971_v17 = vpop.eup %8574  ;;  %8012 = vmatpush3.bf16.msra.mxu0 %v8009_v39 }
 0x5fb   : > { %v9973_v15 = vpop.eup %8576  ;;  %2149 = vadd.xlane.f32.xlu1 %v9971_v17 }
 0x5fc   : > { %2147 = vadd.xlane.f32.xlu0 %v9973_v15 }
 0x5fe   : > { %v9977_v22 = vpop.eup %8578 }
 0x5ff   : > { %v9979_v27 = vpop.eup %8580  ;;  %2153 = vadd.xlane.f32.xlu1 %v9977_v22 }
 0x600   : > { %2151 = vadd.xlane.f32.xlu0 %v9979_v27 }
 0x670   : > { %v2126_v63 = vpop.xlane.xlu1 %2125 }
 0x671   : > { %8582 = vrcp.f32 %v2126_v63  ;;  %v2124_v21 = vpop.xlane.xlu0 %2123 }
 0x672   : > { %8584 = vrcp.f32 %v2124_v21 }
 0x674   : > { %v2130_v62 = vpop.xlane.xlu1 %2129 }
 0x675   : > { %8586 = vrcp.f32 %v2130_v62  ;;  %v2128_v38 = vpop.xlane.xlu0 %2127 }
 0x676   : > { %8588 = vrcp.f32 %v2128_v38 }
 0x678   : > { %v2134_v49 = vpop.xlane.xlu1 %2133 }
 0x679   : > { %8590 = vrcp.f32 %v2134_v49  ;;  %v2132_v47 = vpop.xlane.xlu0 %2131 }
 0x67a   : > { %8592 = vrcp.f32 %v2132_v47 }
 0x67b   : > { %v8583_v23 = vpop.eup %8582 }
 0x67c   : > { %v8585_v30 = vpop.eup %8584  ;;  %v2138_v26 = vpop.xlane.xlu1 %2137  ;;  %v2172_v37 = vmul.f32 %v8583_v23, %v9924_v45 }
 0x67d   : > { %8594 = vrcp.f32 %v2138_v26  ;;  %v2136_v44 = vpop.xlane.xlu0 %2135  ;;  %v2171_v25 = vmul.f32 %v8585_v30, %v9926_v20 }
 0x67e   : > { %8596 = vrcp.f32 %v2136_v44 }
 0x67f   : > { %v8587_v4 = vpop.eup %8586  ;;  %6949 = vmatprep.mubr.f32.mxu0 %v2171_v25 }
 0x680   : > { %v8589_v56 = vpop.eup %8588  ;;  %v2142_v53 = vpop.xlane.xlu1 %2141  ;;  %6950 = vmatmul.mubr.f32.vlgmr.msra.gmra.mrb[64].mxu0 %v2172_v37  ;;  %v2174_v55 = vmul.f32 %v8587_v4, %v9935_v12 }
 0x681   : > { %8598 = vrcp.f32 %v2142_v53  ;;  %v2140_v31 = vpop.xlane.xlu0 %2139  ;;  %v2173_v8 = vmul.f32 %v8589_v56, %v9937_v52 }
 0x682   : > { %8600 = vrcp.f32 %v2140_v31 }
 0x683   : > { %v8591_v42 = vpop.eup %8590  ;;  %6952 = vmatprep.mubr.f32.mxu0 %v2173_v8 }
 0x684   : > { %v8593_v54 = vpop.eup %8592  ;;  %v2146_v40 = vpop.xlane.xlu1 %2145  ;;  %6953 = vmatmul.mubr.f32.gmra.mrb[66].mxu0 %v2174_v55  ;;  %v2176_v59 = vmul.f32 %v8591_v42, %v9943_v32 }
 0x685   : > { %8602 = vrcp.f32 %v2146_v40  ;;  %v2144_v45 = vpop.xlane.xlu0 %2143  ;;  %v2175_v20 = vmul.f32 %v8593_v54, %v9945_v48 }
 0x686   : > { %8604 = vrcp.f32 %v2144_v45 }
 0x687   : > { %v8595_v13 = vpop.eup %8594  ;;  %6955 = vmatprep.mubr.f32.mxu0 %v2175_v20 }
 0x688   : > { %v8597_v51 = vpop.eup %8596  ;;  %v2150_v14 = vpop.xlane.xlu1 %2149  ;;  %6956 = vmatmul.mubr.f32.gmra.mrb[68].mxu0 %v2176_v59  ;;  %v2178_v24 = vmul.f32 %v8595_v13, %v9951_v60 }
 0x689   : > { %8606 = vrcp.f32 %v2150_v14  ;;  %v2148_v52 = vpop.xlane.xlu0 %2147  ;;  %v2177_v12 = vmul.f32 %v8597_v51, %v9953_v36 }
 0x68a   : > { %8608 = vrcp.f32 %v2148_v52 }
 0x68b   : > { %v8599_v61 = vpop.eup %8598  ;;  %6958 = vmatprep.mubr.f32.mxu0 %v2177_v12 }
 0x68c   : > { %v8601_v50 = vpop.eup %8600  ;;  %v2154_v43 = vpop.xlane.xlu1 %2153  ;;  %6959 = vmatmul.mubr.f32.gmra.mrb[70].mxu0 %v2178_v24  ;;  %v2180_v11 = vmul.f32 %v8599_v61, %v9959_v41 }
 0x68d   : > { %8610 = vrcp.f32 %v2154_v43  ;;  %v2152_v48 = vpop.xlane.xlu0 %2151  ;;  %v2179_v32 = vmul.f32 %v8601_v50, %v9961_v18 }
 0x68e   : > { %8612 = vrcp.f32 %v2152_v48  ;;  %v5449_v48 = vld [vmem:[%s10798_s4 + $0x20] sm:$0xff] }
 0x68f   : > { %v8603_v39 = vpop.eup %8602  ;;  %6961 = vmatprep.mubr.f32.mxu0 %v2179_v32  ;;  %v5450_v32 = vld [vmem:[%s10798_s4 + $0x28] sm:$0xff] }
 0x690   : > { %v8605_v63 = vpop.eup %8604  ;;  %6962 = vmatmul.mubr.f32.gmra.mrb[72].mxu0 %v2180_v11  ;;  %v2182_v60 = vmul.f32 %v8603_v39, %v9965_v0  ;;  %v8013_v11 = vpack.c.bf16 %v5450_v32, %v5449_v48  ;;  %v5451_v39 = vld [vmem:[%s10798_s4 + $0x30] sm:$0xff] }
 0x691   : > { %v2181_v36 = vmul.f32 %v8605_v63, %v9967_v16  ;;  %v5452_v63 = vld [vmem:[%s10798_s4 + $0x38] sm:$0xff] }
 0x692   : > { %8014 = vmatprep.subr.bf16.mxu0 %v8013_v11 }
 0x693   : > { %v8607_v21 = vpop.eup %8606  ;;  %6964 = vmatprep.mubr.f32.mxu0 %v2181_v36  ;;  %8016 = vmatpush3.bf16.msra.mxu0 %v8013_v11  ;;  %v8017_v36 = vpack.c.bf16 %v5452_v63, %v5451_v39 }
 0x694   : > { %v8609_v62 = vpop.eup %8608  ;;  %6965 = vmatmul.mubr.f32.gmra.mrb[74].mxu0 %v2182_v60  ;;  %v2184_v49 = vmul.f32 %v8607_v21, %v9971_v17  ;;  %v1296_v60 = vld [vmem:[%s10798_s4] sm:$0xff]  ;;  %v1297_v21 = vld [vmem:[%s10798_s4 + $0x8] sm:$0xff] }
 0x695   : > { %v2183_v38 = vmul.f32 %v8609_v62, %v9973_v15  ;;  %8018 = vmatprep.subr.bf16.mxu0 %v8017_v36  ;;  %v10065_v62 = vpack.c.bf16 %v1297_v21, %v1296_v60 }
 0x697   : > { %v8611_v18 = vpop.eup %8610  ;;  %6967 = vmatprep.mubr.f32.mxu0 %v2183_v38  ;;  %8020 = vmatpush3.bf16.msra.mxu0 %v8017_v36 }
 0x698   : > { %v8613_v47 = vpop.eup %8612  ;;  %6968 = vmatmul.mubr.f32.gmra.mrb[76].mxu0 %v2184_v49  ;;  %v2186_v30 = vmul.f32 %v8611_v18, %v9977_v22  ;;  %8022 = vmatprep.subr.bf16.mxu0 %v10065_v62 }
 0x699   : > { %v2185_v41 = vmul.f32 %v8613_v47, %v9979_v27 }
 0x69a   : > { %v7239_v23 = vpop.f32.mrb[112].mxu1 }
 0x69b   : > { %v9999_v16 = vmul.f32 0.17677669, %v7239_v23  ;;  %6970 = vmatprep.mubr.f32.mxu0 %v2185_v41  ;;  %v3371_v0 = vpop.f32.mrb[113].mxu1 }
 0x69c   : > { %v10001_v26 = vmul.f32 0.17677669, %v3371_v0  ;;  %6971 = vmatmul.mubr.f32.gmra.mrb[78].mxu0 %v2186_v30 }
 0x69d   : > { %3468 = vmax.xlane.f32.xlu1 %v9999_v16 }
 0x69e   : > { %v7242_v15 = vpop.f32.mrb[114].mxu1  ;;  %3466 = vmax.xlane.f32.xlu0 %v10001_v26 }
 0x69f   : > { %v10005_v17 = vmul.f32 0.17677669, %v7242_v15  ;;  %v3381_v44 = vpop.f32.mrb[115].mxu1 }
 0x6a0   : > { %v10007_v25 = vmul.f32 0.17677669, %v3381_v44 }
 0x6a1   : > { %3472 = vmax.xlane.f32.xlu1 %v10005_v17 }
 0x6a2   : > { %v7245_v22 = vpop.f32.mrb[116].mxu1  ;;  %3470 = vmax.xlane.f32.xlu0 %v10007_v25 }
 0x6a3   : > { %v10011_v27 = vmul.f32 0.17677669, %v7245_v22  ;;  %v3391_v37 = vpop.f32.mrb[117].mxu1 }
 0x6a4   : > { %v10013_v4 = vmul.f32 0.17677669, %v3391_v37 }
 0x6a5   : > { %3476 = vmax.xlane.f32.xlu1 %v10011_v27 }
 0x6a6   : > { %v7248_v56 = vpop.f32.mrb[118].mxu1  ;;  %3474 = vmax.xlane.f32.xlu0 %v10013_v4 }
 0x6a7   : > { %v10017_v53 = vmul.f32 0.17677669, %v7248_v56  ;;  %v3401_v31 = vpop.f32.mrb[119].mxu1 }
 0x6a8   : > { %v10019_v8 = vmul.f32 0.17677669, %v3401_v31 }
 0x6a9   : > { %3480 = vmax.xlane.f32.xlu1 %v10017_v53 }
 0x6aa   : > { %v7251_v55 = vpop.f32.mrb[120].mxu1  ;;  %3478 = vmax.xlane.f32.xlu0 %v10019_v8 }
 0x6ab   : > { %v10023_v42 = vmul.f32 0.17677669, %v7251_v55  ;;  %v3411_v54 = vpop.f32.mrb[121].mxu1 }
 0x6ac   : > { %v10025_v40 = vmul.f32 0.17677669, %v3411_v54 }
 0x6ad   : > { %3484 = vmax.xlane.f32.xlu1 %v10023_v42 }
 0x6ae   : > { %v7254_v45 = vpop.f32.mrb[122].mxu1  ;;  %3482 = vmax.xlane.f32.xlu0 %v10025_v40 }
 0x6af   : > { %v10029_v20 = vmul.f32 0.17677669, %v7254_v45  ;;  %v3421_v59 = vpop.f32.mrb[123].mxu1 }
 0x6b0   : > { %v10031_v13 = vmul.f32 0.17677669, %v3421_v59 }
 0x6b1   : > { %3488 = vmax.xlane.f32.xlu1 %v10029_v20 }
 0x6b2   : > { %v7257_v51 = vpop.f32.mrb[124].mxu1  ;;  %3486 = vmax.xlane.f32.xlu0 %v10031_v13 }
 0x6b3   : > { %v10035_v14 = vmul.f32 0.17677669, %v7257_v51  ;;  %v3431_v52 = vpop.f32.mrb[125].mxu1 }
 0x6b4   : > { %v10037_v12 = vmul.f32 0.17677669, %v3431_v52 }
 0x6b5   : > { %3492 = vmax.xlane.f32.xlu1 %v10035_v14 }
 0x6b6   : > { %v7260_v24 = vpop.f32.mrb[126].mxu1  ;;  %3490 = vmax.xlane.f32.xlu0 %v10037_v12 }
 0x6b7   : > { %v10041_v61 = vmul.f32 0.17677669, %v7260_v24  ;;  %v3441_v50 = vpop.f32.mrb[127].mxu1 }
 0x6b8   : > { %v10043_v43 = vmul.f32 0.17677669, %v3441_v50 }
 0x6b9   : > { %3496 = vmax.xlane.f32.xlu1 %v10041_v61 }
 0x6ba   : > { %3494 = vmax.xlane.f32.xlu0 %v10043_v43 }
 0x72a   : > { %v3469_v38 = vpop.xlane.xlu1 %3468 }
 0x72b   : > { %v3499_v49 = vsub.f32 %v9999_v16, %v3469_v38  ;;  %v3467_v18 = vpop.xlane.xlu0 %3466 }
 0x72c   : > { %v3498_v47 = vsub.f32 %v10001_v26, %v3467_v18 }
 0x72d   : > { %v3516_v41 = vmul.f32 1.442695, %v3499_v49 }
 0x72e   : > { %v3514_v23 = vmul.f32 1.442695, %v3498_v47  ;;  %v3473_v30 = vpop.xlane.xlu1 %3472 }
 0x72f   : > { %8614 = vpow2.f32 %v3516_v41  ;;  %v3501_v0 = vsub.f32 %v10005_v17, %v3473_v30  ;;  %v3471_v15 = vpop.xlane.xlu0 %3470 }
 0x730   : > { %8616 = vpow2.f32 %v3514_v23  ;;  %v3500_v44 = vsub.f32 %v10007_v25, %v3471_v15 }
 0x731   : > { %v3520_v22 = vmul.f32 1.442695, %v3501_v0 }
 0x732   : > { %v3518_v37 = vmul.f32 1.442695, %v3500_v44  ;;  %v3477_v56 = vpop.xlane.xlu1 %3476 }
 0x733   : > { %8618 = vpow2.f32 %v3520_v22  ;;  %v3503_v31 = vsub.f32 %v10011_v27, %v3477_v56  ;;  %v3475_v16 = vpop.xlane.xlu0 %3474 }
 0x734   : > { %8620 = vpow2.f32 %v3518_v37  ;;  %v3502_v26 = vsub.f32 %v10013_v4, %v3475_v16 }
 0x735   : > { %v3524_v55 = vmul.f32 1.442695, %v3503_v31 }
 0x736   : > { %v3522_v54 = vmul.f32 1.442695, %v3502_v26  ;;  %v3481_v45 = vpop.xlane.xlu1 %3480  ;;  %v1298_v26 = vld [vmem:[%s10798_s4 + $0x10] sm:$0xff] }
 0x737   : > { %8622 = vpow2.f32 %v3524_v55  ;;  %v3505_v17 = vsub.f32 %v10017_v53, %v3481_v45  ;;  %v3479_v59 = vpop.xlane.xlu0 %3478  ;;  %v1299_v55 = vld [vmem:[%s10798_s4 + $0x18] sm:$0xff] }
 0x738   : > { %8624 = vpow2.f32 %v3522_v54  ;;  %v3504_v25 = vsub.f32 %v10019_v8, %v3479_v59  ;;  %v8025_v59 = vpack.c.bf16 %v1299_v55, %v1298_v26  ;;  %v5530_v26 = vld [vmem:[%s10797_s3 + $0x168] sm:$0xff]  ;;  %v5532_v55 = vld [vmem:[%s10797_s3 + $0x178] sm:$0xff] }
 0x739   : > { %v10076_v51 = vpop.eup %8614  ;;  %v3528_v52 = vmul.f32 1.442695, %v3505_v17 }
 0x73a   : > { %v10078_v24 = vpop.eup %8616  ;;  %v3526_v27 = vmul.f32 1.442695, %v3504_v25  ;;  %v3485_v50 = vpop.xlane.xlu1 %3484  ;;  %3548 = vadd.xlane.f32.xlu1 %v10076_v51 }
 0x73b   : > { %8626 = vpow2.f32 %v3528_v52  ;;  %v3507_v4 = vsub.f32 %v10023_v42, %v3485_v50  ;;  %3546 = vadd.xlane.f32.xlu0 %v10078_v24  ;;  %v3483_v48 = vpop.xlane.xlu0 %3482  ;;  %v5517_v52 = vld [vmem:[%s10797_s3 + $0x100] sm:$0xff] }
 0x73c   : > { %8628 = vpow2.f32 %v3526_v27  ;;  %v3506_v53 = vsub.f32 %v10025_v40, %v3483_v48  ;;  %v5518_v27 = vld [vmem:[%s10797_s3 + $0x108] sm:$0xff] }
 0x73d   : > { %v10084_v32 = vpop.eup %8618  ;;  %v3532_v8 = vmul.f32 1.442695, %v3507_v4 }
 0x73e   : > { %v10086_v11 = vpop.eup %8620  ;;  %v3530_v39 = vmul.f32 1.442695, %v3506_v53  ;;  %v3489_v63 = vpop.xlane.xlu1 %3488  ;;  %3552 = vadd.xlane.f32.xlu1 %v10084_v32  ;;  %v8093_v53 = vpack.c.bf16 %v5518_v27, %v5517_v52  ;;  %v10272_v52 = vld [vmem:[%s8947_s10 + $0x48] sm:$0xff]  ;;  %v10276_v27 = vld [vmem:[%s8947_s10 + $0x50] sm:$0xff] }
 0x73f   : > { %8630 = vpow2.f32 %v3532_v8  ;;  %v3509_v36 = vsub.f32 %v10029_v20, %v3489_v63  ;;  %3550 = vadd.xlane.f32.xlu0 %v10086_v11  ;;  %v3487_v42 = vpop.xlane.xlu0 %3486 }
 0x740   : > { %8632 = vpow2.f32 %v3530_v39  ;;  %v3508_v60 = vsub.f32 %v10031_v13, %v3487_v42 }
 0x741   : > { %v10092_v21 = vpop.eup %8622  ;;  %v3536_v40 = vmul.f32 1.442695, %v3509_v36 }
 0x742   : > { %v10094_v38 = vpop.eup %8624  ;;  %v3534_v49 = vmul.f32 1.442695, %v3508_v60  ;;  %v3493_v18 = vpop.xlane.xlu1 %3492  ;;  %3556 = vadd.xlane.f32.xlu1 %v10092_v21 }
 0x743   : > { %8634 = vpow2.f32 %v3536_v40  ;;  %v3511_v47 = vsub.f32 %v10035_v14, %v3493_v18  ;;  %3554 = vadd.xlane.f32.xlu0 %v10094_v38  ;;  %v3491_v20 = vpop.xlane.xlu0 %3490 }
 0x744   : > { %8636 = vpow2.f32 %v3534_v49  ;;  %v3510_v41 = vsub.f32 %v10037_v12, %v3491_v20 }
 0x745   : > { %v10100_v23 = vpop.eup %8626  ;;  %v3540_v13 = vmul.f32 1.442695, %v3511_v47 }
 0x746   : > { %v10102_v30 = vpop.eup %8628  ;;  %v3538_v0 = vmul.f32 1.442695, %v3510_v41  ;;  %3560 = vadd.xlane.f32.xlu1 %v10100_v23  ;;  %v3497_v15 = vpop.xlane.xlu1 %3496  ;;  %v5519_v41 = vld [vmem:[%s10797_s3 + $0x110] sm:$0xff] }
 0x747   : > { %8638 = vpow2.f32 %v3540_v13  ;;  %v3513_v44 = vsub.f32 %v10041_v61, %v3497_v15  ;;  %3558 = vadd.xlane.f32.xlu0 %v10102_v30  ;;  %v3495_v14 = vpop.xlane.xlu0 %3494  ;;  %v5520_v13 = vld [vmem:[%s10797_s3 + $0x118] sm:$0xff]  ;;  %v5521_v15 = vld [vmem:[%s10797_s3 + $0x120] sm:$0xff] }
 0x748   : > { %8640 = vpow2.f32 %v3538_v0  ;;  %v3512_v22 = vsub.f32 %v10043_v43, %v3495_v14  ;;  %v8097_v0 = vpack.c.bf16 %v5520_v13, %v5519_v41 }
 0x749   : > { %v10108_v37 = vpop.eup %8630  ;;  %v3544_v12 = vmul.f32 1.442695, %v3513_v44  ;;  %v5522_v44 = vld [vmem:[%s10797_s3 + $0x128] sm:$0xff] }
 0x74a   : > { %v10110_v56 = vpop.eup %8632  ;;  %v3542_v31 = vmul.f32 1.442695, %v3512_v22  ;;  %3564 = vadd.xlane.f32.xlu1 %v10108_v37  ;;  %v8101_v14 = vpack.c.bf16 %v5522_v44, %v5521_v15  ;;  %v5524_v22 = vld [vmem:[%s10797_s3 + $0x138] sm:$0xff] }
 0x74b   : > { %8642 = vpow2.f32 %v3544_v12  ;;  %3562 = vadd.xlane.f32.xlu0 %v10110_v56  ;;  %v5526_v12 = vld [vmem:[%s10797_s3 + $0x148] sm:$0xff] }
 0x74c   : > { %8644 = vpow2.f32 %v3542_v31  ;;  %v5528_v31 = vld [vmem:[%s10797_s3 + $0x158] sm:$0xff] }
 0x74d   : > { %v10114_v16 = vpop.eup %8634 }
 0x74e   : > { %v10116_v61 = vpop.eup %8636  ;;  %3568 = vadd.xlane.f32.xlu1 %v10114_v16 }
 0x74f   : > { %3566 = vadd.xlane.f32.xlu0 %v10116_v61 }
 0x751   : > { %v10120_v43 = vpop.eup %8638 }
 0x752   : > { %v10128_v54 = vpop.eup %8640  ;;  %3572 = vadd.xlane.f32.xlu1 %v10120_v43 }
 0x753   : > { %3570 = vadd.xlane.f32.xlu0 %v10128_v54  ;;  %v6951_v45 = vpop.f32.mrb[64].mxu0 }
 0x754   : > { %v2253_v17 = vpop.f32.mrb[65].mxu0 }
 0x755   : > { %v10132_v25 = vpop.eup %8642  ;;  %6981 = vmatprep.mubr.msk.f32.mxu0 %vm749_vm0, %v2253_v17  ;;  %v10264_v17 = vld [vmem:[%s8947_s10 + $0x38] sm:$0xff] }
 0x756   : > { %v10141_v50 = vpop.eup %8644  ;;  %3576 = vadd.xlane.f32.xlu1 %v10132_v25  ;;  %6982 = vmatmul.mubr.msk.f32.vlgmr.msra.gmra.mrb[80].mxu0 %vm749_vm0, %v6951_v45  ;;  %v10260_v45 = vld [vmem:[%s8947_s10 + $0x30] sm:$0xff] }
 0x757   : > { %3574 = vadd.xlane.f32.xlu0 %v10141_v50  ;;  %v6954_v4 = vpop.f32.mrb[66].mxu0  ;;  %8024 = vmatpush3.bf16.msra.mxu0 %v10065_v62 }
 0x758   : > { %v2263_v48 = vpop.f32.mrb[67].mxu0  ;;  %8026 = vmatprep.subr.bf16.mxu0 %v8025_v59 }
 0x759   : > { %6984 = vmatprep.mubr.msk.f32.mxu0 %vm749_vm0, %v2263_v48  ;;  %v10284_v48 = vld [vmem:[%s8947_s10 + $0x60] sm:$0xff] }
 0x75a   : > { %6985 = vmatmul.mubr.msk.f32.gmra.mrb[82].mxu0 %vm749_vm0, %v6954_v4  ;;  %v10280_v4 = vld [vmem:[%s8947_s10 + $0x58] sm:$0xff] }
 0x75b   : > { %v6957_v8 = vpop.f32.mrb[68].mxu0  ;;  %8028 = vmatpush3.bf16.msra.mxu0 %v8025_v59  ;;  %v10268_v59 = vld [vmem:[%s8947_s10 + $0x40] sm:$0xff] }
 0x75c   : > { %v2273_v39 = vpop.f32.mrb[69].mxu0  ;;  %8094 = vmatprep.subr.bf16.mxu0 %v8093_v53 }
 0x75d   : > { %6987 = vmatprep.mubr.msk.f32.mxu0 %vm749_vm0, %v2273_v39  ;;  %v10296_v39 = vld [vmem:[%s8947_s10 + $0x78] sm:$0xff] }
 0x75e   : > { %6988 = vmatmul.mubr.msk.f32.gmra.mrb[84].mxu0 %vm749_vm0, %v6957_v8  ;;  %v10292_v8 = vld [vmem:[%s8947_s10 + $0x70] sm:$0xff] }
 0x75f   : > { %v6960_v63 = vpop.f32.mrb[70].mxu0 }
 0x760   : > { %v2283_v36 = vpop.f32.mrb[71].mxu0 }
 0x761   : > { %6990 = vmatprep.mubr.msk.f32.mxu0 %vm749_vm0, %v2283_v36 }
 0x762   : > { %6991 = vmatmul.mubr.msk.f32.gmra.mrb[86].mxu0 %vm749_vm0, %v6960_v63 }
 0x763   : > { %v6963_v62 = vpop.f32.mrb[72].mxu0 }
 0x764   : > { %v2293_v42 = vpop.f32.mrb[73].mxu0 }
 0x765   : > { %6993 = vmatprep.mubr.msk.f32.mxu0 %vm749_vm0, %v2293_v42 }
 0x766   : > { %6994 = vmatmul.mubr.msk.f32.gmra.mrb[88].mxu0 %vm749_vm0, %v6963_v62 }
 0x767   : > { %v6966_v60 = vpop.f32.mrb[74].mxu0 }
 0x768   : > { %v2303_v40 = vpop.f32.mrb[75].mxu0 }
 0x769   : > { %6996 = vmatprep.mubr.msk.f32.mxu0 %vm749_vm0, %v2303_v40 }
 0x76a   : > { %6997 = vmatmul.mubr.msk.f32.gmra.mrb[90].mxu0 %vm749_vm0, %v6966_v60 }
 0x76b   : > { %v6969_v49 = vpop.f32.mrb[76].mxu0 }
 0x76c   : > { %v2313_v18 = vpop.f32.mrb[77].mxu0 }
 0x76d   : > { %6999 = vmatprep.mubr.msk.f32.mxu0 %vm749_vm0, %v2313_v18 }
 0x76e   : > { %7000 = vmatmul.mubr.msk.f32.gmra.mrb[92].mxu0 %vm749_vm0, %v6969_v49 }
 0x76f   : > { %v6972_v47 = vpop.f32.mrb[78].mxu0 }
 0x770   : > { %v2323_v20 = vpop.f32.mrb[79].mxu0 }
 0x771   : > { %7002 = vmatprep.mubr.msk.f32.mxu0 %vm749_vm0, %v2323_v20 }
 0x772   : > { %7003 = vmatmul.mubr.msk.f32.gmra.mrb[94].mxu0 %vm749_vm0, %v6972_v47 }
 0x773   : > { %7013 = vmatprep.mubr.msk.f32.mxu0 %vm749_vm0, %v9570_v57  ;;  %v5523_v57 = vld [vmem:[%s10797_s3 + $0x130] sm:$0xff] }
 0x776   : > { %7014 = vmatmul.mubr.msk.f32.vlgmr.msra.gmra.mrb[80].mxu0 %vm749_vm0, %v9568_v28  ;;  %v8105_v28 = vpack.c.bf16 %v5524_v22, %v5523_v57 }
 0x777   : > { %7016 = vmatprep.mubr.msk.f32.mxu0 %vm749_vm0, %v9574_v58  ;;  %8096 = vmatpush3.bf16.msra.mxu0 %v8093_v53  ;;  %v5525_v58 = vld [vmem:[%s10797_s3 + $0x140] sm:$0xff]  ;;  %v10288_v53 = vld [vmem:[%s8947_s10 + $0x68] sm:$0xff] }
 0x778   : > { %8098 = vmatprep.subr.bf16.mxu0 %v8097_v0 }
 0x77a   : > { %7017 = vmatmul.mubr.msk.f32.gmra.mrb[82].mxu0 %vm749_vm0, %v9572_v29  ;;  %v8109_v29 = vpack.c.bf16 %v5526_v12, %v5525_v58 }
 0x77b   : > { %7019 = vmatprep.mubr.msk.f32.mxu0 %vm749_vm0, %v9578_v2  ;;  %8100 = vmatpush3.bf16.msra.mxu0 %v8097_v0  ;;  %v5527_v2 = vld [vmem:[%s10797_s3 + $0x150] sm:$0xff] }
 0x77c   : > { %8102 = vmatprep.subr.bf16.mxu0 %v8101_v14 }
 0x77e   : > { %7020 = vmatmul.mubr.msk.f32.gmra.mrb[84].mxu0 %vm749_vm0, %v9576_v1  ;;  %v8113_v1 = vpack.c.bf16 %v5528_v31, %v5527_v2 }
 0x77f   : > { %7022 = vmatprep.mubr.msk.f32.mxu0 %vm749_vm0, %v9582_v35  ;;  %8104 = vmatpush3.bf16.msra.mxu0 %v8101_v14  ;;  %v5529_v35 = vld [vmem:[%s10797_s3 + $0x160] sm:$0xff] }
 0x780   : > { %8106 = vmatprep.subr.bf16.mxu0 %v8105_v28 }
 0x782   : > { %7023 = vmatmul.mubr.msk.f32.gmra.mrb[86].mxu0 %vm749_vm0, %v9580_v33  ;;  %v8117_v33 = vpack.c.bf16 %v5530_v26, %v5529_v35 }
 0x783   : > { %7025 = vmatprep.mubr.msk.f32.mxu0 %vm749_vm0, %v9586_v3  ;;  %8108 = vmatpush3.bf16.msra.mxu0 %v8105_v28  ;;  %v5531_v3 = vld [vmem:[%s10797_s3 + $0x170] sm:$0xff] }
 0x784   : > { %8110 = vmatprep.subr.bf16.mxu0 %v8109_v29 }
 0x786   : > { %7026 = vmatmul.mubr.msk.f32.gmra.mrb[88].mxu0 %vm749_vm0, %v9584_v34  ;;  %v8121_v34 = vpack.c.bf16 %v5532_v55, %v5531_v3 }
 0x787   : > { %7028 = vmatprep.mubr.msk.f32.mxu0 %vm749_vm0, %v9590_v6  ;;  %8112 = vmatpush3.bf16.msra.mxu0 %v8109_v29  ;;  %v10240_v6 = vld [vmem:[%s8947_s10 + $0x8] sm:$0xff] }
 0x788   : > { %8114 = vmatprep.subr.bf16.mxu0 %v8113_v1 }
 0x78a   : > { %7029 = vmatmul.mubr.msk.f32.gmra.mrb[90].mxu0 %vm749_vm0, %v9588_v5  ;;  %v10236_v5 = vld [vmem:[%s8947_s10] sm:$0xff] }
 0x78b   : > { %7031 = vmatprep.mubr.msk.f32.mxu0 %vm749_vm0, %v9594_v46  ;;  %8116 = vmatpush3.bf16.msra.mxu0 %v8113_v1  ;;  %v10248_v46 = vld [vmem:[%s8947_s10 + $0x18] sm:$0xff] }
 0x78c   : > { %8118 = vmatprep.subr.bf16.mxu0 %v8117_v33 }
 0x78e   : > { %7032 = vmatmul.mubr.msk.f32.gmra.mrb[92].mxu0 %vm749_vm0, %v9592_v7  ;;  %v10244_v7 = vld [vmem:[%s8947_s10 + $0x10] sm:$0xff] }
 0x78f   : > { %7034 = vmatprep.mubr.msk.f32.mxu0 %vm749_vm0, %v9598_v10  ;;  %8120 = vmatpush3.bf16.msra.mxu0 %v8117_v33  ;;  %v10256_v10 = vld [vmem:[%s8947_s10 + $0x28] sm:$0xff] }
 0x790   : > { %8122 = vmatprep.subr.bf16.mxu0 %v8121_v34 }
 0x792   : > { %7035 = vmatmul.mubr.msk.f32.gmra.mrb[94].mxu0 %vm749_vm0, %v9596_v9  ;;  %v10252_v9 = vld [vmem:[%s8947_s10 + $0x20] sm:$0xff] }
 0x793   : > { %8124 = vmatpush3.bf16.msra.mxu0 %v8121_v34  ;;  %7181 = vmatprep.mubr.f32.mxu0 %v10236_v5 }
 0x796   : > { %7182 = vmatmul.mubr.f32.vlgmr.msra.gmra.mrb[96].mxu0 %v10240_v6 }
 0x797   : > { %7184 = vmatprep.mubr.f32.mxu0 %v10244_v7 }
 0x79a   : > { %7185 = vmatmul.mubr.f32.gmra.mrb[98].mxu0 %v10248_v46 }
 0x79b   : > { %7187 = vmatprep.mubr.f32.mxu0 %v10252_v9 }
 0x79e   : > { %7188 = vmatmul.mubr.f32.gmra.mrb[100].mxu0 %v10256_v10 }
 0x79f   : > { %7190 = vmatprep.mubr.f32.mxu0 %v10260_v45 }
 0x7a2   : > { %7191 = vmatmul.mubr.f32.gmra.mrb[102].mxu0 %v10264_v17 }
 0x7a3   : > { %7193 = vmatprep.mubr.f32.mxu0 %v10268_v59 }
 0x7a6   : > { %7194 = vmatmul.mubr.f32.gmra.mrb[104].mxu0 %v10272_v52 }
 0x7a7   : > { %7196 = vmatprep.mubr.f32.mxu0 %v10276_v27 }
 0x7aa   : > { %7197 = vmatmul.mubr.f32.gmra.mrb[106].mxu0 %v10280_v4 }
 0x7ab   : > { %7199 = vmatprep.mubr.f32.mxu0 %v10284_v48 }
 0x7ae   : > { %7200 = vmatmul.mubr.f32.gmra.mrb[108].mxu0 %v10288_v53 }
 0x7af   : > { %7202 = vmatprep.mubr.f32.mxu0 %v10292_v8 }
 0x7b2   : > { %7203 = vmatmul.mubr.f32.gmra.mrb[110].mxu0 %v10296_v39 }
 0x7c7   : > { %v3549_v49 = vpop.xlane.xlu1 %3548 }
 0x7c8   : > { %v3547_v63 = vpop.xlane.xlu0 %3546 }
 0x7c9   : > { %8646 = vrcp.f32 %v3547_v63  ;;  %v5565_v63 = vld [vmem:[%s10798_s4 + $0x40] sm:$0xff] }
 0x7ca   : > { %8648 = vrcp.f32 %v3549_v49 }
 0x7cb   : > { %v3553_v15 = vpop.xlane.xlu1 %3552 }
 0x7cc   : > { %v3551_v41 = vpop.xlane.xlu0 %3550 }
 0x7cd   : > { %8650 = vrcp.f32 %v3551_v41  ;;  %v5568_v41 = vld [vmem:[%s10798_s4 + $0x58] sm:$0xff] }
 0x7ce   : > { %8652 = vrcp.f32 %v3553_v15 }
 0x7cf   : > { %v3557_v28 = vpop.xlane.xlu1 %3556 }
 0x7d3   : > { %v8647_v36 = vpop.eup %8646  ;;  %v3561_v35 = vpop.xlane.xlu1 %3560 }
 0x7d4   : > { %v3594_v62 = vmul.f32 %v8647_v36, %v10078_v24  ;;  %v3555_v24 = vpop.xlane.xlu0 %3554  ;;  %v5566_v36 = vld [vmem:[%s10798_s4 + $0x48] sm:$0xff] }
 0x7d5   : > { %8654 = vrcp.f32 %v3555_v24  ;;  %v8205_v49 = vpack.c.bf16 %v5566_v36, %v5565_v63 }
 0x7d6   : > { %7293 = vmatprep.mubr.f32.mxu0 %v3594_v62  ;;  %8656 = vrcp.f32 %v3557_v28 }
 0x7d7   : > { %v3565_v62 = vpop.xlane.xlu1 %3564 }
 0x7d8   : > { %v3559_v2 = vpop.xlane.xlu0 %3558 }
 0x7d9   : > { %8658 = vrcp.f32 %v3559_v2 }
 0x7da   : > { %8660 = vrcp.f32 %v3561_v35 }
 0x7db   : > { %v3569_v15 = vpop.xlane.xlu1 %3568 }
 0x7dc   : > { %v3563_v3 = vpop.xlane.xlu0 %3562 }
 0x7dd   : > { %8662 = vrcp.f32 %v3563_v3 }
 0x7de   : > { %8664 = vrcp.f32 %v3565_v62 }
 0x869   : > { %v7183_v42 = vpop.f32.mrb[96].mxu0 }
 0x86a   : > { %v3130_v60 = vpop.f32.mrb[97].mxu0 }
 0x86b   : > { %v8173_v40 = vpack.c.bf16 %v7183_v42, %v3130_v60 }
 0x86d   : > { %v7186_v18 = vpop.f32.mrb[98].mxu0  ;;  %8174 = vmatprep.subr.bf16.mxu0 %v8173_v40 }
 0x86e   : > { %v3140_v47 = vpop.f32.mrb[99].mxu0  ;;  %8176 = vmatpush3.bf16.msra.mxu0 %v8173_v40 }
 0x86f   : > { %v8177_v20 = vpack.c.bf16 %v7186_v18, %v3140_v47  ;;  %v8649_v18 = vpop.eup %8648  ;;  %v3567_v47 = vpop.xlane.xlu0 %3566 }
 0x870   : > { %8666 = vrcp.f32 %v3567_v47  ;;  %v5589_v47 = vld [vmem:[%s10795_s1 + $0x1a0] sm:$0xff] }
 0x871   : > { %v7189_v13 = vpop.f32.mrb[100].mxu0  ;;  %8178 = vmatprep.subr.bf16.mxu0 %v8177_v20  ;;  %8668 = vrcp.f32 %v3569_v15 }
 0x872   : > { %v3150_v0 = vpop.f32.mrb[101].mxu0  ;;  %8180 = vmatpush3.bf16.msra.mxu0 %v8177_v20  ;;  %v5567_v20 = vld [vmem:[%s10798_s4 + $0x50] sm:$0xff] }
 0x873   : > { %v8181_v44 = vpack.c.bf16 %v7189_v13, %v3150_v0  ;;  %v8651_v13 = vpop.eup %8650  ;;  %v3595_v0 = vmul.f32 %v8649_v18, %v10076_v51 }
 0x874   : > { %v3596_v24 = vmul.f32 %v8651_v13, %v10086_v11  ;;  %v5591_v13 = vld [vmem:[%s10795_s1 + $0x1b0] sm:$0xff] }
 0x875   : > { %v7192_v14 = vpop.f32.mrb[102].mxu0  ;;  %8182 = vmatprep.subr.bf16.mxu0 %v8181_v44 }
 0x876   : > { %v3160_v57 = vpop.f32.mrb[103].mxu0  ;;  %8184 = vmatpush3.bf16.msra.mxu0 %v8181_v44  ;;  %v8209_v44 = vpack.c.bf16 %v5568_v41, %v5567_v20  ;;  %v5590_v20 = vld [vmem:[%s10795_s1 + $0x1a8] sm:$0xff] }
 0x877   : > { %v8185_v22 = vpack.c.bf16 %v7192_v14, %v3160_v57  ;;  %v8653_v14 = vpop.eup %8652  ;;  %v8221_v41 = vpack.c.bf16 %v5590_v20, %v5589_v47  ;;  %v5615_v20 = vld [vmem:[%s10796_s2 + $0x1f0] sm:$0xff] }
 0x878   : > { %v8655_v57 = vpop.eup %8654  ;;  %v3597_v28 = vmul.f32 %v8653_v14, %v10084_v32  ;;  %v5594_v14 = vld [vmem:[%s10795_s1 + $0x1c8] sm:$0xff] }
 0x879   : > { %v7195_v58 = vpop.f32.mrb[104].mxu0  ;;  %8186 = vmatprep.subr.bf16.mxu0 %v8185_v22  ;;  %v3598_v51 = vmul.f32 %v8655_v57, %v10094_v38  ;;  %v5595_v57 = vld [vmem:[%s10795_s1 + $0x1d0] sm:$0xff] }
 0x87a   : > { %v3170_v12 = vpop.f32.mrb[105].mxu0  ;;  %8188 = vmatpush3.bf16.msra.mxu0 %v8185_v22  ;;  %v3571_v22 = vpop.xlane.xlu0 %3570 }
 0x87b   : > { %v8189_v29 = vpack.c.bf16 %v7195_v58, %v3170_v12  ;;  %v8657_v58 = vpop.eup %8656  ;;  %8670 = vrcp.f32 %v3571_v22  ;;  %v5596_v22 = vld [vmem:[%s10795_s1 + $0x1d8] sm:$0xff] }
 0x87c   : > { %v8659_v12 = vpop.eup %8658  ;;  %v3599_v11 = vmul.f32 %v8657_v58, %v10092_v21  ;;  %v5597_v58 = vld [vmem:[%s10795_s1 + $0x1e0] sm:$0xff] }
 0x87d   : > { %v7198_v31 = vpop.f32.mrb[106].mxu0  ;;  %8190 = vmatprep.subr.bf16.mxu0 %v8189_v29  ;;  %v8661_v2 = vpop.eup %8660 }
 0x87e   : > { %v3180_v1 = vpop.f32.mrb[107].mxu0  ;;  %8192 = vmatpush3.bf16.msra.mxu0 %v8189_v29  ;;  %v3573_v29 = vpop.xlane.xlu1 %3572  ;;  %v3601_v38 = vmul.f32 %v8661_v2, %v10100_v23 }
 0x87f   : > { %v8193_v26 = vpack.c.bf16 %v7198_v31, %v3180_v1  ;;  %v3575_v31 = vpop.xlane.xlu0 %3574  ;;  %v3600_v1 = vmul.f32 %v8659_v12, %v10102_v30  ;;  %v8663_v35 = vpop.eup %8662  ;;  %8672 = vrcp.f32 %v3573_v29  ;;  %v5599_v29 = vld [vmem:[%s10795_s1 + $0x1f0] sm:$0xff] }
 0x880   : > { %8674 = vrcp.f32 %v3575_v31  ;;  %v5603_v31 = vld [vmem:[%s10796_s2 + $0x190] sm:$0xff] }
 0x881   : > { %v7201_v33 = vpop.f32.mrb[108].mxu0  ;;  %8194 = vmatprep.subr.bf16.mxu0 %v8193_v26 }
 0x882   : > { %v3190_v55 = vpop.f32.mrb[109].mxu0  ;;  %8196 = vmatpush3.bf16.msra.mxu0 %v8193_v26  ;;  %v3577_v32 = vpop.xlane.xlu1 %3576 }
 0x883   : > { %v8197_v34 = vpack.c.bf16 %v7201_v33, %v3190_v55  ;;  %v8665_v26 = vpop.eup %8664  ;;  %v3602_v33 = vmul.f32 %v8663_v35, %v10110_v56  ;;  %8676 = vrcp.f32 %v3577_v32 }
 0x884   : > { %v8667_v3 = vpop.eup %8666  ;;  %v3603_v21 = vmul.f32 %v8665_v26, %v10108_v37  ;;  %v5605_v26 = vld [vmem:[%s10796_s2 + $0x1a0] sm:$0xff] }
 0x885   : > { %v7204_v42 = vpop.f32.mrb[110].mxu0  ;;  %8198 = vmatprep.subr.bf16.mxu0 %v8197_v34  ;;  %v8669_v55 = vpop.eup %8668  ;;  %v3604_v30 = vmul.f32 %v8667_v3, %v10116_v61  ;;  %v5602_v61 = vld [vmem:[%s10796_s2 + $0x188] sm:$0xff] }
 0x886   : > { %v3200_v60 = vpop.f32.mrb[111].mxu0  ;;  %8200 = vmatpush3.bf16.msra.mxu0 %v8197_v34  ;;  %v8671_v34 = vpop.eup %8670  ;;  %v3605_v63 = vmul.f32 %v8669_v55, %v10114_v16  ;;  %v5601_v16 = vld [vmem:[%s10796_s2 + $0x180] sm:$0xff] }
 0x887   : > { %v8201_v40 = vpack.c.bf16 %v7204_v42, %v3200_v60  ;;  %v3606_v23 = vmul.f32 %v8671_v34, %v10128_v54  ;;  %v10333_v54 = vpack.c.bf16 %v5602_v61, %v5601_v16  ;;  %v5608_v34 = vld [vmem:[%s10796_s2 + $0x1b8] sm:$0xff]  ;;  %v5611_v16 = vld [vmem:[%s10796_s2 + $0x1d0] sm:$0xff] }
 0x888   : > { %v5612_v61 = vld [vmem:[%s10796_s2 + $0x1d8] sm:$0xff] }
 0x889   : > { %8202 = vmatprep.subr.bf16.mxu0 %v8201_v40  ;;  %v8673_v36 = vpop.eup %8672 }
 0x88a   : > { %8204 = vmatpush3.bf16.msra.mxu0 %v8201_v40  ;;  %v8675_v62 = vpop.eup %8674  ;;  %v3607_v56 = vmul.f32 %v8673_v36, %v10120_v43  ;;  %v5585_v43 = vld [vmem:[%s10795_s1 + $0x180] sm:$0xff] }
 0x88b   : > { %8206 = vmatprep.subr.bf16.mxu0 %v8205_v49  ;;  %v3608_v60 = vmul.f32 %v8675_v62, %v10141_v50  ;;  %v5587_v50 = vld [vmem:[%s10795_s1 + $0x190] sm:$0xff]  ;;  %v5609_v62 = vld [vmem:[%s10796_s2 + $0x1c0] sm:$0xff] }
 0x88d   : > { %7294 = vmatmul.mubr.f32.vlgmr.msra.gmra.mrb[112].mxu0 %v3595_v0  ;;  %v8677_v42 = vpop.eup %8676  ;;  %v5592_v0 = vld [vmem:[%s10795_s1 + $0x1b8] sm:$0xff] }
 0x88e   : > { %7296 = vmatprep.mubr.f32.mxu0 %v3596_v24  ;;  %8208 = vmatpush3.bf16.msra.mxu0 %v8205_v49  ;;  %v3609_v37 = vmul.f32 %v8677_v42, %v10132_v25  ;;  %v5586_v25 = vld [vmem:[%s10795_s1 + $0x188] sm:$0xff]  ;;  %v5588_v49 = vld [vmem:[%s10795_s1 + $0x198] sm:$0xff]  ;;  %v8225_v15 = vpack.c.bf16 %v5592_v0, %v5591_v13 }
 0x88f   : > { %8210 = vmatprep.subr.bf16.mxu0 %v8209_v44  ;;  %v8213_v40 = vpack.c.bf16 %v5586_v25, %v5585_v43  ;;  %v8217_v18 = vpack.c.bf16 %v5588_v49, %v5587_v50  ;;  %v8265_v25 = vpack.c.bf16 %v5612_v61, %v5611_v16  ;;  %v5613_v50 = vld [vmem:[%s10796_s2 + $0x1e0] sm:$0xff] }
 0x891   : > { %7297 = vmatmul.mubr.f32.gmra.mrb[114].mxu0 %v3597_v28  ;;  %8214 = vmatprep.subr.bf16.mxu1 %v8213_v40  ;;  %v8233_v28 = vpack.c.bf16 %v5596_v22, %v5595_v57 }
 0x892   : > { %7299 = vmatprep.mubr.f32.mxu0 %v3598_v51  ;;  %8212 = vmatpush3.bf16.msra.mxu0 %v8209_v44  ;;  %v5593_v44 = vld [vmem:[%s10795_s1 + $0x1c0] sm:$0xff]  ;;  %v5598_v51 = vld [vmem:[%s10795_s1 + $0x1e8] sm:$0xff] }
 0x893   : > { %8246 = vmatprep.subr.bf16.mxu0 %v10333_v54  ;;  %8216 = vmatpush3.bf16.msra.mxu1 %v8213_v40  ;;  %v8229_v24 = vpack.c.bf16 %v5594_v14, %v5593_v44  ;;  %v8237_v12 = vpack.c.bf16 %v5598_v51, %v5597_v58  ;;  %v5614_v40 = vld [vmem:[%s10796_s2 + $0x1e8] sm:$0xff] }
 0x894   : > { %8218 = vmatprep.subr.bf16.mxu1 %v8217_v18  ;;  %v8269_v47 = vpack.c.bf16 %v5614_v40, %v5613_v50 }
 0x895   : > { %7300 = vmatmul.mubr.f32.gmra.mrb[116].mxu0 %v3599_v11  ;;  %v5600_v11 = vld [vmem:[%s10795_s1 + $0x1f8] sm:$0xff] }
 0x896   : > { %7302 = vmatprep.mubr.f32.mxu0 %v3600_v1  ;;  %v8241_v2 = vpack.c.bf16 %v5600_v11, %v5599_v29  ;;  %v5604_v1 = vld [vmem:[%s10796_s2 + $0x198] sm:$0xff] }
 0x897   : > { %8220 = vmatpush3.bf16.msra.mxu1 %v8217_v18 }
 0x898   : > { %8222 = vmatprep.subr.bf16.mxu1 %v8221_v41 }
 0x899   : > { %7303 = vmatmul.mubr.f32.gmra.mrb[118].mxu0 %v3601_v38  ;;  %v8249_v38 = vpack.c.bf16 %v5604_v1, %v5603_v31 }
 0x89a   : > { %7305 = vmatprep.mubr.f32.mxu0 %v3602_v33  ;;  %v5606_v33 = vld [vmem:[%s10796_s2 + $0x1a8] sm:$0xff] }
 0x89b   : > { %8224 = vmatpush3.bf16.msra.mxu1 %v8221_v41  ;;  %v8253_v55 = vpack.c.bf16 %v5606_v33, %v5605_v26  ;;  %v5616_v41 = vld [vmem:[%s10796_s2 + $0x1f8] sm:$0xff] }
 0x89c   : > { %8226 = vmatprep.subr.bf16.mxu1 %v8225_v15 }
 0x89d   : > { %7306 = vmatmul.mubr.f32.gmra.mrb[120].mxu0 %v3603_v21 }
 0x89e   : > { %7308 = vmatprep.mubr.f32.mxu0 %v3604_v30  ;;  %v5607_v30 = vld [vmem:[%s10796_s2 + $0x1b0] sm:$0xff] }
 0x89f   : > { %8228 = vmatpush3.bf16.msra.mxu1 %v8225_v15  ;;  %v8273_v15 = vpack.c.bf16 %v5616_v41, %v5615_v20  ;;  %v5619_v20 = vld [vmem:[%s10797_s3 + $0x190] sm:$0xff] }
 0x8a0   : > { %8230 = vmatprep.subr.bf16.mxu1 %v8229_v24 }
 0x8a1   : > { %7309 = vmatmul.mubr.f32.gmra.mrb[122].mxu0 %v3605_v63 }
 0x8a2   : > { %7311 = vmatprep.mubr.f32.mxu0 %v3606_v23  ;;  %v8257_v23 = vpack.c.bf16 %v5608_v34, %v5607_v30 }
 0x8a3   : > { %8232 = vmatpush3.bf16.msra.mxu1 %v8229_v24 }
 0x8a4   : > { %8234 = vmatprep.subr.bf16.mxu1 %v8233_v28 }
 0x8a5   : > { %7312 = vmatmul.mubr.f32.gmra.mrb[124].mxu0 %v3607_v56  ;;  %v5610_v56 = vld [vmem:[%s10796_s2 + $0x1c8] sm:$0xff] }
 0x8a6   : > { %7314 = vmatprep.mubr.f32.mxu0 %v3608_v60 }
 0x8a7   : > { %8236 = vmatpush3.bf16.msra.mxu1 %v8233_v28 }
 0x8a8   : > { %8238 = vmatprep.subr.bf16.mxu1 %v8237_v12 }
 0x8a9   : > { %7315 = vmatmul.mubr.f32.gmra.mrb[126].mxu0 %v3609_v37  ;;  %v8261_v37 = vpack.c.bf16 %v5610_v56, %v5609_v62 }
 0x8ab   : > { %8240 = vmatpush3.bf16.msra.mxu1 %v8237_v12 }
 0x8ac   : > { %8242 = vmatprep.subr.bf16.mxu1 %v8241_v2 }
 0x8af   : > { %8244 = vmatpush3.bf16.msra.mxu1 %v8241_v2 }
 0x8b2   : > { %7382 = vmatmul.mubr.f32.vlgmr.msra.gmra.mrb[128].mxu1 %v10240_v6 }
 0x8b3   : > { %7384 = vmatprep.mubr.f32.mxu1 %v10244_v7 }
 0x8b6   : > { %7385 = vmatmul.mubr.f32.gmra.mrb[130].mxu1 %v10248_v46 }
 0x8b7   : > { %7387 = vmatprep.mubr.f32.mxu1 %v10252_v9 }
 0x8ba   : > { %7388 = vmatmul.mubr.f32.gmra.mrb[132].mxu1 %v10256_v10 }
 0x8bb   : > { %7390 = vmatprep.mubr.f32.mxu1 %v10260_v45 }
 0x8be   : > { %7391 = vmatmul.mubr.f32.gmra.mrb[134].mxu1 %v10264_v17 }
 0x8bf   : > { %7393 = vmatprep.mubr.f32.mxu1 %v10268_v59 }
 0x8c2   : > { %7394 = vmatmul.mubr.f32.gmra.mrb[136].mxu1 %v10272_v52 }
 0x8c3   : > { %7396 = vmatprep.mubr.f32.mxu1 %v10276_v27 }
 0x8c6   : > { %7397 = vmatmul.mubr.f32.gmra.mrb[138].mxu1 %v10280_v4 }
 0x8c7   : > { %7399 = vmatprep.mubr.f32.mxu1 %v10284_v48 }
 0x8ca   : > { %7400 = vmatmul.mubr.f32.gmra.mrb[140].mxu1 %v10288_v53 }
 0x8cb   : > { %7402 = vmatprep.mubr.f32.mxu1 %v10292_v8 }
 0x8ce   : > { %7403 = vmatmul.mubr.f32.gmra.mrb[142].mxu1 %v10296_v39 }
 0x8cf   : > { %7493 = vmatprep.mubr.f32.mxu1 %v10236_v5 }
 0x960   : > { %v7295_v35 = vpop.f32.mrb[112].mxu0 }
 0x961   : > { %v3676_v32 = vpop.f32.mrb[113].mxu0 }
 0x962   : > { %7325 = vmatprep.mubr.msk.f32.mxu0 %vm749_vm0, %v3676_v32 }
 0x963   : > { %7326 = vmatmul.mubr.msk.f32.vlgmr.msra.gmra.mrb[80].mxu0 %vm749_vm0, %v7295_v35 }
 0x964   : > { %v7298_v3 = vpop.f32.mrb[114].mxu0  ;;  %8248 = vmatpush3.bf16.msra.mxu0 %v10333_v54 }
 0x965   : > { %v3686_v21 = vpop.f32.mrb[115].mxu0  ;;  %8250 = vmatprep.subr.bf16.mxu0 %v8249_v38 }
 0x966   : > { %7328 = vmatprep.mubr.msk.f32.mxu0 %vm749_vm0, %v3686_v21 }
 0x967   : > { %7329 = vmatmul.mubr.msk.f32.gmra.mrb[82].mxu0 %vm749_vm0, %v7298_v3 }
 0x968   : > { %v7301_v63 = vpop.f32.mrb[116].mxu0  ;;  %8252 = vmatpush3.bf16.msra.mxu0 %v8249_v38 }
 0x969   : > { %v3696_v36 = vpop.f32.mrb[117].mxu0  ;;  %8254 = vmatprep.subr.bf16.mxu0 %v8253_v55 }
 0x96a   : > { %7331 = vmatprep.mubr.msk.f32.mxu0 %vm749_vm0, %v3696_v36 }
 0x96b   : > { %7332 = vmatmul.mubr.msk.f32.gmra.mrb[84].mxu0 %vm749_vm0, %v7301_v63 }
 0x96c   : > { %v7304_v42 = vpop.f32.mrb[118].mxu0  ;;  %8256 = vmatpush3.bf16.msra.mxu0 %v8253_v55 }
 0x96d   : > { %v3706_v60 = vpop.f32.mrb[119].mxu0  ;;  %8258 = vmatprep.subr.bf16.mxu0 %v8257_v23 }
 0x96e   : > { %7334 = vmatprep.mubr.msk.f32.mxu0 %vm749_vm0, %v3706_v60 }
 0x96f   : > { %7335 = vmatmul.mubr.msk.f32.gmra.mrb[86].mxu0 %vm749_vm0, %v7304_v42 }
 0x970   : > { %v7307_v54 = vpop.f32.mrb[120].mxu0  ;;  %8260 = vmatpush3.bf16.msra.mxu0 %v8257_v23 }
 0x971   : > { %v3716_v43 = vpop.f32.mrb[121].mxu0  ;;  %8262 = vmatprep.subr.bf16.mxu0 %v8261_v37 }
 0x972   : > { %7337 = vmatprep.mubr.msk.f32.mxu0 %vm749_vm0, %v3716_v43 }
 0x973   : > { %7338 = vmatmul.mubr.msk.f32.gmra.mrb[88].mxu0 %vm749_vm0, %v7307_v54 }
 0x974   : > { %v7310_v49 = vpop.f32.mrb[122].mxu0  ;;  %8264 = vmatpush3.bf16.msra.mxu0 %v8261_v37 }
 0x975   : > { %v3726_v18 = vpop.f32.mrb[123].mxu0  ;;  %8266 = vmatprep.subr.bf16.mxu0 %v8265_v25 }
 0x976   : > { %7340 = vmatprep.mubr.msk.f32.mxu0 %vm749_vm0, %v3726_v18 }
 0x977   : > { %7341 = vmatmul.mubr.msk.f32.gmra.mrb[90].mxu0 %vm749_vm0, %v7310_v49 }
 0x978   : > { %v7313_v13 = vpop.f32.mrb[124].mxu0  ;;  %8268 = vmatpush3.bf16.msra.mxu0 %v8265_v25 }
 0x979   : > { %v3736_v0 = vpop.f32.mrb[125].mxu0  ;;  %8270 = vmatprep.subr.bf16.mxu0 %v8269_v47 }
 0x97a   : > { %7343 = vmatprep.mubr.msk.f32.mxu0 %vm749_vm0, %v3736_v0 }
 0x97b   : > { %7344 = vmatmul.mubr.msk.f32.gmra.mrb[92].mxu0 %vm749_vm0, %v7313_v13  ;;  %v5620_v13 = vld [vmem:[%s10797_s3 + $0x198] sm:$0xff] }
 0x97c   : > { %v7316_v44 = vpop.f32.mrb[126].mxu0  ;;  %8272 = vmatpush3.bf16.msra.mxu0 %v8269_v47  ;;  %v5618_v47 = vld [vmem:[%s10797_s3 + $0x188] sm:$0xff]  ;;  %v8281_v0 = vpack.c.bf16 %v5620_v13, %v5619_v20 }
 0x97d   : > { %v3746_v14 = vpop.f32.mrb[127].mxu0  ;;  %8274 = vmatprep.subr.bf16.mxu0 %v8273_v15  ;;  %v8277_v41 = vpack.c.bf16 %v5618_v47, %v5617_v19 }
 0x97e   : > { %7346 = vmatprep.mubr.msk.f32.mxu0 %vm749_vm0, %v3746_v14 }
 0x97f   : > { %7347 = vmatmul.mubr.msk.f32.gmra.mrb[94].mxu0 %vm749_vm0, %v7316_v44  ;;  %v5622_v44 = vld [vmem:[%s10797_s3 + $0x1a8] sm:$0xff]  ;;  %8278 = vmatprep.subr.bf16.mxu1 %v8277_v41 }
 0x980   : > { %8276 = vmatpush3.bf16.msra.mxu0 %v8273_v15  ;;  %7437 = vmatprep.mubr.f32.mxu0 %v10236_v5  ;;  %v5621_v15 = vld [vmem:[%s10797_s3 + $0x1a0] sm:$0xff] }
 0x981   : > { %8280 = vmatpush3.bf16.msra.mxu1 %v8277_v41  ;;  %v8285_v14 = vpack.c.bf16 %v5622_v44, %v5621_v15 }
 0x982   : > { %8282 = vmatprep.subr.bf16.mxu1 %v8281_v0 }
 0x983   : > { %7438 = vmatmul.mubr.f32.vlgmr.msra.gmra.mrb[128].mxu0 %v10240_v6 }
 0x984   : > { %7440 = vmatprep.mubr.f32.mxu0 %v10244_v7 }
 0x985   : > { %v7383_v5 = vpop.f32.mrb[128].mxu1  ;;  %8284 = vmatpush3.bf16.msra.mxu1 %v8281_v0 }
 0x986   : > { %v4052_v24 = vpop.f32.mrb[129].mxu1  ;;  %8286 = vmatprep.subr.bf16.mxu1 %v8285_v14 }
 0x987   : > { %7441 = vmatmul.mubr.f32.gmra.mrb[130].mxu0 %v10248_v46 }
 0x988   : > { %7443 = vmatprep.mubr.f32.mxu0 %v10252_v9 }
 0x989   : > { %v7386_v57 = vpop.f32.mrb[130].mxu1  ;;  %8288 = vmatpush3.bf16.msra.mxu1 %v8285_v14 }
 0x98a   : > { %v4062_v22 = vpop.f32.mrb[131].mxu1 }
 0x98b   : > { %7444 = vmatmul.mubr.f32.gmra.mrb[132].mxu0 %v10256_v10 }
 0x98c   : > { %7446 = vmatprep.mubr.f32.mxu0 %v10260_v45 }
 0x98d   : > { %v7389_v28 = vpop.f32.mrb[132].mxu1 }
 0x98e   : > { %v4072_v58 = vpop.f32.mrb[133].mxu1 }
 0x98f   : > { %7447 = vmatmul.mubr.f32.gmra.mrb[134].mxu0 %v10264_v17 }
 0x990   : > { %7449 = vmatprep.mubr.f32.mxu0 %v10268_v59 }
 0x991   : > { %v7392_v51 = vpop.f32.mrb[134].mxu1 }
 0x992   : > { %v4082_v12 = vpop.f32.mrb[135].mxu1 }
 0x993   : > { %7450 = vmatmul.mubr.f32.gmra.mrb[136].mxu0 %v10272_v52 }
 0x994   : > { %7452 = vmatprep.mubr.f32.mxu0 %v10276_v27 }
 0x995   : > { %v7395_v29 = vpop.f32.mrb[136].mxu1 }
 0x996   : > { %v4092_v11 = vpop.f32.mrb[137].mxu1 }
 0x997   : > { %7453 = vmatmul.mubr.f32.gmra.mrb[138].mxu0 %v10280_v4 }
 0x998   : > { %7455 = vmatprep.mubr.f32.mxu0 %v10284_v48 }
 0x999   : > { %v7398_v2 = vpop.f32.mrb[138].mxu1 }
 0x99a   : > { %v4102_v31 = vpop.f32.mrb[139].mxu1 }
 0x99b   : > { %7456 = vmatmul.mubr.f32.gmra.mrb[140].mxu0 %v10288_v53 }
 0x99c   : > { %7458 = vmatprep.mubr.f32.mxu0 %v10292_v8 }
 0x99d   : > { %v7401_v1 = vpop.f32.mrb[140].mxu1 }
 0x99e   : > { %v4112_v35 = vpop.f32.mrb[141].mxu1 }
 0x99f   : > { %7459 = vmatmul.mubr.f32.gmra.mrb[142].mxu0 %v10296_v39 }
 0x9a0   : > { %7549 = vmatprep.mubr.msk.f32.mxu0 %vm749_vm0, %v4052_v24  ;;  %v5624_v24 = vld [vmem:[%s10797_s3 + $0x1b8] sm:$0xff] }
 0x9a1   : > { %v7404_v32 = vpop.f32.mrb[142].mxu1 }
 0x9a2   : > { %v4122_v38 = vpop.f32.mrb[143].mxu1 }
 0xa56   : > { %v7439_v26 = vpop.f32.mrb[128].mxu0 }
 0xa57   : > { %v4214_v33 = vpop.f32.mrb[129].mxu0 }
 0xa58   : > { %v8309_v3 = vpack.c.bf16 %v7439_v26, %v4214_v33 }
 0xa5a   : > { %8311 = vmatprep.subr.msk.bf16.mxu0 %vm9111_vm1, %v8309_v3  ;;  %v7442_v21 = vpop.f32.mrb[130].mxu0 }
 0xa5b   : > { %8314 = vmatpush3.bf16.xpose.msk.msra.mxu0 %vm9111_vm1, %v8309_v3  ;;  %v4224_v55 = vpop.f32.mrb[131].mxu0 }
 0xa5c   : > { %v8315_v30 = vpack.c.bf16 %v7442_v21, %v4224_v55 }
 0xa5e   : > { %8317 = vmatprep.subr.msk.bf16.mxu0 %vm9111_vm1, %v8315_v30  ;;  %v7445_v34 = vpop.f32.mrb[132].mxu0 }
 0xa5f   : > { %v4234_v63 = vpop.f32.mrb[133].mxu0 }
 0xa60   : > { %v8321_v36 = vpack.c.bf16 %v7445_v34, %v4234_v63 }
 0xa62   : > { %v7448_v23 = vpop.f32.mrb[134].mxu0 }
 0xa63   : > { %8320 = vmatpush3.bf16.xpose.msk.msra.mxu0 %vm9111_vm1, %v8315_v30  ;;  %v4244_v62 = vpop.f32.mrb[135].mxu0 }
 0xa64   : > { %8323 = vmatprep.subr.msk.bf16.mxu0 %vm9111_vm1, %v8321_v36  ;;  %v8327_v56 = vpack.c.bf16 %v7448_v23, %v4244_v62 }
 0xa66   : > { %v7451_v42 = vpop.f32.mrb[136].mxu0 }
 0xa67   : > { %v4254_v60 = vpop.f32.mrb[137].mxu0 }
 0xa68   : > { %v8333_v37 = vpack.c.bf16 %v7451_v42, %v4254_v60 }
 0xa6a   : > { %v7454_v16 = vpop.f32.mrb[138].mxu0 }
 0xa6b   : > { %8326 = vmatpush3.bf16.xpose.msk.msra.mxu0 %vm9111_vm1, %v8321_v36  ;;  %v4264_v61 = vpop.f32.mrb[139].mxu0 }
 0xa6c   : > { %8329 = vmatprep.subr.msk.bf16.mxu0 %vm9111_vm1, %v8327_v56  ;;  %v8339_v54 = vpack.c.bf16 %v7454_v16, %v4264_v61 }
 0xa6e   : > { %v7457_v43 = vpop.f32.mrb[140].mxu0 }
 0xa6f   : > { %v4274_v25 = vpop.f32.mrb[141].mxu0 }
 0xa70   : > { %v8345_v50 = vpack.c.bf16 %v7457_v43, %v4274_v25 }
 0xa72   : > { %v7460_v40 = vpop.f32.mrb[142].mxu0 }
 0xa73   : > { %8332 = vmatpush3.bf16.xpose.msk.msra.mxu0 %vm9111_vm1, %v8327_v56  ;;  %v4284_v49 = vpop.f32.mrb[143].mxu0 }
 0xa74   : > { %8335 = vmatprep.subr.msk.bf16.mxu0 %vm9111_vm1, %v8333_v37  ;;  %v8351_v18 = vpack.c.bf16 %v7460_v40, %v4284_v49 }
 0xa7b   : > { %8338 = vmatpush3.bf16.xpose.msk.msra.mxu0 %vm9111_vm1, %v8333_v37 }
 0xa7c   : > { %8341 = vmatprep.subr.msk.bf16.mxu0 %vm9111_vm1, %v8339_v54 }
 0xa83   : > { %8344 = vmatpush3.bf16.xpose.msk.msra.mxu0 %vm9111_vm1, %v8339_v54 }
 0xa84   : > { %8347 = vmatprep.subr.msk.bf16.mxu0 %vm9111_vm1, %v8345_v50 }
 0xa8b   : > { %8350 = vmatpush3.bf16.xpose.msk.msra.mxu0 %vm9111_vm1, %v8345_v50 }
 0xa8c   : > { %8353 = vmatprep.subr.msk.bf16.mxu0 %vm9111_vm1, %v8351_v18 }
 0xa93   : > { %8356 = vmatpush3.bf16.xpose.msk.msra.mxu0 %vm9111_vm1, %v8351_v18 }
 0xa9a   : > { %7550 = vmatmul.mubr.msk.f32.vlgmr.msra.gmra.mrb[144].mxu0 %vm749_vm0, %v7383_v5  ;;  %v5623_v5 = vld [vmem:[%s10797_s3 + $0x1b0] sm:$0xff] }
 0xa9b   : > { %7552 = vmatprep.mubr.msk.f32.mxu0 %vm749_vm0, %v4062_v22  ;;  %v5625_v22 = vld [vmem:[%s10797_s3 + $0x1c0] sm:$0xff] }
 0xa9e   : > { %7553 = vmatmul.mubr.msk.f32.gmra.mrb[146].mxu0 %vm749_vm0, %v7386_v57  ;;  %v8289_v57 = vpack.c.bf16 %v5624_v24, %v5623_v5 }
 0xa9f   : > { %7555 = vmatprep.mubr.msk.f32.mxu0 %vm749_vm0, %v4072_v58 }
 0xaa0   : > { %8290 = vmatprep.subr.bf16.mxu1 %v8289_v57 }
 0xaa1   : > { %8292 = vmatpush3.bf16.msra.mxu1 %v8289_v57 }
 0xaa2   : > { %7556 = vmatmul.mubr.msk.f32.gmra.mrb[148].mxu0 %vm749_vm0, %v7389_v28  ;;  %v5626_v28 = vld [vmem:[%s10797_s3 + $0x1c8] sm:$0xff] }
 0xaa3   : > { %7558 = vmatprep.mubr.msk.f32.mxu0 %vm749_vm0, %v4082_v12  ;;  %v8293_v58 = vpack.c.bf16 %v5626_v28, %v5625_v22  ;;  %v5628_v12 = vld [vmem:[%s10797_s3 + $0x1d8] sm:$0xff] }
 0xaa5   : > { %8294 = vmatprep.subr.bf16.mxu1 %v8293_v58 }
 0xaa6   : > { %7559 = vmatmul.mubr.msk.f32.gmra.mrb[150].mxu0 %vm749_vm0, %v7392_v51  ;;  %v5627_v51 = vld [vmem:[%s10797_s3 + $0x1d0] sm:$0xff]  ;;  %8296 = vmatpush3.bf16.msra.mxu1 %v8293_v58 }
 0xaa7   : > { %7561 = vmatprep.mubr.msk.f32.mxu0 %vm749_vm0, %v4092_v11  ;;  %v5629_v11 = vld [vmem:[%s10797_s3 + $0x1e0] sm:$0xff] }
 0xaaa   : > { %7562 = vmatmul.mubr.msk.f32.gmra.mrb[152].mxu0 %vm749_vm0, %v7395_v29  ;;  %v8297_v29 = vpack.c.bf16 %v5628_v12, %v5627_v51 }
 0xaab   : > { %7564 = vmatprep.mubr.msk.f32.mxu0 %vm749_vm0, %v4102_v31 }
 0xaac   : > { %8298 = vmatprep.subr.bf16.mxu1 %v8297_v29 }
 0xaad   : > { %8300 = vmatpush3.bf16.msra.mxu1 %v8297_v29 }
 0xaae   : > { %7565 = vmatmul.mubr.msk.f32.gmra.mrb[154].mxu0 %vm749_vm0, %v7398_v2  ;;  %v5630_v2 = vld [vmem:[%s10797_s3 + $0x1e8] sm:$0xff] }
 0xaaf   : > { %7567 = vmatprep.mubr.msk.f32.mxu0 %vm749_vm0, %v4112_v35  ;;  %v8301_v31 = vpack.c.bf16 %v5630_v2, %v5629_v11  ;;  %v5632_v35 = vld [vmem:[%s10797_s3 + $0x1f8] sm:$0xff] }
 0xab1   : > { %8302 = vmatprep.subr.bf16.mxu1 %v8301_v31 }
 0xab2   : > { %7568 = vmatmul.mubr.msk.f32.gmra.mrb[156].mxu0 %vm749_vm0, %v7401_v1  ;;  %v5631_v1 = vld [vmem:[%s10797_s3 + $0x1f0] sm:$0xff]  ;;  %8304 = vmatpush3.bf16.msra.mxu1 %v8301_v31 }
 0xab3   : > { %7570 = vmatprep.mubr.msk.f32.mxu0 %vm749_vm0, %v4122_v38 }
 0xab6   : > { %7571 = vmatmul.mubr.msk.f32.gmra.mrb[158].mxu0 %vm749_vm0, %v7404_v32  ;;  %v8305_v32 = vpack.c.bf16 %v5632_v35, %v5631_v1 }
 0xab8   : > { %8306 = vmatprep.subr.bf16.mxu1 %v8305_v32 }
 0xab9   : > { %8308 = vmatpush3.bf16.msra.mxu1 %v8305_v32 }
 0xabc   : > { %7494 = vmatmul.mubr.f32.vlgmr.msra.gmra.mrb[144].mxu1 %v10240_v6 }
 0xabd   : > { %7496 = vmatprep.mubr.f32.mxu1 %v10244_v7 }
 0xac0   : > { %7497 = vmatmul.mubr.f32.gmra.mrb[146].mxu1 %v10248_v46 }
 0xac1   : > { %7499 = vmatprep.mubr.f32.mxu1 %v10252_v9 }
 0xac4   : > { %7500 = vmatmul.mubr.f32.gmra.mrb[148].mxu1 %v10256_v10 }
 0xac5   : > { %7502 = vmatprep.mubr.f32.mxu1 %v10260_v45 }
 0xac8   : > { %7503 = vmatmul.mubr.f32.gmra.mrb[150].mxu1 %v10264_v17 }
 0xac9   : > { %7505 = vmatprep.mubr.f32.mxu1 %v10268_v59 }
 0xacc   : > { %7506 = vmatmul.mubr.f32.gmra.mrb[152].mxu1 %v10272_v52 }
 0xacd   : > { %7508 = vmatprep.mubr.f32.mxu1 %v10276_v27 }
 0xad0   : > { %7509 = vmatmul.mubr.f32.gmra.mrb[154].mxu1 %v10280_v4 }
 0xad1   : > { %7511 = vmatprep.mubr.f32.mxu1 %v10284_v48 }
 0xad4   : > { %7512 = vmatmul.mubr.f32.gmra.mrb[156].mxu1 %v10288_v53 }
 0xad5   : > { %7514 = vmatprep.mubr.f32.mxu1 %v10292_v8 }
 0xad8   : > { %7515 = vmatmul.mubr.f32.gmra.mrb[158].mxu1 %v10296_v39 }
 0xb6d   : > { %v7551_v6 = vpop.f32.mrb[144].mxu0 }
 0xb6e   : > { %v4697_v7 = vmul.f32 0.17677669, %v7551_v6  ;;  %v4617_v46 = vpop.f32.mrb[145].mxu0 }
 0xb6f   : > { %v4696_v9 = vmul.f32 0.17677669, %v4617_v46 }
 0xb70   : > { %4714 = vmax.xlane.f32.xlu1 %v4697_v7 }
 0xb71   : > { %4712 = vmax.xlane.f32.xlu0 %v4696_v9  ;;  %v7554_v10 = vpop.f32.mrb[146].mxu0 }
 0xb72   : > { %v4699_v45 = vmul.f32 0.17677669, %v7554_v10  ;;  %v4627_v17 = vpop.f32.mrb[147].mxu0 }
 0xb73   : > { %v4698_v59 = vmul.f32 0.17677669, %v4627_v17 }
 0xb74   : > { %4718 = vmax.xlane.f32.xlu1 %v4699_v45 }
 0xb75   : > { %4716 = vmax.xlane.f32.xlu0 %v4698_v59  ;;  %v7557_v52 = vpop.f32.mrb[148].mxu0 }
 0xb76   : > { %v4701_v27 = vmul.f32 0.17677669, %v7557_v52  ;;  %v4637_v4 = vpop.f32.mrb[149].mxu0 }
 0xb77   : > { %v4700_v48 = vmul.f32 0.17677669, %v4637_v4 }
 0xb78   : > { %4722 = vmax.xlane.f32.xlu1 %v4701_v27 }
 0xb79   : > { %4720 = vmax.xlane.f32.xlu0 %v4700_v48  ;;  %v7560_v53 = vpop.f32.mrb[150].mxu0 }
 0xb7a   : > { %v10586_v8 = vmul.f32 0.17677669, %v7560_v53  ;;  %v4647_v39 = vpop.f32.mrb[151].mxu0 }
 0xb7b   : > { %v10588_v38 = vmul.f32 0.17677669, %v4647_v39 }
 0xb7c   : > { %4726 = vmax.xlane.f32.xlu1 %v10586_v8 }
 0xb7d   : > { %4724 = vmax.xlane.f32.xlu0 %v10588_v38  ;;  %v7563_v26 = vpop.f32.mrb[152].mxu0 }
 0xb7e   : > { %v10592_v33 = vmul.f32 0.17677669, %v7563_v26  ;;  %v4657_v3 = vpop.f32.mrb[153].mxu0 }
 0xb7f   : > { %v10594_v21 = vmul.f32 0.17677669, %v4657_v3 }
 0xb80   : > { %4730 = vmax.xlane.f32.xlu1 %v10592_v33 }
 0xb81   : > { %4728 = vmax.xlane.f32.xlu0 %v10594_v21  ;;  %v7566_v55 = vpop.f32.mrb[154].mxu0 }
 0xb82   : > { %v10598_v30 = vmul.f32 0.17677669, %v7566_v55  ;;  %v4667_v34 = vpop.f32.mrb[155].mxu0 }
 0xb83   : > { %v10600_v63 = vmul.f32 0.17677669, %v4667_v34 }
 0xb84   : > { %4734 = vmax.xlane.f32.xlu1 %v10598_v30 }
 0xb85   : > { %4732 = vmax.xlane.f32.xlu0 %v10600_v63  ;;  %v7569_v36 = vpop.f32.mrb[156].mxu0 }
 0xb86   : > { %v10604_v23 = vmul.f32 0.17677669, %v7569_v36  ;;  %v4677_v62 = vpop.f32.mrb[157].mxu0 }
 0xb87   : > { %v10606_v56 = vmul.f32 0.17677669, %v4677_v62 }
 0xb88   : > { %4738 = vmax.xlane.f32.xlu1 %v10604_v23 }
 0xb89   : > { %4736 = vmax.xlane.f32.xlu0 %v10606_v56  ;;  %v7572_v42 = vpop.f32.mrb[158].mxu0 }
 0xb8a   : > { %v10610_v60 = vmul.f32 0.17677669, %v7572_v42  ;;  %v4687_v37 = vpop.f32.mrb[159].mxu0 }
 0xb8b   : > { %v10612_v16 = vmul.f32 0.17677669, %v4687_v37 }
 0xb8c   : > { %4742 = vmax.xlane.f32.xlu1 %v10610_v60 }
 0xb8d   : > { %4740 = vmax.xlane.f32.xlu0 %v10612_v16 }
 0xb8f   : > { %v7495_v20 = vpop.f32.mrb[144].mxu1 }
 0xb90   : > { %v4376_v13 = vpop.f32.mrb[145].mxu1 }
 0xb91   : > { %v8357_v44 = vpack.c.bf16 %v7495_v20, %v4376_v13 }
 0xb93   : > { %v7498_v57 = vpop.f32.mrb[146].mxu1  ;;  %8358 = vmatprep.subr.bf16.mxu1 %v8357_v44 }
 0xb94   : > { %v4386_v28 = vpop.f32.mrb[147].mxu1  ;;  %8360 = vmatpush3.bf16.msra.mxu1 %v8357_v44 }
 0xb95   : > { %v8361_v12 = vpack.c.bf16 %v7498_v57, %v4386_v28 }
 0xb97   : > { %v7501_v31 = vpop.f32.mrb[148].mxu1  ;;  %8362 = vmatprep.subr.bf16.mxu1 %v8361_v12 }
 0xb98   : > { %v4396_v32 = vpop.f32.mrb[149].mxu1  ;;  %8364 = vmatpush3.bf16.msra.mxu1 %v8361_v12  ;;  %v5665_v12 = vld [vmem:[%s10798_s4 + $0x60] sm:$0xff] }
 0xbfd   : > { %v4715_v61 = vpop.xlane.xlu1 %4714 }
 0xbfe   : > { %v4745_v54 = vsub.f32 %v4697_v7, %v4715_v61  ;;  %v4713_v43 = vpop.xlane.xlu0 %4712 }
 0xbff   : > { %v4744_v25 = vsub.f32 %v4696_v9, %v4713_v43  ;;  %v8365_v9 = vpack.c.bf16 %v7501_v31, %v4396_v32  ;;  %v5668_v31 = vld [vmem:[%s10798_s4 + $0x78] sm:$0xff] }
 0xc00   : > { %v4762_v50 = vmul.f32 1.442695, %v4745_v54 }
 0xc01   : > { %v4760_v40 = vmul.f32 1.442695, %v4744_v25  ;;  %v4719_v49 = vpop.xlane.xlu1 %4718  ;;  %8366 = vmatprep.subr.bf16.mxu1 %v8365_v9 }
 0xc02   : > { %8678 = vpow2.f32 %v4762_v50  ;;  %v4747_v18 = vsub.f32 %v4699_v45, %v4719_v49  ;;  %v4717_v19 = vpop.xlane.xlu0 %4716  ;;  %8368 = vmatpush3.bf16.msra.mxu1 %v8365_v9 }
 0xc03   : > { %8680 = vpow2.f32 %v4760_v40  ;;  %v4746_v47 = vsub.f32 %v4698_v59, %v4717_v19  ;;  %v7504_v59 = vpop.f32.mrb[150].mxu1 }
 0xc04   : > { %v4766_v41 = vmul.f32 1.442695, %v4747_v18  ;;  %v4406_v4 = vpop.f32.mrb[151].mxu1 }
 0xc05   : > { %v4764_v0 = vmul.f32 1.442695, %v4746_v47  ;;  %v4723_v15 = vpop.xlane.xlu1 %4722  ;;  %v8369_v39 = vpack.c.bf16 %v7504_v59, %v4406_v4  ;;  %v7507_v3 = vpop.f32.mrb[152].mxu1 }
 0xc06   : > { %8682 = vpow2.f32 %v4766_v41  ;;  %v4749_v14 = vsub.f32 %v4701_v27, %v4723_v15  ;;  %v4721_v5 = vpop.xlane.xlu0 %4720  ;;  %v4416_v34 = vpop.f32.mrb[153].mxu1 }
 0xc07   : > { %8684 = vpow2.f32 %v4764_v0  ;;  %v4748_v24 = vsub.f32 %v4700_v48, %v4721_v5  ;;  %8370 = vmatprep.subr.bf16.mxu1 %v8369_v39  ;;  %v7510_v54 = vpop.f32.mrb[154].mxu1 }
 0xc08   : > { %v4770_v22 = vmul.f32 1.442695, %v4749_v14  ;;  %8372 = vmatpush3.bf16.msra.mxu1 %v8369_v39  ;;  %v4426_v50 = vpop.f32.mrb[155].mxu1 }
 0xc09   : > { %v4768_v58 = vmul.f32 1.442695, %v4748_v24  ;;  %v4727_v51 = vpop.xlane.xlu1 %4726  ;;  %v7513_v15 = vpop.f32.mrb[156].mxu1 }
 0xc0a   : > { %8686 = vpow2.f32 %v4770_v22  ;;  %v4751_v29 = vsub.f32 %v10586_v8, %v4727_v51  ;;  %v4725_v11 = vpop.xlane.xlu0 %4724 }
 0xc0b   : > { %8688 = vpow2.f32 %v4768_v58  ;;  %v4750_v2 = vsub.f32 %v10588_v38, %v4725_v11  ;;  %v5667_v11 = vld [vmem:[%s10798_s4 + $0x70] sm:$0xff] }
 0xc0c   : > { %v10618_v1 = vpop.eup %8678  ;;  %v4774_v35 = vmul.f32 1.442695, %v4751_v29  ;;  %v5666_v29 = vld [vmem:[%s10798_s4 + $0x68] sm:$0xff] }
 0xc0d   : > { %v10620_v6 = vpop.eup %8680  ;;  %v4772_v7 = vmul.f32 1.442695, %v4750_v2  ;;  %v4731_v46 = vpop.xlane.xlu1 %4730  ;;  %4794 = vadd.xlane.f32.xlu1 %v10618_v1  ;;  %v8389_v2 = vpack.c.bf16 %v5666_v29, %v5665_v12 }
 0xc0e   : > { %8690 = vpow2.f32 %v4774_v35  ;;  %v4753_v10 = vsub.f32 %v10592_v33, %v4731_v46  ;;  %v4729_v45 = vpop.xlane.xlu0 %4728  ;;  %4792 = vadd.xlane.f32.xlu0 %v10620_v6  ;;  %v8393_v35 = vpack.c.bf16 %v5668_v31, %v5667_v11 }
 0xc0f   : > { %8692 = vpow2.f32 %v4772_v7  ;;  %v4752_v17 = vsub.f32 %v10594_v21, %v4729_v45  ;;  %8390 = vmatprep.subr.bf16.mxu0 %v8389_v2 }
 0xc10   : > { %v10626_v52 = vpop.eup %8682  ;;  %v4778_v27 = vmul.f32 1.442695, %v4753_v10  ;;  %8392 = vmatpush3.bf16.msra.mxu0 %v8389_v2 }
 0xc11   : > { %v10628_v48 = vpop.eup %8684  ;;  %v4776_v53 = vmul.f32 1.442695, %v4752_v17  ;;  %v4735_v8 = vpop.xlane.xlu1 %4734  ;;  %4798 = vadd.xlane.f32.xlu1 %v10626_v52  ;;  %8394 = vmatprep.subr.bf16.mxu0 %v8393_v35 }
 0xc12   : > { %8694 = vpow2.f32 %v4778_v27  ;;  %v4755_v38 = vsub.f32 %v10598_v30, %v4735_v8  ;;  %v4733_v26 = vpop.xlane.xlu0 %4732  ;;  %4796 = vadd.xlane.f32.xlu0 %v10628_v48  ;;  %v8373_v30 = vpack.c.bf16 %v7507_v3, %v4416_v34 }
 0xc13   : > { %8696 = vpow2.f32 %v4776_v53  ;;  %v4754_v33 = vsub.f32 %v10600_v63, %v4733_v26 }
 0xc14   : > { %v10634_v21 = vpop.eup %8686  ;;  %v4782_v55 = vmul.f32 1.442695, %v4755_v38  ;;  %8374 = vmatprep.subr.bf16.mxu1 %v8373_v30  ;;  %8396 = vmatpush3.bf16.msra.mxu0 %v8393_v35 }
 0xc15   : > { %v10636_v36 = vpop.eup %8688  ;;  %v4780_v62 = vmul.f32 1.442695, %v4754_v33  ;;  %v4739_v42 = vpop.xlane.xlu1 %4738  ;;  %4802 = vadd.xlane.f32.xlu1 %v10634_v21  ;;  %8376 = vmatpush3.bf16.msra.mxu1 %v8373_v30 }
 0xc16   : > { %8698 = vpow2.f32 %v4782_v55  ;;  %v4757_v37 = vsub.f32 %v10604_v23, %v4739_v42  ;;  %v4737_v61 = vpop.xlane.xlu0 %4736  ;;  %4800 = vadd.xlane.f32.xlu0 %v10636_v36  ;;  %v8377_v23 = vpack.c.bf16 %v7510_v54, %v4426_v50 }
 0xc17   : > { %8700 = vpow2.f32 %v4780_v62  ;;  %v4756_v63 = vsub.f32 %v10606_v56, %v4737_v61 }
 0xc18   : > { %v10642_v43 = vpop.eup %8690  ;;  %v4786_v25 = vmul.f32 1.442695, %v4757_v37  ;;  %8378 = vmatprep.subr.bf16.mxu1 %v8377_v23 }
 0xc19   : > { %v10644_v40 = vpop.eup %8692  ;;  %v4784_v49 = vmul.f32 1.442695, %v4756_v63  ;;  %4806 = vadd.xlane.f32.xlu1 %v10642_v43  ;;  %v4743_v18 = vpop.xlane.xlu1 %4742  ;;  %8380 = vmatpush3.bf16.msra.mxu1 %v8377_v23 }
 0xc1a   : > { %8702 = vpow2.f32 %v4786_v25  ;;  %v4759_v19 = vsub.f32 %v10610_v60, %v4743_v18  ;;  %4804 = vadd.xlane.f32.xlu0 %v10644_v40  ;;  %v4741_v56 = vpop.xlane.xlu0 %4740  ;;  %v4436_v60 = vpop.f32.mrb[157].mxu1 }
 0xc1b   : > { %8704 = vpow2.f32 %v4784_v49  ;;  %v4758_v47 = vsub.f32 %v10612_v16, %v4741_v56  ;;  %v8381_v44 = vpack.c.bf16 %v7513_v15, %v4436_v60  ;;  %v7516_v5 = vpop.f32.mrb[158].mxu1 }
 0xc1c   : > { %v10650_v20 = vpop.eup %8694  ;;  %v4790_v41 = vmul.f32 1.442695, %v4759_v19  ;;  %v4446_v24 = vpop.f32.mrb[159].mxu1 }
 0xc1d   : > { %v10652_v13 = vpop.eup %8696  ;;  %v4788_v0 = vmul.f32 1.442695, %v4758_v47  ;;  %4810 = vadd.xlane.f32.xlu1 %v10650_v20  ;;  %8382 = vmatprep.subr.bf16.mxu1 %v8381_v44  ;;  %v8385_v57 = vpack.c.bf16 %v7516_v5, %v4446_v24 }
 0xc1e   : > { %8706 = vpow2.f32 %v4790_v41  ;;  %4808 = vadd.xlane.f32.xlu0 %v10652_v13  ;;  %8384 = vmatpush3.bf16.msra.mxu1 %v8381_v44 }
 0xc1f   : > { %8708 = vpow2.f32 %v4788_v0  ;;  %8386 = vmatprep.subr.bf16.mxu1 %v8385_v57 }
 0xc20   : > { %v10656_v14 = vpop.eup %8698 }
 0xc21   : > { %v10658_v16 = vpop.eup %8700  ;;  %4814 = vadd.xlane.f32.xlu1 %v10656_v14 }
 0xc22   : > { %4812 = vadd.xlane.f32.xlu0 %v10658_v16  ;;  %8388 = vmatpush3.bf16.msra.mxu1 %v8385_v57 }
 0xc24   : > { %v10662_v22 = vpop.eup %8702 }
 0xc25   : > { %v10664_v28 = vpop.eup %8704  ;;  %4818 = vadd.xlane.f32.xlu1 %v10662_v22 }
 0xc26   : > { %4816 = vadd.xlane.f32.xlu0 %v10664_v28 }
 0xc28   : > { %v10668_v58 = vpop.eup %8706 }
 0xc29   : > { %v10670_v51 = vpop.eup %8708  ;;  %4822 = vadd.xlane.f32.xlu1 %v10668_v58 }
 0xc2a   : > { %4820 = vadd.xlane.f32.xlu0 %v10670_v51 }
 0xc9a   : > { %v4795_v32 = vpop.xlane.xlu1 %4794 }
 0xc9b   : > { %8710 = vrcp.f32 %v4795_v32  ;;  %v4793_v7 = vpop.xlane.xlu0 %4792  ;;  %v5685_v32 = vld [vmem:[%s10799_s5] ss:$0 sm:$0xff] }
 0xc9c   : > { %8712 = vrcp.f32 %v4793_v7 }
 0xc9e   : > { %v4799_v46 = vpop.xlane.xlu1 %4798 }
 0xc9f   : > { %8714 = vrcp.f32 %v4799_v46  ;;  %v4797_v9 = vpop.xlane.xlu0 %4796 }
 0xca0   : > { %8716 = vrcp.f32 %v4797_v9 }
 0xca2   : > { %v4803_v10 = vpop.xlane.xlu1 %4802 }
 0xca3   : > { %8718 = vrcp.f32 %v4803_v10  ;;  %v4801_v45 = vpop.xlane.xlu0 %4800 }
 0xca4   : > { %8720 = vrcp.f32 %v4801_v45 }
 0xca5   : > { %v8711_v17 = vpop.eup %8710 }
 0xca6   : > { %v8713_v59 = vpop.eup %8712  ;;  %v4807_v27 = vpop.xlane.xlu1 %4806  ;;  %v4841_v8 = vmul.f32 %v8711_v17, %v10618_v1 }
 0xca7   : > { %8722 = vrcp.f32 %v4807_v27  ;;  %v4805_v4 = vpop.xlane.xlu0 %4804  ;;  %v4840_v53 = vmul.f32 %v8713_v59, %v10620_v6 }
 0xca8   : > { %8724 = vrcp.f32 %v4805_v4 }
 0xca9   : > { %v8715_v39 = vpop.eup %8714  ;;  %7605 = vmatprep.mubr.f32.mxu1 %v4840_v53 }
 0xcaa   : > { %v8717_v38 = vpop.eup %8716  ;;  %v4811_v26 = vpop.xlane.xlu1 %4810  ;;  %7606 = vmatmul.mubr.f32.vlgmr.msra.gmra.mrb[160].mxu1 %v4841_v8  ;;  %v4843_v55 = vmul.f32 %v8715_v39, %v10626_v52 }
 0xcab   : > { %8726 = vrcp.f32 %v4811_v26  ;;  %v4809_v33 = vpop.xlane.xlu0 %4808  ;;  %v4842_v3 = vmul.f32 %v8717_v38, %v10628_v48 }
 0xcac   : > { %8728 = vrcp.f32 %v4809_v33 }
 0xcad   : > { %v8719_v34 = vpop.eup %8718  ;;  %7608 = vmatprep.mubr.f32.mxu1 %v4842_v3 }
 0xcae   : > { %v8721_v62 = vpop.eup %8720  ;;  %v4815_v42 = vpop.xlane.xlu1 %4814  ;;  %7609 = vmatmul.mubr.f32.gmra.mrb[162].mxu1 %v4843_v55  ;;  %v4845_v30 = vmul.f32 %v8719_v34, %v10634_v21 }
 0xcaf   : > { %8730 = vrcp.f32 %v4815_v42  ;;  %v4813_v1 = vpop.xlane.xlu0 %4812  ;;  %v4844_v6 = vmul.f32 %v8721_v62, %v10636_v36 }
 0xcb0   : > { %8732 = vrcp.f32 %v4813_v1 }
 0xcb1   : > { %v8723_v37 = vpop.eup %8722  ;;  %7611 = vmatprep.mubr.f32.mxu1 %v4844_v6 }
 0xcb2   : > { %v8725_v61 = vpop.eup %8724  ;;  %v4819_v63 = vpop.xlane.xlu1 %4818  ;;  %7612 = vmatmul.mubr.f32.gmra.mrb[164].mxu1 %v4845_v30  ;;  %v4847_v54 = vmul.f32 %v8723_v37, %v10642_v43 }
 0xcb3   : > { %8734 = vrcp.f32 %v4819_v63  ;;  %v4817_v48 = vpop.xlane.xlu0 %4816  ;;  %v4846_v52 = vmul.f32 %v8725_v61, %v10644_v40 }
 0xcb4   : > { %8736 = vrcp.f32 %v4817_v48 }
 0xcb5   : > { %v8727_v25 = vpop.eup %8726  ;;  %7614 = vmatprep.mubr.f32.mxu1 %v4846_v52 }
 0xcb6   : > { %v8729_v50 = vpop.eup %8728  ;;  %v4823_v49 = vpop.xlane.xlu1 %4822  ;;  %7615 = vmatmul.mubr.f32.gmra.mrb[166].mxu1 %v4847_v54  ;;  %v4849_v18 = vmul.f32 %v8727_v25, %v10650_v20 }
 0xcb7   : > { %8738 = vrcp.f32 %v4823_v49  ;;  %v4821_v36 = vpop.xlane.xlu0 %4820  ;;  %v4848_v21 = vmul.f32 %v8729_v50, %v10652_v13 }
 0xcb8   : > { %8740 = vrcp.f32 %v4821_v36 }
 0xcb9   : > { %v8731_v23 = vpop.eup %8730  ;;  %7617 = vmatprep.mubr.f32.mxu1 %v4848_v21 }
 0xcba   : > { %v8733_v19 = vpop.eup %8732  ;;  %7618 = vmatmul.mubr.f32.gmra.mrb[168].mxu1 %v4849_v18  ;;  %v4851_v43 = vmul.f32 %v8731_v23, %v10656_v14 }
 0xcbb   : > { %v4850_v40 = vmul.f32 %v8733_v19, %v10658_v16 }
 0xcbd   : > { %v8735_v56 = vpop.eup %8734  ;;  %7620 = vmatprep.mubr.f32.mxu1 %v4850_v40 }
 0xcbe   : > { %v8737_v47 = vpop.eup %8736  ;;  %7621 = vmatmul.mubr.f32.gmra.mrb[170].mxu1 %v4851_v43  ;;  %v4853_v0 = vmul.f32 %v8735_v56, %v10662_v22 }
 0xcbf   : > { %v4852_v41 = vmul.f32 %v8737_v47, %v10664_v28 }
 0xcc1   : > { %v8739_v13 = vpop.eup %8738  ;;  %7623 = vmatprep.mubr.f32.mxu1 %v4852_v41 }
 0xcc2   : > { %v8741_v15 = vpop.eup %8740  ;;  %7624 = vmatmul.mubr.f32.gmra.mrb[172].mxu1 %v4853_v0  ;;  %v4855_v60 = vmul.f32 %v8739_v13, %v10668_v58 }
 0xcc3   : > { %v4854_v20 = vmul.f32 %v8741_v15, %v10670_v51 }
 0xcc5   : > { %7626 = vmatprep.mubr.f32.mxu1 %v4854_v20 }
 0xcc6   : > { %7627 = vmatmul.mubr.f32.gmra.mrb[174].mxu1 %v4855_v60 }
 0xd7d   : > { %v7607_v44 = vpop.f32.mrb[160].mxu1 }
 0xd7e   : > { %v4922_v14 = vpop.f32.mrb[161].mxu1 }
 0xd7f   : > { %7637 = vmatprep.mubr.msk.f32.mxu0 %vm749_vm0, %v4922_v14 }
 0xd80   : > { %7638 = vmatmul.mubr.msk.f32.vlgmr.msra.gmra.mrb[80].mxu0 %vm749_vm0, %v7607_v44 }
 0xd81   : > { %v7610_v16 = vpop.f32.mrb[162].mxu1 }
 0xd82   : > { %v4932_v5 = vpop.f32.mrb[163].mxu1 }
 0xd83   : > { %7640 = vmatprep.mubr.msk.f32.mxu0 %vm749_vm0, %v4932_v5 }
 0xd84   : > { %7641 = vmatmul.mubr.msk.f32.gmra.mrb[82].mxu0 %vm749_vm0, %v7610_v16 }
 0xd85   : > { %v7613_v24 = vpop.f32.mrb[164].mxu1 }
 0xd86   : > { %v4942_v57 = vpop.f32.mrb[165].mxu1 }
 0xd87   : > { %7643 = vmatprep.mubr.msk.f32.mxu0 %vm749_vm0, %v4942_v57 }
 0xd88   : > { %7644 = vmatmul.mubr.msk.f32.gmra.mrb[84].mxu0 %vm749_vm0, %v7613_v24 }
 0xd89   : > { %v7616_v22 = vpop.f32.mrb[166].mxu1 }
 0xd8a   : > { %v4952_v28 = vpop.f32.mrb[167].mxu1 }
 0xd8b   : > { %7646 = vmatprep.mubr.msk.f32.mxu0 %vm749_vm0, %v4952_v28 }
 0xd8c   : > { %7647 = vmatmul.mubr.msk.f32.gmra.mrb[86].mxu0 %vm749_vm0, %v7616_v22 }
 0xd8d   : > { %v7619_v58 = vpop.f32.mrb[168].mxu1 }
 0xd8e   : > { %v4962_v51 = vpop.f32.mrb[169].mxu1 }
 0xd8f   : > { %7649 = vmatprep.mubr.msk.f32.mxu0 %vm749_vm0, %v4962_v51 }
 0xd90   : > { %7650 = vmatmul.mubr.msk.f32.gmra.mrb[88].mxu0 %vm749_vm0, %v7619_v58 }
 0xd91   : > { %v7622_v12 = vpop.f32.mrb[170].mxu1 }
 0xd92   : > { %v4972_v29 = vpop.f32.mrb[171].mxu1 }
 0xd93   : > { %7652 = vmatprep.mubr.msk.f32.mxu0 %vm749_vm0, %v4972_v29 }
 0xd94   : > { %7653 = vmatmul.mubr.msk.f32.gmra.mrb[90].mxu0 %vm749_vm0, %v7622_v12 }
 0xd95   : > { %v7625_v11 = vpop.f32.mrb[172].mxu1 }
 0xd96   : > { %v4982_v2 = vpop.f32.mrb[173].mxu1 }
 0xd97   : > { %7655 = vmatprep.mubr.msk.f32.mxu0 %vm749_vm0, %v4982_v2 }
 0xd98   : > { %7656 = vmatmul.mubr.msk.f32.gmra.mrb[92].mxu0 %vm749_vm0, %v7625_v11 }
 0xd99   : > { %v7628_v31 = vpop.f32.mrb[174].mxu1 }
 0xd9a   : > { %v4992_v35 = vpop.f32.mrb[175].mxu1 }
 0xd9b   : > { %7658 = vmatprep.mubr.msk.f32.mxu0 %vm749_vm0, %v4992_v35 }
 0xd9c   : > { %7659 = vmatmul.mubr.msk.f32.gmra.mrb[94].mxu0 %vm749_vm0, %v7628_v31 }
 0xe53   : > { %v7639_v7 = vpop.f32.mrb[80].mxu0 }
 0xe54   : > { %v5223_v46 = vadd.f32 %v7639_v7, %v5685_v32  ;;  %v5120_v9 = vpop.f32.mrb[81].mxu0 }
 0xe55   : > { %v5222_v10 = vadd.f32 %v5685_v32, %v5120_v9 }
 0xe56   : > { %5239 = vst [vmem:[%s10724_s19 + $0x8] sm:$0xff] %v5223_v46 }
 0xe57   : > { %5238 = vst [vmem:[%s10724_s19] sm:$0xff] %v5222_v10  ;;  %v7642_v45 = vpop.f32.mrb[82].mxu0 }
 0xe58   : > { %v5225_v17 = vadd.f32 %v7642_v45, %v5685_v32  ;;  %v5130_v59 = vpop.f32.mrb[83].mxu0 }
 0xe59   : > { %v5224_v27 = vadd.f32 %v5685_v32, %v5130_v59 }
 0xe5a   : > { %5241 = vst [vmem:[%s10724_s19 + $0x18] sm:$0xff] %v5225_v17 }
 0xe5b   : > { %5240 = vst [vmem:[%s10724_s19 + $0x10] sm:$0xff] %v5224_v27  ;;  %v7645_v4 = vpop.f32.mrb[84].mxu0 }
 0xe5c   : > { %v5227_v53 = vadd.f32 %v7645_v4, %v5685_v32  ;;  %v5140_v8 = vpop.f32.mrb[85].mxu0 }
 0xe5d   : > { %v5226_v39 = vadd.f32 %v5685_v32, %v5140_v8 }
 0xe5e   : > { %5243 = vst [vmem:[%s10724_s19 + $0x28] sm:$0xff] %v5227_v53 }
 0xe5f   : > { %5242 = vst [vmem:[%s10724_s19 + $0x20] sm:$0xff] %v5226_v39  ;;  %v7648_v38 = vpop.f32.mrb[86].mxu0 }
 0xe60   : > { %v5229_v26 = vadd.f32 %v7648_v38, %v5685_v32  ;;  %v5150_v33 = vpop.f32.mrb[87].mxu0 }
 0xe61   : > { %v5228_v3 = vadd.f32 %v5685_v32, %v5150_v33 }
 0xe62   : > { %5245 = vst [vmem:[%s10724_s19 + $0x38] sm:$0xff] %v5229_v26 }
 0xe63   : > { %5244 = vst [vmem:[%s10724_s19 + $0x30] sm:$0xff] %v5228_v3  ;;  %v7651_v55 = vpop.f32.mrb[88].mxu0 }
 0xe64   : > { %v5231_v34 = vadd.f32 %v7651_v55, %v5685_v32  ;;  %v5160_v62 = vpop.f32.mrb[89].mxu0 }
 0xe65   : > { %v5230_v42 = vadd.f32 %v5685_v32, %v5160_v62 }
 0xe66   : > { %5247 = vst [vmem:[%s10724_s19 + $0x48] sm:$0xff] %v5231_v34 }
 0xe67   : > { %5246 = vst [vmem:[%s10724_s19 + $0x40] sm:$0xff] %v5230_v42  ;;  %v7654_v1 = vpop.f32.mrb[90].mxu0 }
 0xe68   : > { %v5233_v6 = vadd.f32 %v7654_v1, %v5685_v32  ;;  %v5170_v30 = vpop.f32.mrb[91].mxu0 }
 0xe69   : > { %v5232_v37 = vadd.f32 %v5685_v32, %v5170_v30 }
 0xe6a   : > { %5249 = vst [vmem:[%s10724_s19 + $0x58] sm:$0xff] %v5233_v6 }
 0xe6b   : > { %5248 = vst [vmem:[%s10724_s19 + $0x50] sm:$0xff] %v5232_v37  ;;  %v7657_v61 = vpop.f32.mrb[92].mxu0 }
 0xe6c   : > { %v5235_v63 = vadd.f32 %v7657_v61, %v5685_v32  ;;  %v5180_v48 = vpop.f32.mrb[93].mxu0 }
 0xe6d   : > { %v5234_v52 = vadd.f32 %v5685_v32, %v5180_v48 }
 0xe6e   : > { %5251 = vst [vmem:[%s10724_s19 + $0x68] sm:$0xff] %v5235_v63 }
 0xe6f   : > { %5250 = vst [vmem:[%s10724_s19 + $0x60] sm:$0xff] %v5234_v52  ;;  %v7660_v54 = vpop.f32.mrb[94].mxu0 }
 0xe70   : > { %v5237_v25 = vadd.f32 %v7660_v54, %v5685_v32  ;;  %v5190_v50 = vpop.f32.mrb[95].mxu0 }
 0xe71   : > { %v5236_v49 = vadd.f32 %v5685_v32, %v5190_v50 }
 0xe72   : > { %5253 = vst [vmem:[%s10724_s19 + $0x78] sm:$0xff] %v5237_v25 }
 0xe73   : > { %5252 = vst [vmem:[%s10724_s19 + $0x70] sm:$0xff] %v5236_v49 }
 0xe74   : > { %8787 = shalt.err (!%p8784_p3)
}
 0xe75   : > { %s8788_s14 = scalar_lea.hbm %s10745_s29, 2048  ;;  %s8792_s17 = scalar_lea.hbm %s10800_s6, 4096 }
 0xe76   : > { %p8789_p4 = scmp.ne.s32.totalorder %s10745_s29, %s8788_s14  ;;  %p8793_p9 = scmp.lt.u32.totalorder %s10745_s29, %s10800_s6 }
 0xe77   : > { %p8794_p10 = scmp.lt.u32.totalorder %s8792_s17, %s8788_s14  ;;  %p8796_p12 = scmp.lt.u32.totalorder %s8788_s14, %s10745_s29 }
 0xe78   : > { %p8790_p7 = pnand %p8789_p4, %p8914_p5 }
 0xe79   : > { %p8795_p11 = por %p8794_p10, %p8793_p9 }
 0xe7a   : > { %p8791_p8 = pneg %p8790_p7 }
 0xe7b   : > { %p8797_p13 = por %p8796_p12, %p8795_p11 }
 0xe7d   : > { %p8798_p0 = pnand %p8797_p13, %p8791_p8 }
 0xe7f   : > { %8801 = shalt.err (!%p8798_p0)
}
 0xe80   : > { %s8839_s20 = smov 128   ;;  %s8840_s28 = smov 8  }
 0xe81   : > { %8445 = dma.vmem_to_hbm [thread:$0]  (%p8914_p5), %s10747_s26, 2048, %s10745_s29, %s10753_s25, %s8839_s20, %s8839_s20, %s8840_s28  }
 0xe82 PF: > { %p8451_p1 = scmp.ge.s32.totalorder %s8836_s24, 2  ;;  %s5283_s10 = sand.u32 1, %s8824_s21  }
 0xe83   : > { %s5284_s9 = scalar_lea.sflag [#allocation3], %s5283_s10 }
 0xe84   : > { %p8448_p2 = pnand %p8451_p1, %p8918_p6 }
 0xe86   : > { %8819 = dma.done.wait (!%p8448_p2), %s5284_s9, 2048  }
 0xe87   : > { %8821 = vsyncadd (!%p8448_p2), %s5284_s9, 4294965248  ;;  %p16_p3 = scmp.ge.s32.totalorder %s8901_s27, 4   ;;  %s10805_s21 = smov %s8828_s22 }
 0xe88   : > { %s10806_s22 = smov %s8832_s23  ;;  %s10807_s23 = smov %s8912_s30 }
 0xe89   : > { %s10808_s24 = smov %s8901_s27  ;;  %18 = sbr.rel (!%p16_p3) target bundleno = 3 (0x3), region = 91 }
 0xe90   :  { %5289 = vsyncpa [#allocation3], 1 }
 0xe91   :  { %5291 = vsyncpa [#allocation3 + $0x1], 1 }

</bundles_post_ra>
